<compile_context>
chip_gen: v5e
topology: v5e:2x2
jax: 0.10.0
libtpu: 0.0.40
codegen_flags: <defaults>
</compile_context>

<pallas_src>
import functools

import jax
import jax.numpy as jnp
from jax.experimental import pallas as pl
from jax.experimental.pallas import tpu as pltpu  # noqa: F401  (VMEM-resident by default; no tiling needed)


# ----------------------------------------------------------------------------
# Fused kernel: CNN branch + bidirectional multi-layer GRU + final FC.
# All refs are whole-array VMEM blocks (no grid).
# ----------------------------------------------------------------------------
def fused_forward_kernel(*refs, T, H, num_layers):
    f32 = jnp.float32
    (xpad_ref, x_ref, bwe_ref, bwo_ref, cbias_ref, gmat_ref, bmat_ref,
     gamma_ref, beta_ref) = refs[:9]
    layer_refs = refs[9:9 + 5 * num_layers]
    wc_ref, wg_ref, fcb_ref = refs[9 + 5 * num_layers:12 + 5 * num_layers]
    out_ref = refs[12 + 5 * num_layers]

    # ---- CNN branch -------------------------------------------------------
    # conv1d(1->10, k=9, s=2, p=4) as one matmul per maxpool phase (even/odd
    # conv positions), maxpool(2,2) = max of the two phases, BatchNorm1d(10)
    # with batch statistics (fresh module => training-mode forward), ReLU.
    # Column order of the result is already c*L_pool + l (PyTorch view(T,-1)).
    xp = xpad_ref[...]                                                # (T, F+8)
    conv_e = jnp.dot(xp, bwe_ref[...], preferred_element_type=f32)    # (T, 10*Lp)
    conv_o = jnp.dot(xp, bwo_ref[...], preferred_element_type=f32)
    pooled = jnp.maximum(conv_e, conv_o) + cbias_ref[...]
    colsum = jnp.sum(pooled, axis=0, keepdims=True)                   # (1, 10*Lp)
    mean_c = jnp.dot(colsum, gmat_ref[...], preferred_element_type=f32)      # (1, 10)
    mean_full = jnp.dot(mean_c, bmat_ref[...], preferred_element_type=f32)   # (1, 10*Lp)
    cent = pooled - mean_full
    var_c = jnp.dot(jnp.sum(cent * cent, axis=0, keepdims=True), gmat_ref[...],
                    preferred_element_type=f32)                       # (1, 10) biased var
    scale_c = gamma_ref[...] * jax.lax.rsqrt(var_c + 1e-5)
    scale_full = jnp.dot(scale_c, bmat_ref[...], preferred_element_type=f32)
    cnn_flat = jnp.maximum(cent * scale_full + beta_ref[...], 0.0)    # (T, 10*Lp)

    # ---- bidirectional GRU stack, both directions fused per step ----------
    # Gate column layout (width 6H): [r_f | r_b | z_f | z_b | n_f | n_b]
    # Hidden state layout (width 2H): [h_f | h_b]
    lane = jax.lax.broadcasted_iota(jnp.int32, (1, 2 * H), 1)
    mask_f = (lane < H).astype(f32)
    mask_b = 1.0 - mask_f
    row_ids = jax.lax.broadcasted_iota(jnp.int32, (T, 1), 0)
    row_sel = [(row_ids == t).astype(f32) for t in range(T)]

    seq = x_ref[...]                                                  # (T, F_in)
    for l in range(num_layers):
        wfe, wbe, whh, b6, bhn = layer_refs[5 * l:5 * l + 5]
        # Input-gate pre-activations for all time steps, both directions.
        # b_ih (all gates) and b_hh (r,z gates) are folded into b6 already.
        gi_f = jnp.dot(seq, wfe[...], preferred_element_type=f32) + b6[...]   # (T, 6H)
        gi_b = jnp.dot(seq, wbe[...], preferred_element_type=f32)             # (T, 6H)
        whh_v = whh[...]                                              # (2H, 6H) block-diag
        bhn_v = bhn[...]                                              # (1, 2H)  [bhn_f|bhn_b]

        h = jnp.zeros((1, 2 * H), f32)                                # h0 = 0
        h_rows = []
        for s in range(T):                                            # fully unrolled
            # fwd consumes time s, bwd consumes time T-1-s
            gi = gi_f[s:s + 1, :] + gi_b[T - 1 - s:T - s, :]
            gh = jnp.dot(h, whh_v, preferred_element_type=f32)        # one MXU push / step
            r = jax.nn.sigmoid(gi[:, 0:2 * H] + gh[:, 0:2 * H])
            z = jax.nn.sigmoid(gi[:, 2 * H:4 * H] + gh[:, 2 * H:4 * H])
            n = jnp.tanh(gi[:, 4 * H:6 * H] + r * (gh[:, 4 * H:6 * H] + bhn_v))
            h = (1.0 - z) * n + z * h
            h_rows.append(h)

        # Re-assemble in original time order: row t = [h_f(t) | h_b(t)].
        acc = jnp.zeros((T, 2 * H), f32)
        for t in range(T):
            blend = h_rows[t] * mask_f + h_rows[T - 1 - t] * mask_b   # (1, 2H)
            acc = acc + row_sel[t] * blend                            # masked scatter-add
        seq = acc                                                     # next layer input

    # ---- final FC: out = [cnn_flat | gru_out] @ fc_w.T + fc_b --------------
    out_ref[...] = (jnp.dot(cnn_flat, wc_ref[...], preferred_element_type=f32)
                    + jnp.dot(seq, wg_ref[...], preferred_element_type=f32)
                    + fcb_ref[...])


# ----------------------------------------------------------------------------
# Wrapper-side (plain JAX) parameter re-packing for the fused kernel.
# ----------------------------------------------------------------------------
def _build_conv_big_weights(conv_w, F, L_pool):
    # BigW_phase[j, c*L_pool + l] = w[c, j - 4l - 2*phase] for the 9 valid taps,
    # so that  x_pad @ BigW_phase  gives the stride-2 conv outputs at positions
    # 2l (+phase) directly in channel-major (c*L_pool + l) column order.
    w_ck = conv_w[:, 0, :]                                            # (10, 9)
    c_out = w_ck.shape[0]
    f_pad = F + 8
    jj = jnp.arange(f_pad)[:, None]
    ll = jnp.arange(L_pool)[None, :]

    def build(phase):
        k = jj - 4 * ll - 2 * phase                                   # (f_pad, L_pool)
        valid = (k >= 0) & (k <= 8)
        kc = jnp.clip(k, 0, 8)
        w_sel = w_ck[:, kc]                                           # (10, f_pad, L_pool)
        big = jnp.where(valid[None, :, :], w_sel, 0.0)
        return jnp.transpose(big, (1, 0, 2)).reshape(f_pad, c_out * L_pool)

    return build(0), build(1)


def _prep_gru_layer(pf, pb, H):
    # Build the fused/extended weight blocks for one bidirectional GRU layer.
    def parts(p):
        w_ih, w_hh, b_ih, b_hh = p["w_ih"], p["w_hh"], p["b_ih"], p["b_hh"]
        wi = [w_ih[i * H:(i + 1) * H].T for i in range(3)]            # (F_in, H) r,z,n
        wh = [w_hh[i * H:(i + 1) * H].T for i in range(3)]            # (H, H)   r,z,n
        bi = [b_ih[i * H:(i + 1) * H] for i in range(3)]
        bh = [b_hh[i * H:(i + 1) * H] for i in range(3)]
        return wi, wh, bi, bh

    wif, whf, bif, bhf = parts(pf)
    wib, whb, bib, bhb = parts(pb)
    f_in = wif[0].shape[0]
    zF = jnp.zeros((f_in, H), jnp.float32)
    zH = jnp.zeros((H, H), jnp.float32)
    # column blocks: [r_f | r_b | z_f | z_b | n_f | n_b]
    wih_ext_f = jnp.concatenate([wif[0], zF, wif[1], zF, wif[2], zF], axis=1)
    wih_ext_b = jnp.concatenate([zF, wib[0], zF, wib[1], zF, wib[2]], axis=1)
    whh_block = jnp.concatenate(
        [jnp.concatenate([whf[0], zH, whf[1], zH, whf[2], zH], axis=1),
         jnp.concatenate([zH, whb[0], zH, whb[1], zH, whb[2]], axis=1)], axis=0)
    bias6h = jnp.concatenate([bif[0] + bhf[0], bib[0] + bhb[0],
                              bif[1] + bhf[1], bib[1] + bhb[1],
                              bif[2], bib[2]]).reshape(1, 6 * H)
    bhn_cat = jnp.concatenate([bhf[2], bhb[2]]).reshape(1, 2 * H)
    return wih_ext_f, wih_ext_b, whh_block, bias6h, bhn_cat


@functools.partial(jax.jit, static_argnums=(2, 3))
def pca_cnn_bigru_forward(x, params, hidden_size, num_layers):
    B, T, F = x.shape
    assert B == 1, "PyTorch forward's reshape (B,T,F)->(T,1,F) requires B == 1"
    H = hidden_size
    L_out = (F + 2 * 4 - 9) // 2 + 1
    L_pool = (L_out - 2) // 2 + 1
    c_conv = params["conv1_w"].shape[0]
    n_cnn_feat = c_conv * L_pool
    num_classes = params["fc_w"].shape[0]

    xsig = x.reshape(T, F)
    xpad = jnp.pad(xsig, ((0, 0), (4, 4)))                            # (T, F+8)

    bigw_e, bigw_o = _build_conv_big_weights(params["conv1_w"], F, L_pool)
    cbias = jnp.repeat(params["conv1_b"], L_pool).reshape(1, n_cnn_feat)
    gmat = jnp.repeat(jnp.eye(c_conv, dtype=jnp.float32), L_pool, axis=0) / (T * L_pool)
    bmat = jnp.repeat(jnp.eye(c_conv, dtype=jnp.float32), L_pool, axis=1)
    gamma = params["bn1_g"].reshape(1, c_conv)
    beta_full = jnp.repeat(params["bn1_b"], L_pool).reshape(1, n_cnn_feat)

    operands = [xpad, xsig, bigw_e, bigw_o, cbias, gmat, bmat, gamma, beta_full]
    for l in range(num_layers):
        operands += list(_prep_gru_layer(params["gru"][l]["fwd"],
                                         params["gru"][l]["bwd"], H))
    operands += [params["fc_w"][:, :n_cnn_feat].T,                    # (10*Lp, C)
                 params["fc_w"][:, n_cnn_feat:].T,                    # (2H, C)
                 params["fc_b"].reshape(1, num_classes)]

    kernel = functools.partial(fused_forward_kernel, T=T, H=H, num_layers=num_layers)
    return pl.pallas_call(
        kernel,
        out_shape=jax.ShapeDtypeStruct((T, num_classes), jnp.float32),
    )(*operands)


# ----------------------------------------------------------------------------
# Deterministic parameter initialization (shapes from the module's __init__).
# nn.Dropout and self.fc1 are defined but never used in forward -> omitted.
# ----------------------------------------------------------------------------
def init_params(key, input_size, hidden_size, num_layers, num_classes):
    keys = iter(jax.random.split(key, 64))

    def unif(k, shape, scale):
        return jax.random.uniform(k, shape, jnp.float32, -scale, scale)

    p = {}
    p["conv1_w"] = unif(next(keys), (10, 1, 9), 1.0 / 3.0)
    p["conv1_b"] = unif(next(keys), (10,), 1.0 / 3.0)
    p["bn1_g"] = jnp.ones((10,), jnp.float32)
    p["bn1_b"] = jnp.zeros((10,), jnp.float32)
    kh = 1.0 / (hidden_size ** 0.5)
    gru = []
    for l in range(num_layers):
        in_l = input_size if l == 0 else 2 * hidden_size
        layer = {}
        for d in ("fwd", "bwd"):
            layer[d] = {
                "w_ih": unif(next(keys), (3 * hidden_size, in_l), kh),
                "w_hh": unif(next(keys), (3 * hidden_size, hidden_size), kh),
                "b_ih": unif(next(keys), (3 * hidden_size,), kh),
                "b_hh": unif(next(keys), (3 * hidden_size,), kh),
            }
        gru.append(layer)
    p["gru"] = gru
    kf = 1.0 / (316 ** 0.5)
    p["fc_w"] = unif(next(keys), (num_classes, 316), kf)
    p["fc_b"] = unif(next(keys), (num_classes,), kf)
    return p


# ----------------------------------------------------------------------------
# Pure-JAX reference (same math) used as a correctness check.
# ----------------------------------------------------------------------------
def reference_forward(x, params, hidden_size, num_layers):
    B, T, F = x.shape
    xp = jnp.pad(x.reshape(T, F), ((0, 0), (4, 4)))
    L_out = (F + 8 - 9) // 2 + 1
    idx = (jnp.arange(L_out) * 2)[:, None] + jnp.arange(9)[None, :]
    patches = xp[:, idx]                                              # (T, L_out, 9)
    conv = jnp.einsum("tok,ck->tco", patches, params["conv1_w"][:, 0, :]) \
        + params["conv1_b"][None, :, None]                            # (T, 10, L_out)
    L_pool = (L_out - 2) // 2 + 1
    pooled = conv[:, :, :2 * L_pool].reshape(T, 10, L_pool, 2).max(axis=-1)
    mean = pooled.mean(axis=(0, 2), keepdims=True)
    var = ((pooled - mean) ** 2).mean(axis=(0, 2), keepdims=True)
    y = (pooled - mean) / jnp.sqrt(var + 1e-5) * params["bn1_g"][None, :, None] \
        + params["bn1_b"][None, :, None]
    x1_flat = jnp.maximum(y, 0.0).reshape(T, -1)

    H = hidden_size

    def gru_dir(xs, pd):
        def step(h, x_t):
            gi = pd["w_ih"] @ x_t + pd["b_ih"]
            gh = pd["w_hh"] @ h + pd["b_hh"]
            r = jax.nn.sigmoid(gi[:H] + gh[:H])
            z = jax.nn.sigmoid(gi[H:2 * H] + gh[H:2 * H])
            n = jnp.tanh(gi[2 * H:] + r * gh[2 * H:])
            hn = (1.0 - z) * n + z * h
            return hn, hn
        _, ys = jax.lax.scan(step, jnp.zeros((H,), jnp.float32), xs)
        return ys

    seq = x.reshape(T, F)
    for l in range(num_layers):
        f = gru_dir(seq, params["gru"][l]["fwd"])
        b = gru_dir(seq[::-1], params["gru"][l]["bwd"])[::-1]
        seq = jnp.concatenate([f, b], axis=-1)
    feats = jnp.concatenate([x1_flat, seq], axis=1)
    return feats @ params["fc_w"].T + params["fc_b"]


if __name__ == "__main__":
    # input_size=120, hidden_size=8 -> CNN features 10*30=300, GRU 2*8=16,
    # 300 + 16 = 316 which matches nn.Linear(316, num_classes).
    input_size, hidden_size, num_layers, num_classes = 120, 8, 2, 5
    T = 8
    key = jax.random.PRNGKey(0)
    kx, kp = jax.random.split(key)
    x = jax.random.normal(kx, (1, T, input_size), jnp.float32)        # (B=1, T, input_size)
    params = init_params(kp, input_size, hidden_size, num_layers, num_classes)

    out = pca_cnn_bigru_forward(x, params, hidden_size, num_layers)
    out = jax.block_until_ready(out)
    ref = jax.block_until_ready(reference_forward(x, params, hidden_size, num_layers))

    assert out.shape == (T, num_classes), out.shape
    err = float(jnp.max(jnp.abs(out - ref)))
    assert err < 1e-4, f"max abs err {err}"
    print("KERNEL_OK")
</pallas_src>

<mosaic_0001>
module attributes {stable_mosaic.version = 11 : i64} {
  func.func @fused_forward_kernel(%arg0: memref<8x128xf32, #tpu.memory_space<vmem>>, %arg1: memref<8x120xf32, #tpu.memory_space<vmem>>, %arg2: memref<128x300xf32, #tpu.memory_space<vmem>>, %arg3: memref<128x300xf32, #tpu.memory_space<vmem>>, %arg4: memref<1x300xf32, #tpu.memory_space<vmem>>, %arg5: memref<300x10xf32, #tpu.memory_space<vmem>>, %arg6: memref<10x300xf32, #tpu.memory_space<vmem>>, %arg7: memref<1x10xf32, #tpu.memory_space<vmem>>, %arg8: memref<1x300xf32, #tpu.memory_space<vmem>>, %arg9: memref<120x48xf32, #tpu.memory_space<vmem>>, %arg10: memref<120x48xf32, #tpu.memory_space<vmem>>, %arg11: memref<16x48xf32, #tpu.memory_space<vmem>>, %arg12: memref<1x48xf32, #tpu.memory_space<vmem>>, %arg13: memref<1x16xf32, #tpu.memory_space<vmem>>, %arg14: memref<16x48xf32, #tpu.memory_space<vmem>>, %arg15: memref<16x48xf32, #tpu.memory_space<vmem>>, %arg16: memref<16x48xf32, #tpu.memory_space<vmem>>, %arg17: memref<1x48xf32, #tpu.memory_space<vmem>>, %arg18: memref<1x16xf32, #tpu.memory_space<vmem>>, %arg19: memref<300x5xf32, #tpu.memory_space<vmem>>, %arg20: memref<16x5xf32, #tpu.memory_space<vmem>>, %arg21: memref<1x5xf32, #tpu.memory_space<vmem>>, %arg22: memref<8x5xf32, #tpu.memory_space<vmem>>) attributes {dimension_semantics = [], scalar_prefetch = 0 : i64, scratch_operands = 0 : i64, tpu.core_type = #tpu.core_type<tc>} {
    %c0 = arith.constant 0 : index
    %c0_0 = arith.constant 0 : index
    %0 = vector.load %arg0[%c0, %c0_0] : memref<8x128xf32, #tpu.memory_space<vmem>>, vector<8x128xf32>
    %c0_1 = arith.constant 0 : index
    %c0_2 = arith.constant 0 : index
    %1 = vector.load %arg2[%c0_1, %c0_2] : memref<128x300xf32, #tpu.memory_space<vmem>>, vector<128x300xf32>
    %cst = arith.constant dense<0.000000e+00> : vector<8x300xf32>
    %2 = tpu.matmul %0, %1, %cst {dimension_numbers = #tpu.dot_dimension_numbers<[1], [0], [0], [1], [0, 0, 1, 1], [], []>} : vector<8x128xf32>, vector<128x300xf32>, vector<8x300xf32> -> vector<8x300xf32>
    %c0_3 = arith.constant 0 : index
    %c0_4 = arith.constant 0 : index
    %3 = vector.load %arg3[%c0_3, %c0_4] : memref<128x300xf32, #tpu.memory_space<vmem>>, vector<128x300xf32>
    %cst_5 = arith.constant dense<0.000000e+00> : vector<8x300xf32>
    %4 = tpu.matmul %0, %3, %cst_5 {dimension_numbers = #tpu.dot_dimension_numbers<[1], [0], [0], [1], [0, 0, 1, 1], [], []>} : vector<8x128xf32>, vector<128x300xf32>, vector<8x300xf32> -> vector<8x300xf32>
    %5 = arith.maximumf %2, %4 : vector<8x300xf32>
    %c0_6 = arith.constant 0 : index
    %c0_7 = arith.constant 0 : index
    %6 = vector.load %arg4[%c0_6, %c0_7] : memref<1x300xf32, #tpu.memory_space<vmem>>, vector<1x300xf32>
    %7 = vector.broadcast %6 : vector<1x300xf32> to vector<8x300xf32>
    %8 = arith.addf %5, %7 : vector<8x300xf32>
    %cst_8 = arith.constant dense<0.000000e+00> : vector<300xf32>
    %9 = vector.multi_reduction <add>, %8, %cst_8 [0] : vector<8x300xf32> to vector<300xf32>
    %10 = vector.shape_cast %9 : vector<300xf32> to vector<1x300xf32>
    %c0_9 = arith.constant 0 : index
    %c0_10 = arith.constant 0 : index
    %11 = vector.load %arg5[%c0_9, %c0_10] : memref<300x10xf32, #tpu.memory_space<vmem>>, vector<300x10xf32>
    %cst_11 = arith.constant dense<0.000000e+00> : vector<1x10xf32>
    %12 = tpu.matmul %10, %11, %cst_11 {dimension_numbers = #tpu.dot_dimension_numbers<[1], [0], [0], [1], [0, 0, 1, 1], [], []>} : vector<1x300xf32>, vector<300x10xf32>, vector<1x10xf32> -> vector<1x10xf32>
    %c0_12 = arith.constant 0 : index
    %c0_13 = arith.constant 0 : index
    %13 = vector.load %arg6[%c0_12, %c0_13] : memref<10x300xf32, #tpu.memory_space<vmem>>, vector<10x300xf32>
    %cst_14 = arith.constant dense<0.000000e+00> : vector<1x300xf32>
    %14 = tpu.matmul %12, %13, %cst_14 {dimension_numbers = #tpu.dot_dimension_numbers<[1], [0], [0], [1], [0, 0, 1, 1], [], []>} : vector<1x10xf32>, vector<10x300xf32>, vector<1x300xf32> -> vector<1x300xf32>
    %15 = vector.broadcast %14 : vector<1x300xf32> to vector<8x300xf32>
    %16 = arith.subf %8, %15 : vector<8x300xf32>
    %17 = arith.mulf %16, %16 : vector<8x300xf32>
    %cst_15 = arith.constant dense<0.000000e+00> : vector<300xf32>
    %18 = vector.multi_reduction <add>, %17, %cst_15 [0] : vector<8x300xf32> to vector<300xf32>
    %19 = vector.shape_cast %18 : vector<300xf32> to vector<1x300xf32>
    %c0_16 = arith.constant 0 : index
    %c0_17 = arith.constant 0 : index
    %20 = vector.load %arg5[%c0_16, %c0_17] : memref<300x10xf32, #tpu.memory_space<vmem>>, vector<300x10xf32>
    %cst_18 = arith.constant dense<0.000000e+00> : vector<1x10xf32>
    %21 = tpu.matmul %19, %20, %cst_18 {dimension_numbers = #tpu.dot_dimension_numbers<[1], [0], [0], [1], [0, 0, 1, 1], [], []>} : vector<1x300xf32>, vector<300x10xf32>, vector<1x10xf32> -> vector<1x10xf32>
    %c0_19 = arith.constant 0 : index
    %c0_20 = arith.constant 0 : index
    %22 = vector.load %arg7[%c0_19, %c0_20] : memref<1x10xf32, #tpu.memory_space<vmem>>, vector<1x10xf32>
    %cst_21 = arith.constant 9.99999974E-6 : f32
    %23 = vector.broadcast %cst_21 : f32 to vector<1x10xf32>
    %24 = arith.addf %21, %23 : vector<1x10xf32>
    %25 = math.rsqrt %24 : vector<1x10xf32>
    %26 = arith.mulf %22, %25 : vector<1x10xf32>
    %c0_22 = arith.constant 0 : index
    %c0_23 = arith.constant 0 : index
    %27 = vector.load %arg6[%c0_22, %c0_23] : memref<10x300xf32, #tpu.memory_space<vmem>>, vector<10x300xf32>
    %cst_24 = arith.constant dense<0.000000e+00> : vector<1x300xf32>
    %28 = tpu.matmul %26, %27, %cst_24 {dimension_numbers = #tpu.dot_dimension_numbers<[1], [0], [0], [1], [0, 0, 1, 1], [], []>} : vector<1x10xf32>, vector<10x300xf32>, vector<1x300xf32> -> vector<1x300xf32>
    %29 = vector.broadcast %28 : vector<1x300xf32> to vector<8x300xf32>
    %30 = arith.mulf %16, %29 : vector<8x300xf32>
    %c0_25 = arith.constant 0 : index
    %c0_26 = arith.constant 0 : index
    %31 = vector.load %arg8[%c0_25, %c0_26] : memref<1x300xf32, #tpu.memory_space<vmem>>, vector<1x300xf32>
    %32 = vector.broadcast %31 : vector<1x300xf32> to vector<8x300xf32>
    %33 = arith.addf %30, %32 : vector<8x300xf32>
    %cst_27 = arith.constant 0.000000e+00 : f32
    %34 = vector.broadcast %cst_27 : f32 to vector<8x300xf32>
    %35 = arith.maximumf %33, %34 : vector<8x300xf32>
    %36 = tpu.iota {dimensions = array<i32: 1>} : vector<1x16xi32>
    %c8_i32 = arith.constant 8 : i32
    %37 = vector.broadcast %c8_i32 : i32 to vector<1x16xi32>
    %38 = arith.cmpi slt, %36, %37 : vector<1x16xi32>
    %39 = arith.extui %38 : vector<1x16xi1> to vector<1x16xi32>
    %40 = arith.sitofp %39 : vector<1x16xi32> to vector<1x16xf32>
    %cst_28 = arith.constant 1.000000e+00 : f32
    %41 = vector.broadcast %cst_28 : f32 to vector<1x16xf32>
    %42 = arith.subf %41, %40 : vector<1x16xf32>
    %43 = tpu.iota {dimensions = array<i32: 0>} : vector<8x1xi32>
    %c0_i32 = arith.constant 0 : i32
    %44 = vector.broadcast %c0_i32 : i32 to vector<8x1xi32>
    %45 = arith.cmpi eq, %43, %44 : vector<8x1xi32>
    %46 = arith.extui %45 : vector<8x1xi1> to vector<8x1xi32>
    %47 = arith.sitofp %46 : vector<8x1xi32> to vector<8x1xf32>
    %c1_i32 = arith.constant 1 : i32
    %48 = vector.broadcast %c1_i32 : i32 to vector<8x1xi32>
    %49 = arith.cmpi eq, %43, %48 : vector<8x1xi32>
    %50 = arith.extui %49 : vector<8x1xi1> to vector<8x1xi32>
    %51 = arith.sitofp %50 : vector<8x1xi32> to vector<8x1xf32>
    %c2_i32 = arith.constant 2 : i32
    %52 = vector.broadcast %c2_i32 : i32 to vector<8x1xi32>
    %53 = arith.cmpi eq, %43, %52 : vector<8x1xi32>
    %54 = arith.extui %53 : vector<8x1xi1> to vector<8x1xi32>
    %55 = arith.sitofp %54 : vector<8x1xi32> to vector<8x1xf32>
    %c3_i32 = arith.constant 3 : i32
    %56 = vector.broadcast %c3_i32 : i32 to vector<8x1xi32>
    %57 = arith.cmpi eq, %43, %56 : vector<8x1xi32>
    %58 = arith.extui %57 : vector<8x1xi1> to vector<8x1xi32>
    %59 = arith.sitofp %58 : vector<8x1xi32> to vector<8x1xf32>
    %c4_i32 = arith.constant 4 : i32
    %60 = vector.broadcast %c4_i32 : i32 to vector<8x1xi32>
    %61 = arith.cmpi eq, %43, %60 : vector<8x1xi32>
    %62 = arith.extui %61 : vector<8x1xi1> to vector<8x1xi32>
    %63 = arith.sitofp %62 : vector<8x1xi32> to vector<8x1xf32>
    %c5_i32 = arith.constant 5 : i32
    %64 = vector.broadcast %c5_i32 : i32 to vector<8x1xi32>
    %65 = arith.cmpi eq, %43, %64 : vector<8x1xi32>
    %66 = arith.extui %65 : vector<8x1xi1> to vector<8x1xi32>
    %67 = arith.sitofp %66 : vector<8x1xi32> to vector<8x1xf32>
    %c6_i32 = arith.constant 6 : i32
    %68 = vector.broadcast %c6_i32 : i32 to vector<8x1xi32>
    %69 = arith.cmpi eq, %43, %68 : vector<8x1xi32>
    %70 = arith.extui %69 : vector<8x1xi1> to vector<8x1xi32>
    %71 = arith.sitofp %70 : vector<8x1xi32> to vector<8x1xf32>
    %c7_i32 = arith.constant 7 : i32
    %72 = vector.broadcast %c7_i32 : i32 to vector<8x1xi32>
    %73 = arith.cmpi eq, %43, %72 : vector<8x1xi32>
    %74 = arith.extui %73 : vector<8x1xi1> to vector<8x1xi32>
    %75 = arith.sitofp %74 : vector<8x1xi32> to vector<8x1xf32>
    %c0_29 = arith.constant 0 : index
    %c0_30 = arith.constant 0 : index
    %76 = vector.load %arg1[%c0_29, %c0_30] : memref<8x120xf32, #tpu.memory_space<vmem>>, vector<8x120xf32>
    %c0_31 = arith.constant 0 : index
    %c0_32 = arith.constant 0 : index
    %77 = vector.load %arg9[%c0_31, %c0_32] : memref<120x48xf32, #tpu.memory_space<vmem>>, vector<120x48xf32>
    %cst_33 = arith.constant dense<0.000000e+00> : vector<8x48xf32>
    %78 = tpu.matmul %76, %77, %cst_33 {dimension_numbers = #tpu.dot_dimension_numbers<[1], [0], [0], [1], [0, 0, 1, 1], [], []>} : vector<8x120xf32>, vector<120x48xf32>, vector<8x48xf32> -> vector<8x48xf32>
    %c0_34 = arith.constant 0 : index
    %c0_35 = arith.constant 0 : index
    %79 = vector.load %arg12[%c0_34, %c0_35] : memref<1x48xf32, #tpu.memory_space<vmem>>, vector<1x48xf32>
    %80 = vector.broadcast %79 : vector<1x48xf32> to vector<8x48xf32>
    %81 = arith.addf %78, %80 : vector<8x48xf32>
    %c0_36 = arith.constant 0 : index
    %c0_37 = arith.constant 0 : index
    %82 = vector.load %arg10[%c0_36, %c0_37] : memref<120x48xf32, #tpu.memory_space<vmem>>, vector<120x48xf32>
    %cst_38 = arith.constant dense<0.000000e+00> : vector<8x48xf32>
    %83 = tpu.matmul %76, %82, %cst_38 {dimension_numbers = #tpu.dot_dimension_numbers<[1], [0], [0], [1], [0, 0, 1, 1], [], []>} : vector<8x120xf32>, vector<120x48xf32>, vector<8x48xf32> -> vector<8x48xf32>
    %c0_39 = arith.constant 0 : index
    %c0_40 = arith.constant 0 : index
    %84 = vector.load %arg11[%c0_39, %c0_40] : memref<16x48xf32, #tpu.memory_space<vmem>>, vector<16x48xf32>
    %c0_41 = arith.constant 0 : index
    %c0_42 = arith.constant 0 : index
    %85 = vector.load %arg13[%c0_41, %c0_42] : memref<1x16xf32, #tpu.memory_space<vmem>>, vector<1x16xf32>
    %cst_43 = arith.constant 0.000000e+00 : f32
    %86 = vector.broadcast %cst_43 : f32 to vector<1x16xf32>
    %87 = vector.extract_strided_slice %81 {offsets = [0, 0], sizes = [1, 48], strides = [1, 1]} : vector<8x48xf32> to vector<1x48xf32>
    %88 = vector.extract_strided_slice %83 {offsets = [7, 0], sizes = [1, 48], strides = [1, 1]} : vector<8x48xf32> to vector<1x48xf32>
    %89 = arith.addf %87, %88 : vector<1x48xf32>
    %cst_44 = arith.constant dense<0.000000e+00> : vector<1x48xf32>
    %90 = tpu.matmul %86, %84, %cst_44 {dimension_numbers = #tpu.dot_dimension_numbers<[1], [0], [0], [1], [0, 0, 1, 1], [], []>} : vector<1x16xf32>, vector<16x48xf32>, vector<1x48xf32> -> vector<1x48xf32>
    %91 = vector.extract_strided_slice %89 {offsets = [0, 0], sizes = [1, 16], strides = [1, 1]} : vector<1x48xf32> to vector<1x16xf32>
    %92 = vector.extract_strided_slice %90 {offsets = [0, 0], sizes = [1, 16], strides = [1, 1]} : vector<1x48xf32> to vector<1x16xf32>
    %93 = arith.addf %91, %92 : vector<1x16xf32>
    %94 = arith.negf %93 : vector<1x16xf32>
    %95 = math.exp %94 : vector<1x16xf32>
    %cst_45 = arith.constant 1.000000e+00 : f32
    %96 = vector.broadcast %cst_45 : f32 to vector<1x16xf32>
    %97 = arith.addf %96, %95 : vector<1x16xf32>
    %98 = arith.divf %96, %97 : vector<1x16xf32>
    %99 = vector.extract_strided_slice %89 {offsets = [0, 16], sizes = [1, 16], strides = [1, 1]} : vector<1x48xf32> to vector<1x16xf32>
    %100 = vector.extract_strided_slice %90 {offsets = [0, 16], sizes = [1, 16], strides = [1, 1]} : vector<1x48xf32> to vector<1x16xf32>
    %101 = arith.addf %99, %100 : vector<1x16xf32>
    %102 = arith.negf %101 : vector<1x16xf32>
    %103 = math.exp %102 : vector<1x16xf32>
    %cst_46 = arith.constant 1.000000e+00 : f32
    %104 = vector.broadcast %cst_46 : f32 to vector<1x16xf32>
    %105 = arith.addf %104, %103 : vector<1x16xf32>
    %106 = arith.divf %104, %105 : vector<1x16xf32>
    %107 = vector.extract_strided_slice %89 {offsets = [0, 32], sizes = [1, 16], strides = [1, 1]} : vector<1x48xf32> to vector<1x16xf32>
    %108 = vector.extract_strided_slice %90 {offsets = [0, 32], sizes = [1, 16], strides = [1, 1]} : vector<1x48xf32> to vector<1x16xf32>
    %109 = arith.addf %108, %85 : vector<1x16xf32>
    %110 = arith.mulf %98, %109 : vector<1x16xf32>
    %111 = arith.addf %107, %110 : vector<1x16xf32>
    %112 = math.tanh %111 : vector<1x16xf32>
    %cst_47 = arith.constant 1.000000e+00 : f32
    %113 = vector.broadcast %cst_47 : f32 to vector<1x16xf32>
    %114 = arith.subf %113, %106 : vector<1x16xf32>
    %115 = arith.mulf %114, %112 : vector<1x16xf32>
    %116 = arith.mulf %106, %86 : vector<1x16xf32>
    %117 = arith.addf %115, %116 : vector<1x16xf32>
    %118 = vector.extract_strided_slice %81 {offsets = [1, 0], sizes = [1, 48], strides = [1, 1]} : vector<8x48xf32> to vector<1x48xf32>
    %119 = vector.extract_strided_slice %83 {offsets = [6, 0], sizes = [1, 48], strides = [1, 1]} : vector<8x48xf32> to vector<1x48xf32>
    %120 = arith.addf %118, %119 : vector<1x48xf32>
    %cst_48 = arith.constant dense<0.000000e+00> : vector<1x48xf32>
    %121 = tpu.matmul %117, %84, %cst_48 {dimension_numbers = #tpu.dot_dimension_numbers<[1], [0], [0], [1], [0, 0, 1, 1], [], []>} : vector<1x16xf32>, vector<16x48xf32>, vector<1x48xf32> -> vector<1x48xf32>
    %122 = vector.extract_strided_slice %120 {offsets = [0, 0], sizes = [1, 16], strides = [1, 1]} : vector<1x48xf32> to vector<1x16xf32>
    %123 = vector.extract_strided_slice %121 {offsets = [0, 0], sizes = [1, 16], strides = [1, 1]} : vector<1x48xf32> to vector<1x16xf32>
    %124 = arith.addf %122, %123 : vector<1x16xf32>
    %125 = arith.negf %124 : vector<1x16xf32>
    %126 = math.exp %125 : vector<1x16xf32>
    %cst_49 = arith.constant 1.000000e+00 : f32
    %127 = vector.broadcast %cst_49 : f32 to vector<1x16xf32>
    %128 = arith.addf %127, %126 : vector<1x16xf32>
    %129 = arith.divf %127, %128 : vector<1x16xf32>
    %130 = vector.extract_strided_slice %120 {offsets = [0, 16], sizes = [1, 16], strides = [1, 1]} : vector<1x48xf32> to vector<1x16xf32>
    %131 = vector.extract_strided_slice %121 {offsets = [0, 16], sizes = [1, 16], strides = [1, 1]} : vector<1x48xf32> to vector<1x16xf32>
    %132 = arith.addf %130, %131 : vector<1x16xf32>
    %133 = arith.negf %132 : vector<1x16xf32>
    %134 = math.exp %133 : vector<1x16xf32>
    %cst_50 = arith.constant 1.000000e+00 : f32
    %135 = vector.broadcast %cst_50 : f32 to vector<1x16xf32>
    %136 = arith.addf %135, %134 : vector<1x16xf32>
    %137 = arith.divf %135, %136 : vector<1x16xf32>
    %138 = vector.extract_strided_slice %120 {offsets = [0, 32], sizes = [1, 16], strides = [1, 1]} : vector<1x48xf32> to vector<1x16xf32>
    %139 = vector.extract_strided_slice %121 {offsets = [0, 32], sizes = [1, 16], strides = [1, 1]} : vector<1x48xf32> to vector<1x16xf32>
    %140 = arith.addf %139, %85 : vector<1x16xf32>
    %141 = arith.mulf %129, %140 : vector<1x16xf32>
    %142 = arith.addf %138, %141 : vector<1x16xf32>
    %143 = math.tanh %142 : vector<1x16xf32>
    %cst_51 = arith.constant 1.000000e+00 : f32
    %144 = vector.broadcast %cst_51 : f32 to vector<1x16xf32>
    %145 = arith.subf %144, %137 : vector<1x16xf32>
    %146 = arith.mulf %145, %143 : vector<1x16xf32>
    %147 = arith.mulf %137, %117 : vector<1x16xf32>
    %148 = arith.addf %146, %147 : vector<1x16xf32>
    %149 = vector.extract_strided_slice %81 {offsets = [2, 0], sizes = [1, 48], strides = [1, 1]} : vector<8x48xf32> to vector<1x48xf32>
    %150 = vector.extract_strided_slice %83 {offsets = [5, 0], sizes = [1, 48], strides = [1, 1]} : vector<8x48xf32> to vector<1x48xf32>
    %151 = arith.addf %149, %150 : vector<1x48xf32>
    %cst_52 = arith.constant dense<0.000000e+00> : vector<1x48xf32>
    %152 = tpu.matmul %148, %84, %cst_52 {dimension_numbers = #tpu.dot_dimension_numbers<[1], [0], [0], [1], [0, 0, 1, 1], [], []>} : vector<1x16xf32>, vector<16x48xf32>, vector<1x48xf32> -> vector<1x48xf32>
    %153 = vector.extract_strided_slice %151 {offsets = [0, 0], sizes = [1, 16], strides = [1, 1]} : vector<1x48xf32> to vector<1x16xf32>
    %154 = vector.extract_strided_slice %152 {offsets = [0, 0], sizes = [1, 16], strides = [1, 1]} : vector<1x48xf32> to vector<1x16xf32>
    %155 = arith.addf %153, %154 : vector<1x16xf32>
    %156 = arith.negf %155 : vector<1x16xf32>
    %157 = math.exp %156 : vector<1x16xf32>
    %cst_53 = arith.constant 1.000000e+00 : f32
    %158 = vector.broadcast %cst_53 : f32 to vector<1x16xf32>
    %159 = arith.addf %158, %157 : vector<1x16xf32>
    %160 = arith.divf %158, %159 : vector<1x16xf32>
    %161 = vector.extract_strided_slice %151 {offsets = [0, 16], sizes = [1, 16], strides = [1, 1]} : vector<1x48xf32> to vector<1x16xf32>
    %162 = vector.extract_strided_slice %152 {offsets = [0, 16], sizes = [1, 16], strides = [1, 1]} : vector<1x48xf32> to vector<1x16xf32>
    %163 = arith.addf %161, %162 : vector<1x16xf32>
    %164 = arith.negf %163 : vector<1x16xf32>
    %165 = math.exp %164 : vector<1x16xf32>
    %cst_54 = arith.constant 1.000000e+00 : f32
    %166 = vector.broadcast %cst_54 : f32 to vector<1x16xf32>
    %167 = arith.addf %166, %165 : vector<1x16xf32>
    %168 = arith.divf %166, %167 : vector<1x16xf32>
    %169 = vector.extract_strided_slice %151 {offsets = [0, 32], sizes = [1, 16], strides = [1, 1]} : vector<1x48xf32> to vector<1x16xf32>
    %170 = vector.extract_strided_slice %152 {offsets = [0, 32], sizes = [1, 16], strides = [1, 1]} : vector<1x48xf32> to vector<1x16xf32>
    %171 = arith.addf %170, %85 : vector<1x16xf32>
    %172 = arith.mulf %160, %171 : vector<1x16xf32>
    %173 = arith.addf %169, %172 : vector<1x16xf32>
    %174 = math.tanh %173 : vector<1x16xf32>
    %cst_55 = arith.constant 1.000000e+00 : f32
    %175 = vector.broadcast %cst_55 : f32 to vector<1x16xf32>
    %176 = arith.subf %175, %168 : vector<1x16xf32>
    %177 = arith.mulf %176, %174 : vector<1x16xf32>
    %178 = arith.mulf %168, %148 : vector<1x16xf32>
    %179 = arith.addf %177, %178 : vector<1x16xf32>
    %180 = vector.extract_strided_slice %81 {offsets = [3, 0], sizes = [1, 48], strides = [1, 1]} : vector<8x48xf32> to vector<1x48xf32>
    %181 = vector.extract_strided_slice %83 {offsets = [4, 0], sizes = [1, 48], strides = [1, 1]} : vector<8x48xf32> to vector<1x48xf32>
    %182 = arith.addf %180, %181 : vector<1x48xf32>
    %cst_56 = arith.constant dense<0.000000e+00> : vector<1x48xf32>
    %183 = tpu.matmul %179, %84, %cst_56 {dimension_numbers = #tpu.dot_dimension_numbers<[1], [0], [0], [1], [0, 0, 1, 1], [], []>} : vector<1x16xf32>, vector<16x48xf32>, vector<1x48xf32> -> vector<1x48xf32>
    %184 = vector.extract_strided_slice %182 {offsets = [0, 0], sizes = [1, 16], strides = [1, 1]} : vector<1x48xf32> to vector<1x16xf32>
    %185 = vector.extract_strided_slice %183 {offsets = [0, 0], sizes = [1, 16], strides = [1, 1]} : vector<1x48xf32> to vector<1x16xf32>
    %186 = arith.addf %184, %185 : vector<1x16xf32>
    %187 = arith.negf %186 : vector<1x16xf32>
    %188 = math.exp %187 : vector<1x16xf32>
    %cst_57 = arith.constant 1.000000e+00 : f32
    %189 = vector.broadcast %cst_57 : f32 to vector<1x16xf32>
    %190 = arith.addf %189, %188 : vector<1x16xf32>
    %191 = arith.divf %189, %190 : vector<1x16xf32>
    %192 = vector.extract_strided_slice %182 {offsets = [0, 16], sizes = [1, 16], strides = [1, 1]} : vector<1x48xf32> to vector<1x16xf32>
    %193 = vector.extract_strided_slice %183 {offsets = [0, 16], sizes = [1, 16], strides = [1, 1]} : vector<1x48xf32> to vector<1x16xf32>
    %194 = arith.addf %192, %193 : vector<1x16xf32>
    %195 = arith.negf %194 : vector<1x16xf32>
    %196 = math.exp %195 : vector<1x16xf32>
    %cst_58 = arith.constant 1.000000e+00 : f32
    %197 = vector.broadcast %cst_58 : f32 to vector<1x16xf32>
    %198 = arith.addf %197, %196 : vector<1x16xf32>
    %199 = arith.divf %197, %198 : vector<1x16xf32>
    %200 = vector.extract_strided_slice %182 {offsets = [0, 32], sizes = [1, 16], strides = [1, 1]} : vector<1x48xf32> to vector<1x16xf32>
    %201 = vector.extract_strided_slice %183 {offsets = [0, 32], sizes = [1, 16], strides = [1, 1]} : vector<1x48xf32> to vector<1x16xf32>
    %202 = arith.addf %201, %85 : vector<1x16xf32>
    %203 = arith.mulf %191, %202 : vector<1x16xf32>
    %204 = arith.addf %200, %203 : vector<1x16xf32>
    %205 = math.tanh %204 : vector<1x16xf32>
    %cst_59 = arith.constant 1.000000e+00 : f32
    %206 = vector.broadcast %cst_59 : f32 to vector<1x16xf32>
    %207 = arith.subf %206, %199 : vector<1x16xf32>
    %208 = arith.mulf %207, %205 : vector<1x16xf32>
    %209 = arith.mulf %199, %179 : vector<1x16xf32>
    %210 = arith.addf %208, %209 : vector<1x16xf32>
    %211 = vector.extract_strided_slice %81 {offsets = [4, 0], sizes = [1, 48], strides = [1, 1]} : vector<8x48xf32> to vector<1x48xf32>
    %212 = vector.extract_strided_slice %83 {offsets = [3, 0], sizes = [1, 48], strides = [1, 1]} : vector<8x48xf32> to vector<1x48xf32>
    %213 = arith.addf %211, %212 : vector<1x48xf32>
    %cst_60 = arith.constant dense<0.000000e+00> : vector<1x48xf32>
    %214 = tpu.matmul %210, %84, %cst_60 {dimension_numbers = #tpu.dot_dimension_numbers<[1], [0], [0], [1], [0, 0, 1, 1], [], []>} : vector<1x16xf32>, vector<16x48xf32>, vector<1x48xf32> -> vector<1x48xf32>
    %215 = vector.extract_strided_slice %213 {offsets = [0, 0], sizes = [1, 16], strides = [1, 1]} : vector<1x48xf32> to vector<1x16xf32>
    %216 = vector.extract_strided_slice %214 {offsets = [0, 0], sizes = [1, 16], strides = [1, 1]} : vector<1x48xf32> to vector<1x16xf32>
    %217 = arith.addf %215, %216 : vector<1x16xf32>
    %218 = arith.negf %217 : vector<1x16xf32>
    %219 = math.exp %218 : vector<1x16xf32>
    %cst_61 = arith.constant 1.000000e+00 : f32
    %220 = vector.broadcast %cst_61 : f32 to vector<1x16xf32>
    %221 = arith.addf %220, %219 : vector<1x16xf32>
    %222 = arith.divf %220, %221 : vector<1x16xf32>
    %223 = vector.extract_strided_slice %213 {offsets = [0, 16], sizes = [1, 16], strides = [1, 1]} : vector<1x48xf32> to vector<1x16xf32>
    %224 = vector.extract_strided_slice %214 {offsets = [0, 16], sizes = [1, 16], strides = [1, 1]} : vector<1x48xf32> to vector<1x16xf32>
    %225 = arith.addf %223, %224 : vector<1x16xf32>
    %226 = arith.negf %225 : vector<1x16xf32>
    %227 = math.exp %226 : vector<1x16xf32>
    %cst_62 = arith.constant 1.000000e+00 : f32
    %228 = vector.broadcast %cst_62 : f32 to vector<1x16xf32>
    %229 = arith.addf %228, %227 : vector<1x16xf32>
    %230 = arith.divf %228, %229 : vector<1x16xf32>
    %231 = vector.extract_strided_slice %213 {offsets = [0, 32], sizes = [1, 16], strides = [1, 1]} : vector<1x48xf32> to vector<1x16xf32>
    %232 = vector.extract_strided_slice %214 {offsets = [0, 32], sizes = [1, 16], strides = [1, 1]} : vector<1x48xf32> to vector<1x16xf32>
    %233 = arith.addf %232, %85 : vector<1x16xf32>
    %234 = arith.mulf %222, %233 : vector<1x16xf32>
    %235 = arith.addf %231, %234 : vector<1x16xf32>
    %236 = math.tanh %235 : vector<1x16xf32>
    %cst_63 = arith.constant 1.000000e+00 : f32
    %237 = vector.broadcast %cst_63 : f32 to vector<1x16xf32>
    %238 = arith.subf %237, %230 : vector<1x16xf32>
    %239 = arith.mulf %238, %236 : vector<1x16xf32>
    %240 = arith.mulf %230, %210 : vector<1x16xf32>
    %241 = arith.addf %239, %240 : vector<1x16xf32>
    %242 = vector.extract_strided_slice %81 {offsets = [5, 0], sizes = [1, 48], strides = [1, 1]} : vector<8x48xf32> to vector<1x48xf32>
    %243 = vector.extract_strided_slice %83 {offsets = [2, 0], sizes = [1, 48], strides = [1, 1]} : vector<8x48xf32> to vector<1x48xf32>
    %244 = arith.addf %242, %243 : vector<1x48xf32>
    %cst_64 = arith.constant dense<0.000000e+00> : vector<1x48xf32>
    %245 = tpu.matmul %241, %84, %cst_64 {dimension_numbers = #tpu.dot_dimension_numbers<[1], [0], [0], [1], [0, 0, 1, 1], [], []>} : vector<1x16xf32>, vector<16x48xf32>, vector<1x48xf32> -> vector<1x48xf32>
    %246 = vector.extract_strided_slice %244 {offsets = [0, 0], sizes = [1, 16], strides = [1, 1]} : vector<1x48xf32> to vector<1x16xf32>
    %247 = vector.extract_strided_slice %245 {offsets = [0, 0], sizes = [1, 16], strides = [1, 1]} : vector<1x48xf32> to vector<1x16xf32>
    %248 = arith.addf %246, %247 : vector<1x16xf32>
    %249 = arith.negf %248 : vector<1x16xf32>
    %250 = math.exp %249 : vector<1x16xf32>
    %cst_65 = arith.constant 1.000000e+00 : f32
    %251 = vector.broadcast %cst_65 : f32 to vector<1x16xf32>
    %252 = arith.addf %251, %250 : vector<1x16xf32>
    %253 = arith.divf %251, %252 : vector<1x16xf32>
    %254 = vector.extract_strided_slice %244 {offsets = [0, 16], sizes = [1, 16], strides = [1, 1]} : vector<1x48xf32> to vector<1x16xf32>
    %255 = vector.extract_strided_slice %245 {offsets = [0, 16], sizes = [1, 16], strides = [1, 1]} : vector<1x48xf32> to vector<1x16xf32>
    %256 = arith.addf %254, %255 : vector<1x16xf32>
    %257 = arith.negf %256 : vector<1x16xf32>
    %258 = math.exp %257 : vector<1x16xf32>
    %cst_66 = arith.constant 1.000000e+00 : f32
    %259 = vector.broadcast %cst_66 : f32 to vector<1x16xf32>
    %260 = arith.addf %259, %258 : vector<1x16xf32>
    %261 = arith.divf %259, %260 : vector<1x16xf32>
    %262 = vector.extract_strided_slice %244 {offsets = [0, 32], sizes = [1, 16], strides = [1, 1]} : vector<1x48xf32> to vector<1x16xf32>
    %263 = vector.extract_strided_slice %245 {offsets = [0, 32], sizes = [1, 16], strides = [1, 1]} : vector<1x48xf32> to vector<1x16xf32>
    %264 = arith.addf %263, %85 : vector<1x16xf32>
    %265 = arith.mulf %253, %264 : vector<1x16xf32>
    %266 = arith.addf %262, %265 : vector<1x16xf32>
    %267 = math.tanh %266 : vector<1x16xf32>
    %cst_67 = arith.constant 1.000000e+00 : f32
    %268 = vector.broadcast %cst_67 : f32 to vector<1x16xf32>
    %269 = arith.subf %268, %261 : vector<1x16xf32>
    %270 = arith.mulf %269, %267 : vector<1x16xf32>
    %271 = arith.mulf %261, %241 : vector<1x16xf32>
    %272 = arith.addf %270, %271 : vector<1x16xf32>
    %273 = vector.extract_strided_slice %81 {offsets = [6, 0], sizes = [1, 48], strides = [1, 1]} : vector<8x48xf32> to vector<1x48xf32>
    %274 = vector.extract_strided_slice %83 {offsets = [1, 0], sizes = [1, 48], strides = [1, 1]} : vector<8x48xf32> to vector<1x48xf32>
    %275 = arith.addf %273, %274 : vector<1x48xf32>
    %cst_68 = arith.constant dense<0.000000e+00> : vector<1x48xf32>
    %276 = tpu.matmul %272, %84, %cst_68 {dimension_numbers = #tpu.dot_dimension_numbers<[1], [0], [0], [1], [0, 0, 1, 1], [], []>} : vector<1x16xf32>, vector<16x48xf32>, vector<1x48xf32> -> vector<1x48xf32>
    %277 = vector.extract_strided_slice %275 {offsets = [0, 0], sizes = [1, 16], strides = [1, 1]} : vector<1x48xf32> to vector<1x16xf32>
    %278 = vector.extract_strided_slice %276 {offsets = [0, 0], sizes = [1, 16], strides = [1, 1]} : vector<1x48xf32> to vector<1x16xf32>
    %279 = arith.addf %277, %278 : vector<1x16xf32>
    %280 = arith.negf %279 : vector<1x16xf32>
    %281 = math.exp %280 : vector<1x16xf32>
    %cst_69 = arith.constant 1.000000e+00 : f32
    %282 = vector.broadcast %cst_69 : f32 to vector<1x16xf32>
    %283 = arith.addf %282, %281 : vector<1x16xf32>
    %284 = arith.divf %282, %283 : vector<1x16xf32>
    %285 = vector.extract_strided_slice %275 {offsets = [0, 16], sizes = [1, 16], strides = [1, 1]} : vector<1x48xf32> to vector<1x16xf32>
    %286 = vector.extract_strided_slice %276 {offsets = [0, 16], sizes = [1, 16], strides = [1, 1]} : vector<1x48xf32> to vector<1x16xf32>
    %287 = arith.addf %285, %286 : vector<1x16xf32>
    %288 = arith.negf %287 : vector<1x16xf32>
    %289 = math.exp %288 : vector<1x16xf32>
    %cst_70 = arith.constant 1.000000e+00 : f32
    %290 = vector.broadcast %cst_70 : f32 to vector<1x16xf32>
    %291 = arith.addf %290, %289 : vector<1x16xf32>
    %292 = arith.divf %290, %291 : vector<1x16xf32>
    %293 = vector.extract_strided_slice %275 {offsets = [0, 32], sizes = [1, 16], strides = [1, 1]} : vector<1x48xf32> to vector<1x16xf32>
    %294 = vector.extract_strided_slice %276 {offsets = [0, 32], sizes = [1, 16], strides = [1, 1]} : vector<1x48xf32> to vector<1x16xf32>
    %295 = arith.addf %294, %85 : vector<1x16xf32>
    %296 = arith.mulf %284, %295 : vector<1x16xf32>
    %297 = arith.addf %293, %296 : vector<1x16xf32>
    %298 = math.tanh %297 : vector<1x16xf32>
    %cst_71 = arith.constant 1.000000e+00 : f32
    %299 = vector.broadcast %cst_71 : f32 to vector<1x16xf32>
    %300 = arith.subf %299, %292 : vector<1x16xf32>
    %301 = arith.mulf %300, %298 : vector<1x16xf32>
    %302 = arith.mulf %292, %272 : vector<1x16xf32>
    %303 = arith.addf %301, %302 : vector<1x16xf32>
    %304 = vector.extract_strided_slice %81 {offsets = [7, 0], sizes = [1, 48], strides = [1, 1]} : vector<8x48xf32> to vector<1x48xf32>
    %305 = vector.extract_strided_slice %83 {offsets = [0, 0], sizes = [1, 48], strides = [1, 1]} : vector<8x48xf32> to vector<1x48xf32>
    %306 = arith.addf %304, %305 : vector<1x48xf32>
    %cst_72 = arith.constant dense<0.000000e+00> : vector<1x48xf32>
    %307 = tpu.matmul %303, %84, %cst_72 {dimension_numbers = #tpu.dot_dimension_numbers<[1], [0], [0], [1], [0, 0, 1, 1], [], []>} : vector<1x16xf32>, vector<16x48xf32>, vector<1x48xf32> -> vector<1x48xf32>
    %308 = vector.extract_strided_slice %306 {offsets = [0, 0], sizes = [1, 16], strides = [1, 1]} : vector<1x48xf32> to vector<1x16xf32>
    %309 = vector.extract_strided_slice %307 {offsets = [0, 0], sizes = [1, 16], strides = [1, 1]} : vector<1x48xf32> to vector<1x16xf32>
    %310 = arith.addf %308, %309 : vector<1x16xf32>
    %311 = arith.negf %310 : vector<1x16xf32>
    %312 = math.exp %311 : vector<1x16xf32>
    %cst_73 = arith.constant 1.000000e+00 : f32
    %313 = vector.broadcast %cst_73 : f32 to vector<1x16xf32>
    %314 = arith.addf %313, %312 : vector<1x16xf32>
    %315 = arith.divf %313, %314 : vector<1x16xf32>
    %316 = vector.extract_strided_slice %306 {offsets = [0, 16], sizes = [1, 16], strides = [1, 1]} : vector<1x48xf32> to vector<1x16xf32>
    %317 = vector.extract_strided_slice %307 {offsets = [0, 16], sizes = [1, 16], strides = [1, 1]} : vector<1x48xf32> to vector<1x16xf32>
    %318 = arith.addf %316, %317 : vector<1x16xf32>
    %319 = arith.negf %318 : vector<1x16xf32>
    %320 = math.exp %319 : vector<1x16xf32>
    %cst_74 = arith.constant 1.000000e+00 : f32
    %321 = vector.broadcast %cst_74 : f32 to vector<1x16xf32>
    %322 = arith.addf %321, %320 : vector<1x16xf32>
    %323 = arith.divf %321, %322 : vector<1x16xf32>
    %324 = vector.extract_strided_slice %306 {offsets = [0, 32], sizes = [1, 16], strides = [1, 1]} : vector<1x48xf32> to vector<1x16xf32>
    %325 = vector.extract_strided_slice %307 {offsets = [0, 32], sizes = [1, 16], strides = [1, 1]} : vector<1x48xf32> to vector<1x16xf32>
    %326 = arith.addf %325, %85 : vector<1x16xf32>
    %327 = arith.mulf %315, %326 : vector<1x16xf32>
    %328 = arith.addf %324, %327 : vector<1x16xf32>
    %329 = math.tanh %328 : vector<1x16xf32>
    %cst_75 = arith.constant 1.000000e+00 : f32
    %330 = vector.broadcast %cst_75 : f32 to vector<1x16xf32>
    %331 = arith.subf %330, %323 : vector<1x16xf32>
    %332 = arith.mulf %331, %329 : vector<1x16xf32>
    %333 = arith.mulf %323, %303 : vector<1x16xf32>
    %334 = arith.addf %332, %333 : vector<1x16xf32>
    %cst_76 = arith.constant 0.000000e+00 : f32
    %335 = vector.broadcast %cst_76 : f32 to vector<8x16xf32>
    %336 = arith.mulf %117, %40 : vector<1x16xf32>
    %337 = arith.mulf %334, %42 : vector<1x16xf32>
    %338 = arith.addf %336, %337 : vector<1x16xf32>
    %339 = vector.broadcast %47 : vector<8x1xf32> to vector<8x16xf32>
    %340 = vector.broadcast %338 : vector<1x16xf32> to vector<8x16xf32>
    %341 = arith.mulf %339, %340 : vector<8x16xf32>
    %342 = arith.addf %335, %341 : vector<8x16xf32>
    %343 = arith.mulf %148, %40 : vector<1x16xf32>
    %344 = arith.mulf %303, %42 : vector<1x16xf32>
    %345 = arith.addf %343, %344 : vector<1x16xf32>
    %346 = vector.broadcast %51 : vector<8x1xf32> to vector<8x16xf32>
    %347 = vector.broadcast %345 : vector<1x16xf32> to vector<8x16xf32>
    %348 = arith.mulf %346, %347 : vector<8x16xf32>
    %349 = arith.addf %342, %348 : vector<8x16xf32>
    %350 = arith.mulf %179, %40 : vector<1x16xf32>
    %351 = arith.mulf %272, %42 : vector<1x16xf32>
    %352 = arith.addf %350, %351 : vector<1x16xf32>
    %353 = vector.broadcast %55 : vector<8x1xf32> to vector<8x16xf32>
    %354 = vector.broadcast %352 : vector<1x16xf32> to vector<8x16xf32>
    %355 = arith.mulf %353, %354 : vector<8x16xf32>
    %356 = arith.addf %349, %355 : vector<8x16xf32>
    %357 = arith.mulf %210, %40 : vector<1x16xf32>
    %358 = arith.mulf %241, %42 : vector<1x16xf32>
    %359 = arith.addf %357, %358 : vector<1x16xf32>
    %360 = vector.broadcast %59 : vector<8x1xf32> to vector<8x16xf32>
    %361 = vector.broadcast %359 : vector<1x16xf32> to vector<8x16xf32>
    %362 = arith.mulf %360, %361 : vector<8x16xf32>
    %363 = arith.addf %356, %362 : vector<8x16xf32>
    %364 = arith.mulf %241, %40 : vector<1x16xf32>
    %365 = arith.mulf %210, %42 : vector<1x16xf32>
    %366 = arith.addf %364, %365 : vector<1x16xf32>
    %367 = vector.broadcast %63 : vector<8x1xf32> to vector<8x16xf32>
    %368 = vector.broadcast %366 : vector<1x16xf32> to vector<8x16xf32>
    %369 = arith.mulf %367, %368 : vector<8x16xf32>
    %370 = arith.addf %363, %369 : vector<8x16xf32>
    %371 = arith.mulf %272, %40 : vector<1x16xf32>
    %372 = arith.mulf %179, %42 : vector<1x16xf32>
    %373 = arith.addf %371, %372 : vector<1x16xf32>
    %374 = vector.broadcast %67 : vector<8x1xf32> to vector<8x16xf32>
    %375 = vector.broadcast %373 : vector<1x16xf32> to vector<8x16xf32>
    %376 = arith.mulf %374, %375 : vector<8x16xf32>
    %377 = arith.addf %370, %376 : vector<8x16xf32>
    %378 = arith.mulf %303, %40 : vector<1x16xf32>
    %379 = arith.mulf %148, %42 : vector<1x16xf32>
    %380 = arith.addf %378, %379 : vector<1x16xf32>
    %381 = vector.broadcast %71 : vector<8x1xf32> to vector<8x16xf32>
    %382 = vector.broadcast %380 : vector<1x16xf32> to vector<8x16xf32>
    %383 = arith.mulf %381, %382 : vector<8x16xf32>
    %384 = arith.addf %377, %383 : vector<8x16xf32>
    %385 = arith.mulf %334, %40 : vector<1x16xf32>
    %386 = arith.mulf %117, %42 : vector<1x16xf32>
    %387 = arith.addf %385, %386 : vector<1x16xf32>
    %388 = vector.broadcast %75 : vector<8x1xf32> to vector<8x16xf32>
    %389 = vector.broadcast %387 : vector<1x16xf32> to vector<8x16xf32>
    %390 = arith.mulf %388, %389 : vector<8x16xf32>
    %391 = arith.addf %384, %390 : vector<8x16xf32>
    %c0_77 = arith.constant 0 : index
    %c0_78 = arith.constant 0 : index
    %392 = vector.load %arg14[%c0_77, %c0_78] : memref<16x48xf32, #tpu.memory_space<vmem>>, vector<16x48xf32>
    %cst_79 = arith.constant dense<0.000000e+00> : vector<8x48xf32>
    %393 = tpu.matmul %391, %392, %cst_79 {dimension_numbers = #tpu.dot_dimension_numbers<[1], [0], [0], [1], [0, 0, 1, 1], [], []>} : vector<8x16xf32>, vector<16x48xf32>, vector<8x48xf32> -> vector<8x48xf32>
    %c0_80 = arith.constant 0 : index
    %c0_81 = arith.constant 0 : index
    %394 = vector.load %arg17[%c0_80, %c0_81] : memref<1x48xf32, #tpu.memory_space<vmem>>, vector<1x48xf32>
    %395 = vector.broadcast %394 : vector<1x48xf32> to vector<8x48xf32>
    %396 = arith.addf %393, %395 : vector<8x48xf32>
    %c0_82 = arith.constant 0 : index
    %c0_83 = arith.constant 0 : index
    %397 = vector.load %arg15[%c0_82, %c0_83] : memref<16x48xf32, #tpu.memory_space<vmem>>, vector<16x48xf32>
    %cst_84 = arith.constant dense<0.000000e+00> : vector<8x48xf32>
    %398 = tpu.matmul %391, %397, %cst_84 {dimension_numbers = #tpu.dot_dimension_numbers<[1], [0], [0], [1], [0, 0, 1, 1], [], []>} : vector<8x16xf32>, vector<16x48xf32>, vector<8x48xf32> -> vector<8x48xf32>
    %c0_85 = arith.constant 0 : index
    %c0_86 = arith.constant 0 : index
    %399 = vector.load %arg16[%c0_85, %c0_86] : memref<16x48xf32, #tpu.memory_space<vmem>>, vector<16x48xf32>
    %c0_87 = arith.constant 0 : index
    %c0_88 = arith.constant 0 : index
    %400 = vector.load %arg18[%c0_87, %c0_88] : memref<1x16xf32, #tpu.memory_space<vmem>>, vector<1x16xf32>
    %cst_89 = arith.constant 0.000000e+00 : f32
    %401 = vector.broadcast %cst_89 : f32 to vector<1x16xf32>
    %402 = vector.extract_strided_slice %396 {offsets = [0, 0], sizes = [1, 48], strides = [1, 1]} : vector<8x48xf32> to vector<1x48xf32>
    %403 = vector.extract_strided_slice %398 {offsets = [7, 0], sizes = [1, 48], strides = [1, 1]} : vector<8x48xf32> to vector<1x48xf32>
    %404 = arith.addf %402, %403 : vector<1x48xf32>
    %cst_90 = arith.constant dense<0.000000e+00> : vector<1x48xf32>
    %405 = tpu.matmul %401, %399, %cst_90 {dimension_numbers = #tpu.dot_dimension_numbers<[1], [0], [0], [1], [0, 0, 1, 1], [], []>} : vector<1x16xf32>, vector<16x48xf32>, vector<1x48xf32> -> vector<1x48xf32>
    %406 = vector.extract_strided_slice %404 {offsets = [0, 0], sizes = [1, 16], strides = [1, 1]} : vector<1x48xf32> to vector<1x16xf32>
    %407 = vector.extract_strided_slice %405 {offsets = [0, 0], sizes = [1, 16], strides = [1, 1]} : vector<1x48xf32> to vector<1x16xf32>
    %408 = arith.addf %406, %407 : vector<1x16xf32>
    %409 = arith.negf %408 : vector<1x16xf32>
    %410 = math.exp %409 : vector<1x16xf32>
    %cst_91 = arith.constant 1.000000e+00 : f32
    %411 = vector.broadcast %cst_91 : f32 to vector<1x16xf32>
    %412 = arith.addf %411, %410 : vector<1x16xf32>
    %413 = arith.divf %411, %412 : vector<1x16xf32>
    %414 = vector.extract_strided_slice %404 {offsets = [0, 16], sizes = [1, 16], strides = [1, 1]} : vector<1x48xf32> to vector<1x16xf32>
    %415 = vector.extract_strided_slice %405 {offsets = [0, 16], sizes = [1, 16], strides = [1, 1]} : vector<1x48xf32> to vector<1x16xf32>
    %416 = arith.addf %414, %415 : vector<1x16xf32>
    %417 = arith.negf %416 : vector<1x16xf32>
    %418 = math.exp %417 : vector<1x16xf32>
    %cst_92 = arith.constant 1.000000e+00 : f32
    %419 = vector.broadcast %cst_92 : f32 to vector<1x16xf32>
    %420 = arith.addf %419, %418 : vector<1x16xf32>
    %421 = arith.divf %419, %420 : vector<1x16xf32>
    %422 = vector.extract_strided_slice %404 {offsets = [0, 32], sizes = [1, 16], strides = [1, 1]} : vector<1x48xf32> to vector<1x16xf32>
    %423 = vector.extract_strided_slice %405 {offsets = [0, 32], sizes = [1, 16], strides = [1, 1]} : vector<1x48xf32> to vector<1x16xf32>
    %424 = arith.addf %423, %400 : vector<1x16xf32>
    %425 = arith.mulf %413, %424 : vector<1x16xf32>
    %426 = arith.addf %422, %425 : vector<1x16xf32>
    %427 = math.tanh %426 : vector<1x16xf32>
    %cst_93 = arith.constant 1.000000e+00 : f32
    %428 = vector.broadcast %cst_93 : f32 to vector<1x16xf32>
    %429 = arith.subf %428, %421 : vector<1x16xf32>
    %430 = arith.mulf %429, %427 : vector<1x16xf32>
    %431 = arith.mulf %421, %401 : vector<1x16xf32>
    %432 = arith.addf %430, %431 : vector<1x16xf32>
    %433 = vector.extract_strided_slice %396 {offsets = [1, 0], sizes = [1, 48], strides = [1, 1]} : vector<8x48xf32> to vector<1x48xf32>
    %434 = vector.extract_strided_slice %398 {offsets = [6, 0], sizes = [1, 48], strides = [1, 1]} : vector<8x48xf32> to vector<1x48xf32>
    %435 = arith.addf %433, %434 : vector<1x48xf32>
    %cst_94 = arith.constant dense<0.000000e+00> : vector<1x48xf32>
    %436 = tpu.matmul %432, %399, %cst_94 {dimension_numbers = #tpu.dot_dimension_numbers<[1], [0], [0], [1], [0, 0, 1, 1], [], []>} : vector<1x16xf32>, vector<16x48xf32>, vector<1x48xf32> -> vector<1x48xf32>
    %437 = vector.extract_strided_slice %435 {offsets = [0, 0], sizes = [1, 16], strides = [1, 1]} : vector<1x48xf32> to vector<1x16xf32>
    %438 = vector.extract_strided_slice %436 {offsets = [0, 0], sizes = [1, 16], strides = [1, 1]} : vector<1x48xf32> to vector<1x16xf32>
    %439 = arith.addf %437, %438 : vector<1x16xf32>
    %440 = arith.negf %439 : vector<1x16xf32>
    %441 = math.exp %440 : vector<1x16xf32>
    %cst_95 = arith.constant 1.000000e+00 : f32
    %442 = vector.broadcast %cst_95 : f32 to vector<1x16xf32>
    %443 = arith.addf %442, %441 : vector<1x16xf32>
    %444 = arith.divf %442, %443 : vector<1x16xf32>
    %445 = vector.extract_strided_slice %435 {offsets = [0, 16], sizes = [1, 16], strides = [1, 1]} : vector<1x48xf32> to vector<1x16xf32>
    %446 = vector.extract_strided_slice %436 {offsets = [0, 16], sizes = [1, 16], strides = [1, 1]} : vector<1x48xf32> to vector<1x16xf32>
    %447 = arith.addf %445, %446 : vector<1x16xf32>
    %448 = arith.negf %447 : vector<1x16xf32>
    %449 = math.exp %448 : vector<1x16xf32>
    %cst_96 = arith.constant 1.000000e+00 : f32
    %450 = vector.broadcast %cst_96 : f32 to vector<1x16xf32>
    %451 = arith.addf %450, %449 : vector<1x16xf32>
    %452 = arith.divf %450, %451 : vector<1x16xf32>
    %453 = vector.extract_strided_slice %435 {offsets = [0, 32], sizes = [1, 16], strides = [1, 1]} : vector<1x48xf32> to vector<1x16xf32>
    %454 = vector.extract_strided_slice %436 {offsets = [0, 32], sizes = [1, 16], strides = [1, 1]} : vector<1x48xf32> to vector<1x16xf32>
    %455 = arith.addf %454, %400 : vector<1x16xf32>
    %456 = arith.mulf %444, %455 : vector<1x16xf32>
    %457 = arith.addf %453, %456 : vector<1x16xf32>
    %458 = math.tanh %457 : vector<1x16xf32>
    %cst_97 = arith.constant 1.000000e+00 : f32
    %459 = vector.broadcast %cst_97 : f32 to vector<1x16xf32>
    %460 = arith.subf %459, %452 : vector<1x16xf32>
    %461 = arith.mulf %460, %458 : vector<1x16xf32>
    %462 = arith.mulf %452, %432 : vector<1x16xf32>
    %463 = arith.addf %461, %462 : vector<1x16xf32>
    %464 = vector.extract_strided_slice %396 {offsets = [2, 0], sizes = [1, 48], strides = [1, 1]} : vector<8x48xf32> to vector<1x48xf32>
    %465 = vector.extract_strided_slice %398 {offsets = [5, 0], sizes = [1, 48], strides = [1, 1]} : vector<8x48xf32> to vector<1x48xf32>
    %466 = arith.addf %464, %465 : vector<1x48xf32>
    %cst_98 = arith.constant dense<0.000000e+00> : vector<1x48xf32>
    %467 = tpu.matmul %463, %399, %cst_98 {dimension_numbers = #tpu.dot_dimension_numbers<[1], [0], [0], [1], [0, 0, 1, 1], [], []>} : vector<1x16xf32>, vector<16x48xf32>, vector<1x48xf32> -> vector<1x48xf32>
    %468 = vector.extract_strided_slice %466 {offsets = [0, 0], sizes = [1, 16], strides = [1, 1]} : vector<1x48xf32> to vector<1x16xf32>
    %469 = vector.extract_strided_slice %467 {offsets = [0, 0], sizes = [1, 16], strides = [1, 1]} : vector<1x48xf32> to vector<1x16xf32>
    %470 = arith.addf %468, %469 : vector<1x16xf32>
    %471 = arith.negf %470 : vector<1x16xf32>
    %472 = math.exp %471 : vector<1x16xf32>
    %cst_99 = arith.constant 1.000000e+00 : f32
    %473 = vector.broadcast %cst_99 : f32 to vector<1x16xf32>
    %474 = arith.addf %473, %472 : vector<1x16xf32>
    %475 = arith.divf %473, %474 : vector<1x16xf32>
    %476 = vector.extract_strided_slice %466 {offsets = [0, 16], sizes = [1, 16], strides = [1, 1]} : vector<1x48xf32> to vector<1x16xf32>
    %477 = vector.extract_strided_slice %467 {offsets = [0, 16], sizes = [1, 16], strides = [1, 1]} : vector<1x48xf32> to vector<1x16xf32>
    %478 = arith.addf %476, %477 : vector<1x16xf32>
    %479 = arith.negf %478 : vector<1x16xf32>
    %480 = math.exp %479 : vector<1x16xf32>
    %cst_100 = arith.constant 1.000000e+00 : f32
    %481 = vector.broadcast %cst_100 : f32 to vector<1x16xf32>
    %482 = arith.addf %481, %480 : vector<1x16xf32>
    %483 = arith.divf %481, %482 : vector<1x16xf32>
    %484 = vector.extract_strided_slice %466 {offsets = [0, 32], sizes = [1, 16], strides = [1, 1]} : vector<1x48xf32> to vector<1x16xf32>
    %485 = vector.extract_strided_slice %467 {offsets = [0, 32], sizes = [1, 16], strides = [1, 1]} : vector<1x48xf32> to vector<1x16xf32>
    %486 = arith.addf %485, %400 : vector<1x16xf32>
    %487 = arith.mulf %475, %486 : vector<1x16xf32>
    %488 = arith.addf %484, %487 : vector<1x16xf32>
    %489 = math.tanh %488 : vector<1x16xf32>
    %cst_101 = arith.constant 1.000000e+00 : f32
    %490 = vector.broadcast %cst_101 : f32 to vector<1x16xf32>
    %491 = arith.subf %490, %483 : vector<1x16xf32>
    %492 = arith.mulf %491, %489 : vector<1x16xf32>
    %493 = arith.mulf %483, %463 : vector<1x16xf32>
    %494 = arith.addf %492, %493 : vector<1x16xf32>
    %495 = vector.extract_strided_slice %396 {offsets = [3, 0], sizes = [1, 48], strides = [1, 1]} : vector<8x48xf32> to vector<1x48xf32>
    %496 = vector.extract_strided_slice %398 {offsets = [4, 0], sizes = [1, 48], strides = [1, 1]} : vector<8x48xf32> to vector<1x48xf32>
    %497 = arith.addf %495, %496 : vector<1x48xf32>
    %cst_102 = arith.constant dense<0.000000e+00> : vector<1x48xf32>
    %498 = tpu.matmul %494, %399, %cst_102 {dimension_numbers = #tpu.dot_dimension_numbers<[1], [0], [0], [1], [0, 0, 1, 1], [], []>} : vector<1x16xf32>, vector<16x48xf32>, vector<1x48xf32> -> vector<1x48xf32>
    %499 = vector.extract_strided_slice %497 {offsets = [0, 0], sizes = [1, 16], strides = [1, 1]} : vector<1x48xf32> to vector<1x16xf32>
    %500 = vector.extract_strided_slice %498 {offsets = [0, 0], sizes = [1, 16], strides = [1, 1]} : vector<1x48xf32> to vector<1x16xf32>
    %501 = arith.addf %499, %500 : vector<1x16xf32>
    %502 = arith.negf %501 : vector<1x16xf32>
    %503 = math.exp %502 : vector<1x16xf32>
    %cst_103 = arith.constant 1.000000e+00 : f32
    %504 = vector.broadcast %cst_103 : f32 to vector<1x16xf32>
    %505 = arith.addf %504, %503 : vector<1x16xf32>
    %506 = arith.divf %504, %505 : vector<1x16xf32>
    %507 = vector.extract_strided_slice %497 {offsets = [0, 16], sizes = [1, 16], strides = [1, 1]} : vector<1x48xf32> to vector<1x16xf32>
    %508 = vector.extract_strided_slice %498 {offsets = [0, 16], sizes = [1, 16], strides = [1, 1]} : vector<1x48xf32> to vector<1x16xf32>
    %509 = arith.addf %507, %508 : vector<1x16xf32>
    %510 = arith.negf %509 : vector<1x16xf32>
    %511 = math.exp %510 : vector<1x16xf32>
    %cst_104 = arith.constant 1.000000e+00 : f32
    %512 = vector.broadcast %cst_104 : f32 to vector<1x16xf32>
    %513 = arith.addf %512, %511 : vector<1x16xf32>
    %514 = arith.divf %512, %513 : vector<1x16xf32>
    %515 = vector.extract_strided_slice %497 {offsets = [0, 32], sizes = [1, 16], strides = [1, 1]} : vector<1x48xf32> to vector<1x16xf32>
    %516 = vector.extract_strided_slice %498 {offsets = [0, 32], sizes = [1, 16], strides = [1, 1]} : vector<1x48xf32> to vector<1x16xf32>
    %517 = arith.addf %516, %400 : vector<1x16xf32>
    %518 = arith.mulf %506, %517 : vector<1x16xf32>
    %519 = arith.addf %515, %518 : vector<1x16xf32>
    %520 = math.tanh %519 : vector<1x16xf32>
    %cst_105 = arith.constant 1.000000e+00 : f32
    %521 = vector.broadcast %cst_105 : f32 to vector<1x16xf32>
    %522 = arith.subf %521, %514 : vector<1x16xf32>
    %523 = arith.mulf %522, %520 : vector<1x16xf32>
    %524 = arith.mulf %514, %494 : vector<1x16xf32>
    %525 = arith.addf %523, %524 : vector<1x16xf32>
    %526 = vector.extract_strided_slice %396 {offsets = [4, 0], sizes = [1, 48], strides = [1, 1]} : vector<8x48xf32> to vector<1x48xf32>
    %527 = vector.extract_strided_slice %398 {offsets = [3, 0], sizes = [1, 48], strides = [1, 1]} : vector<8x48xf32> to vector<1x48xf32>
    %528 = arith.addf %526, %527 : vector<1x48xf32>
    %cst_106 = arith.constant dense<0.000000e+00> : vector<1x48xf32>
    %529 = tpu.matmul %525, %399, %cst_106 {dimension_numbers = #tpu.dot_dimension_numbers<[1], [0], [0], [1], [0, 0, 1, 1], [], []>} : vector<1x16xf32>, vector<16x48xf32>, vector<1x48xf32> -> vector<1x48xf32>
    %530 = vector.extract_strided_slice %528 {offsets = [0, 0], sizes = [1, 16], strides = [1, 1]} : vector<1x48xf32> to vector<1x16xf32>
    %531 = vector.extract_strided_slice %529 {offsets = [0, 0], sizes = [1, 16], strides = [1, 1]} : vector<1x48xf32> to vector<1x16xf32>
    %532 = arith.addf %530, %531 : vector<1x16xf32>
    %533 = arith.negf %532 : vector<1x16xf32>
    %534 = math.exp %533 : vector<1x16xf32>
    %cst_107 = arith.constant 1.000000e+00 : f32
    %535 = vector.broadcast %cst_107 : f32 to vector<1x16xf32>
    %536 = arith.addf %535, %534 : vector<1x16xf32>
    %537 = arith.divf %535, %536 : vector<1x16xf32>
    %538 = vector.extract_strided_slice %528 {offsets = [0, 16], sizes = [1, 16], strides = [1, 1]} : vector<1x48xf32> to vector<1x16xf32>
    %539 = vector.extract_strided_slice %529 {offsets = [0, 16], sizes = [1, 16], strides = [1, 1]} : vector<1x48xf32> to vector<1x16xf32>
    %540 = arith.addf %538, %539 : vector<1x16xf32>
    %541 = arith.negf %540 : vector<1x16xf32>
    %542 = math.exp %541 : vector<1x16xf32>
    %cst_108 = arith.constant 1.000000e+00 : f32
    %543 = vector.broadcast %cst_108 : f32 to vector<1x16xf32>
    %544 = arith.addf %543, %542 : vector<1x16xf32>
    %545 = arith.divf %543, %544 : vector<1x16xf32>
    %546 = vector.extract_strided_slice %528 {offsets = [0, 32], sizes = [1, 16], strides = [1, 1]} : vector<1x48xf32> to vector<1x16xf32>
    %547 = vector.extract_strided_slice %529 {offsets = [0, 32], sizes = [1, 16], strides = [1, 1]} : vector<1x48xf32> to vector<1x16xf32>
    %548 = arith.addf %547, %400 : vector<1x16xf32>
    %549 = arith.mulf %537, %548 : vector<1x16xf32>
    %550 = arith.addf %546, %549 : vector<1x16xf32>
    %551 = math.tanh %550 : vector<1x16xf32>
    %cst_109 = arith.constant 1.000000e+00 : f32
    %552 = vector.broadcast %cst_109 : f32 to vector<1x16xf32>
    %553 = arith.subf %552, %545 : vector<1x16xf32>
    %554 = arith.mulf %553, %551 : vector<1x16xf32>
    %555 = arith.mulf %545, %525 : vector<1x16xf32>
    %556 = arith.addf %554, %555 : vector<1x16xf32>
    %557 = vector.extract_strided_slice %396 {offsets = [5, 0], sizes = [1, 48], strides = [1, 1]} : vector<8x48xf32> to vector<1x48xf32>
    %558 = vector.extract_strided_slice %398 {offsets = [2, 0], sizes = [1, 48], strides = [1, 1]} : vector<8x48xf32> to vector<1x48xf32>
    %559 = arith.addf %557, %558 : vector<1x48xf32>
    %cst_110 = arith.constant dense<0.000000e+00> : vector<1x48xf32>
    %560 = tpu.matmul %556, %399, %cst_110 {dimension_numbers = #tpu.dot_dimension_numbers<[1], [0], [0], [1], [0, 0, 1, 1], [], []>} : vector<1x16xf32>, vector<16x48xf32>, vector<1x48xf32> -> vector<1x48xf32>
    %561 = vector.extract_strided_slice %559 {offsets = [0, 0], sizes = [1, 16], strides = [1, 1]} : vector<1x48xf32> to vector<1x16xf32>
    %562 = vector.extract_strided_slice %560 {offsets = [0, 0], sizes = [1, 16], strides = [1, 1]} : vector<1x48xf32> to vector<1x16xf32>
    %563 = arith.addf %561, %562 : vector<1x16xf32>
    %564 = arith.negf %563 : vector<1x16xf32>
    %565 = math.exp %564 : vector<1x16xf32>
    %cst_111 = arith.constant 1.000000e+00 : f32
    %566 = vector.broadcast %cst_111 : f32 to vector<1x16xf32>
    %567 = arith.addf %566, %565 : vector<1x16xf32>
    %568 = arith.divf %566, %567 : vector<1x16xf32>
    %569 = vector.extract_strided_slice %559 {offsets = [0, 16], sizes = [1, 16], strides = [1, 1]} : vector<1x48xf32> to vector<1x16xf32>
    %570 = vector.extract_strided_slice %560 {offsets = [0, 16], sizes = [1, 16], strides = [1, 1]} : vector<1x48xf32> to vector<1x16xf32>
    %571 = arith.addf %569, %570 : vector<1x16xf32>
    %572 = arith.negf %571 : vector<1x16xf32>
    %573 = math.exp %572 : vector<1x16xf32>
    %cst_112 = arith.constant 1.000000e+00 : f32
    %574 = vector.broadcast %cst_112 : f32 to vector<1x16xf32>
    %575 = arith.addf %574, %573 : vector<1x16xf32>
    %576 = arith.divf %574, %575 : vector<1x16xf32>
    %577 = vector.extract_strided_slice %559 {offsets = [0, 32], sizes = [1, 16], strides = [1, 1]} : vector<1x48xf32> to vector<1x16xf32>
    %578 = vector.extract_strided_slice %560 {offsets = [0, 32], sizes = [1, 16], strides = [1, 1]} : vector<1x48xf32> to vector<1x16xf32>
    %579 = arith.addf %578, %400 : vector<1x16xf32>
    %580 = arith.mulf %568, %579 : vector<1x16xf32>
    %581 = arith.addf %577, %580 : vector<1x16xf32>
    %582 = math.tanh %581 : vector<1x16xf32>
    %cst_113 = arith.constant 1.000000e+00 : f32
    %583 = vector.broadcast %cst_113 : f32 to vector<1x16xf32>
    %584 = arith.subf %583, %576 : vector<1x16xf32>
    %585 = arith.mulf %584, %582 : vector<1x16xf32>
    %586 = arith.mulf %576, %556 : vector<1x16xf32>
    %587 = arith.addf %585, %586 : vector<1x16xf32>
    %588 = vector.extract_strided_slice %396 {offsets = [6, 0], sizes = [1, 48], strides = [1, 1]} : vector<8x48xf32> to vector<1x48xf32>
    %589 = vector.extract_strided_slice %398 {offsets = [1, 0], sizes = [1, 48], strides = [1, 1]} : vector<8x48xf32> to vector<1x48xf32>
    %590 = arith.addf %588, %589 : vector<1x48xf32>
    %cst_114 = arith.constant dense<0.000000e+00> : vector<1x48xf32>
    %591 = tpu.matmul %587, %399, %cst_114 {dimension_numbers = #tpu.dot_dimension_numbers<[1], [0], [0], [1], [0, 0, 1, 1], [], []>} : vector<1x16xf32>, vector<16x48xf32>, vector<1x48xf32> -> vector<1x48xf32>
    %592 = vector.extract_strided_slice %590 {offsets = [0, 0], sizes = [1, 16], strides = [1, 1]} : vector<1x48xf32> to vector<1x16xf32>
    %593 = vector.extract_strided_slice %591 {offsets = [0, 0], sizes = [1, 16], strides = [1, 1]} : vector<1x48xf32> to vector<1x16xf32>
    %594 = arith.addf %592, %593 : vector<1x16xf32>
    %595 = arith.negf %594 : vector<1x16xf32>
    %596 = math.exp %595 : vector<1x16xf32>
    %cst_115 = arith.constant 1.000000e+00 : f32
    %597 = vector.broadcast %cst_115 : f32 to vector<1x16xf32>
    %598 = arith.addf %597, %596 : vector<1x16xf32>
    %599 = arith.divf %597, %598 : vector<1x16xf32>
    %600 = vector.extract_strided_slice %590 {offsets = [0, 16], sizes = [1, 16], strides = [1, 1]} : vector<1x48xf32> to vector<1x16xf32>
    %601 = vector.extract_strided_slice %591 {offsets = [0, 16], sizes = [1, 16], strides = [1, 1]} : vector<1x48xf32> to vector<1x16xf32>
    %602 = arith.addf %600, %601 : vector<1x16xf32>
    %603 = arith.negf %602 : vector<1x16xf32>
    %604 = math.exp %603 : vector<1x16xf32>
    %cst_116 = arith.constant 1.000000e+00 : f32
    %605 = vector.broadcast %cst_116 : f32 to vector<1x16xf32>
    %606 = arith.addf %605, %604 : vector<1x16xf32>
    %607 = arith.divf %605, %606 : vector<1x16xf32>
    %608 = vector.extract_strided_slice %590 {offsets = [0, 32], sizes = [1, 16], strides = [1, 1]} : vector<1x48xf32> to vector<1x16xf32>
    %609 = vector.extract_strided_slice %591 {offsets = [0, 32], sizes = [1, 16], strides = [1, 1]} : vector<1x48xf32> to vector<1x16xf32>
    %610 = arith.addf %609, %400 : vector<1x16xf32>
    %611 = arith.mulf %599, %610 : vector<1x16xf32>
    %612 = arith.addf %608, %611 : vector<1x16xf32>
    %613 = math.tanh %612 : vector<1x16xf32>
    %cst_117 = arith.constant 1.000000e+00 : f32
    %614 = vector.broadcast %cst_117 : f32 to vector<1x16xf32>
    %615 = arith.subf %614, %607 : vector<1x16xf32>
    %616 = arith.mulf %615, %613 : vector<1x16xf32>
    %617 = arith.mulf %607, %587 : vector<1x16xf32>
    %618 = arith.addf %616, %617 : vector<1x16xf32>
    %619 = vector.extract_strided_slice %396 {offsets = [7, 0], sizes = [1, 48], strides = [1, 1]} : vector<8x48xf32> to vector<1x48xf32>
    %620 = vector.extract_strided_slice %398 {offsets = [0, 0], sizes = [1, 48], strides = [1, 1]} : vector<8x48xf32> to vector<1x48xf32>
    %621 = arith.addf %619, %620 : vector<1x48xf32>
    %cst_118 = arith.constant dense<0.000000e+00> : vector<1x48xf32>
    %622 = tpu.matmul %618, %399, %cst_118 {dimension_numbers = #tpu.dot_dimension_numbers<[1], [0], [0], [1], [0, 0, 1, 1], [], []>} : vector<1x16xf32>, vector<16x48xf32>, vector<1x48xf32> -> vector<1x48xf32>
    %623 = vector.extract_strided_slice %621 {offsets = [0, 0], sizes = [1, 16], strides = [1, 1]} : vector<1x48xf32> to vector<1x16xf32>
    %624 = vector.extract_strided_slice %622 {offsets = [0, 0], sizes = [1, 16], strides = [1, 1]} : vector<1x48xf32> to vector<1x16xf32>
    %625 = arith.addf %623, %624 : vector<1x16xf32>
    %626 = arith.negf %625 : vector<1x16xf32>
    %627 = math.exp %626 : vector<1x16xf32>
    %cst_119 = arith.constant 1.000000e+00 : f32
    %628 = vector.broadcast %cst_119 : f32 to vector<1x16xf32>
    %629 = arith.addf %628, %627 : vector<1x16xf32>
    %630 = arith.divf %628, %629 : vector<1x16xf32>
    %631 = vector.extract_strided_slice %621 {offsets = [0, 16], sizes = [1, 16], strides = [1, 1]} : vector<1x48xf32> to vector<1x16xf32>
    %632 = vector.extract_strided_slice %622 {offsets = [0, 16], sizes = [1, 16], strides = [1, 1]} : vector<1x48xf32> to vector<1x16xf32>
    %633 = arith.addf %631, %632 : vector<1x16xf32>
    %634 = arith.negf %633 : vector<1x16xf32>
    %635 = math.exp %634 : vector<1x16xf32>
    %cst_120 = arith.constant 1.000000e+00 : f32
    %636 = vector.broadcast %cst_120 : f32 to vector<1x16xf32>
    %637 = arith.addf %636, %635 : vector<1x16xf32>
    %638 = arith.divf %636, %637 : vector<1x16xf32>
    %639 = vector.extract_strided_slice %621 {offsets = [0, 32], sizes = [1, 16], strides = [1, 1]} : vector<1x48xf32> to vector<1x16xf32>
    %640 = vector.extract_strided_slice %622 {offsets = [0, 32], sizes = [1, 16], strides = [1, 1]} : vector<1x48xf32> to vector<1x16xf32>
    %641 = arith.addf %640, %400 : vector<1x16xf32>
    %642 = arith.mulf %630, %641 : vector<1x16xf32>
    %643 = arith.addf %639, %642 : vector<1x16xf32>
    %644 = math.tanh %643 : vector<1x16xf32>
    %cst_121 = arith.constant 1.000000e+00 : f32
    %645 = vector.broadcast %cst_121 : f32 to vector<1x16xf32>
    %646 = arith.subf %645, %638 : vector<1x16xf32>
    %647 = arith.mulf %646, %644 : vector<1x16xf32>
    %648 = arith.mulf %638, %618 : vector<1x16xf32>
    %649 = arith.addf %647, %648 : vector<1x16xf32>
    %cst_122 = arith.constant 0.000000e+00 : f32
    %650 = vector.broadcast %cst_122 : f32 to vector<8x16xf32>
    %651 = arith.mulf %432, %40 : vector<1x16xf32>
    %652 = arith.mulf %649, %42 : vector<1x16xf32>
    %653 = arith.addf %651, %652 : vector<1x16xf32>
    %654 = vector.broadcast %47 : vector<8x1xf32> to vector<8x16xf32>
    %655 = vector.broadcast %653 : vector<1x16xf32> to vector<8x16xf32>
    %656 = arith.mulf %654, %655 : vector<8x16xf32>
    %657 = arith.addf %650, %656 : vector<8x16xf32>
    %658 = arith.mulf %463, %40 : vector<1x16xf32>
    %659 = arith.mulf %618, %42 : vector<1x16xf32>
    %660 = arith.addf %658, %659 : vector<1x16xf32>
    %661 = vector.broadcast %51 : vector<8x1xf32> to vector<8x16xf32>
    %662 = vector.broadcast %660 : vector<1x16xf32> to vector<8x16xf32>
    %663 = arith.mulf %661, %662 : vector<8x16xf32>
    %664 = arith.addf %657, %663 : vector<8x16xf32>
    %665 = arith.mulf %494, %40 : vector<1x16xf32>
    %666 = arith.mulf %587, %42 : vector<1x16xf32>
    %667 = arith.addf %665, %666 : vector<1x16xf32>
    %668 = vector.broadcast %55 : vector<8x1xf32> to vector<8x16xf32>
    %669 = vector.broadcast %667 : vector<1x16xf32> to vector<8x16xf32>
    %670 = arith.mulf %668, %669 : vector<8x16xf32>
    %671 = arith.addf %664, %670 : vector<8x16xf32>
    %672 = arith.mulf %525, %40 : vector<1x16xf32>
    %673 = arith.mulf %556, %42 : vector<1x16xf32>
    %674 = arith.addf %672, %673 : vector<1x16xf32>
    %675 = vector.broadcast %59 : vector<8x1xf32> to vector<8x16xf32>
    %676 = vector.broadcast %674 : vector<1x16xf32> to vector<8x16xf32>
    %677 = arith.mulf %675, %676 : vector<8x16xf32>
    %678 = arith.addf %671, %677 : vector<8x16xf32>
    %679 = arith.mulf %556, %40 : vector<1x16xf32>
    %680 = arith.mulf %525, %42 : vector<1x16xf32>
    %681 = arith.addf %679, %680 : vector<1x16xf32>
    %682 = vector.broadcast %63 : vector<8x1xf32> to vector<8x16xf32>
    %683 = vector.broadcast %681 : vector<1x16xf32> to vector<8x16xf32>
    %684 = arith.mulf %682, %683 : vector<8x16xf32>
    %685 = arith.addf %678, %684 : vector<8x16xf32>
    %686 = arith.mulf %587, %40 : vector<1x16xf32>
    %687 = arith.mulf %494, %42 : vector<1x16xf32>
    %688 = arith.addf %686, %687 : vector<1x16xf32>
    %689 = vector.broadcast %67 : vector<8x1xf32> to vector<8x16xf32>
    %690 = vector.broadcast %688 : vector<1x16xf32> to vector<8x16xf32>
    %691 = arith.mulf %689, %690 : vector<8x16xf32>
    %692 = arith.addf %685, %691 : vector<8x16xf32>
    %693 = arith.mulf %618, %40 : vector<1x16xf32>
    %694 = arith.mulf %463, %42 : vector<1x16xf32>
    %695 = arith.addf %693, %694 : vector<1x16xf32>
    %696 = vector.broadcast %71 : vector<8x1xf32> to vector<8x16xf32>
    %697 = vector.broadcast %695 : vector<1x16xf32> to vector<8x16xf32>
    %698 = arith.mulf %696, %697 : vector<8x16xf32>
    %699 = arith.addf %692, %698 : vector<8x16xf32>
    %700 = arith.mulf %649, %40 : vector<1x16xf32>
    %701 = arith.mulf %432, %42 : vector<1x16xf32>
    %702 = arith.addf %700, %701 : vector<1x16xf32>
    %703 = vector.broadcast %75 : vector<8x1xf32> to vector<8x16xf32>
    %704 = vector.broadcast %702 : vector<1x16xf32> to vector<8x16xf32>
    %705 = arith.mulf %703, %704 : vector<8x16xf32>
    %706 = arith.addf %699, %705 : vector<8x16xf32>
    %c0_123 = arith.constant 0 : index
    %c0_124 = arith.constant 0 : index
    %707 = vector.load %arg19[%c0_123, %c0_124] : memref<300x5xf32, #tpu.memory_space<vmem>>, vector<300x5xf32>
    %cst_125 = arith.constant dense<0.000000e+00> : vector<8x5xf32>
    %708 = tpu.matmul %35, %707, %cst_125 {dimension_numbers = #tpu.dot_dimension_numbers<[1], [0], [0], [1], [0, 0, 1, 1], [], []>} : vector<8x300xf32>, vector<300x5xf32>, vector<8x5xf32> -> vector<8x5xf32>
    %c0_126 = arith.constant 0 : index
    %c0_127 = arith.constant 0 : index
    %709 = vector.load %arg20[%c0_126, %c0_127] : memref<16x5xf32, #tpu.memory_space<vmem>>, vector<16x5xf32>
    %cst_128 = arith.constant dense<0.000000e+00> : vector<8x5xf32>
    %710 = tpu.matmul %706, %709, %cst_128 {dimension_numbers = #tpu.dot_dimension_numbers<[1], [0], [0], [1], [0, 0, 1, 1], [], []>} : vector<8x16xf32>, vector<16x5xf32>, vector<8x5xf32> -> vector<8x5xf32>
    %711 = arith.addf %708, %710 : vector<8x5xf32>
    %c0_129 = arith.constant 0 : index
    %c0_130 = arith.constant 0 : index
    %712 = vector.load %arg21[%c0_129, %c0_130] : memref<1x5xf32, #tpu.memory_space<vmem>>, vector<1x5xf32>
    %713 = vector.broadcast %712 : vector<1x5xf32> to vector<8x5xf32>
    %714 = arith.addf %711, %713 : vector<8x5xf32>
    %c0_131 = arith.constant 0 : index
    %c0_132 = arith.constant 0 : index
    %715 = vector.load %arg22[%c0_131, %c0_132] : memref<8x5xf32, #tpu.memory_space<vmem>>, vector<8x5xf32>
    tpu.vector_store %arg22[%c0_131, %c0_132], %714 {strides = array<i32>} : memref<8x5xf32, #tpu.memory_space<vmem>>, vector<8x5xf32>,
    return
  }
}

</mosaic_0001>

<bundles_post_ra>
// kernel: pca_cnn_bigru_forward.1
= control target key start
LH: loop header
LB: loop body
LE: loop exit
PB: predicated region body
PF: predicated region fallthrough
CT: control target
= control target key end

     0   :  { %s3883_s0 = inlined_call_operand.vmem [shape: f32[8,128], index: 0, kind: input, shape index: {}]   ;;  %s3884_s1 = inlined_call_operand.vmem [shape: f32[8,120], index: 1, kind: input, shape index: {}]   ;;  %s3885_s2 = inlined_call_operand.vmem [shape: f32[128,300], index: 2, kind: input, shape index: {}]   ;;  %s3886_s3 = inlined_call_operand.vmem [shape: f32[128,300], index: 3, kind: input, shape index: {}]   ;;  %s3887_s4 = inlined_call_operand.vmem [shape: f32[1,300], index: 4, kind: input, shape index: {}]   ;;  %s3888_s5 = inlined_call_operand.vmem [shape: f32[300,10], index: 5, kind: input, shape index: {}]   ;;  %s3889_s6 = inlined_call_operand.vmem [shape: f32[10,300], index: 6, kind: input, shape index: {}]   ;;  %s3890_s7 = inlined_call_operand.vmem [shape: f32[1,10], index: 7, kind: input, shape index: {}]   ;;  %s3891_s8 = inlined_call_operand.vmem [shape: f32[1,300], index: 8, kind: input, shape index: {}]   ;;  %s3892_s9 = inlined_call_operand.vmem [shape: f32[120,48], index: 9, kind: input, shape index: {}]   ;;  %s3893_s10 = inlined_call_operand.vmem [shape: f32[120,48], index: 10, kind: input, shape index: {}]   ;;  %s3894_s11 = inlined_call_operand.vmem [shape: f32[16,48], index: 11, kind: input, shape index: {}]   ;;  %s3895_s12 = inlined_call_operand.vmem [shape: f32[1,48], index: 12, kind: input, shape index: {}]   ;;  %s3896_s13 = inlined_call_operand.vmem [shape: f32[1,16], index: 13, kind: input, shape index: {}]   ;;  %s3897_s14 = inlined_call_operand.vmem [shape: f32[16,48], index: 14, kind: input, shape index: {}]   ;;  %s3898_s15 = inlined_call_operand.vmem [shape: f32[16,48], index: 15, kind: input, shape index: {}]   ;;  %s3899_s16 = inlined_call_operand.vmem [shape: f32[16,48], index: 16, kind: input, shape index: {}]   ;;  %s3900_s17 = inlined_call_operand.vmem [shape: f32[1,48], index: 17, kind: input, shape index: {}]   ;;  %s3901_s18 = inlined_call_operand.vmem [shape: f32[1,16], index: 18, kind: input, shape index: {}]   ;;  %s3902_s19 = inlined_call_operand.vmem [shape: f32[300,5], index: 19, kind: input, shape index: {}]   ;;  %s3903_s20 = inlined_call_operand.vmem [shape: f32[16,5], index: 20, kind: input, shape index: {}]   ;;  %s3904_s21 = inlined_call_operand.vmem [shape: f32[1,5], index: 21, kind: input, shape index: {}]   ;;  %s3905_s22 = inlined_call_operand.hbm [shape: f32[8,5], index: 22, kind: output, shape index: {}]  }
   0x1   :  { %3910 = sst [smem:[#allocation5_spill]] %s3883_s0 }
   0x2   :  { %3911 = sst [smem:[#allocation6_spill]] %s3884_s1 }
   0x3   :  { %3912 = sst [smem:[#allocation7_spill]] %s3885_s2 }
   0x4   :  { %3913 = sst [smem:[#allocation8_spill]] %s3886_s3 }
   0x5   :  { %3914 = sst [smem:[#allocation9_spill]] %s3887_s4 }
   0x6   :  { %3915 = sst [smem:[#allocation10_spill]] %s3888_s5 }
   0x7   :  { %3916 = sst [smem:[#allocation11_spill]] %s3889_s6 }
   0x8   :  { %s3917_s29 = sld [smem:[#allocation7_spill]] }
   0x9   :  { %s3918_s0 = sld [smem:[#allocation8_spill]] }
   0xa   :  { %s3919_s1 = sld [smem:[#allocation5_spill]] }
   0xe   :  { %v118_v0 = vld [vmem:[%s3917_s29 + $0x168] sm:$0xff]  ;;  %v119_v1 = vld [vmem:[%s3917_s29 + $0x170] sm:$0xff]  ;;  %v116_v3 = vld [vmem:[%s3917_s29 + $0x158] sm:$0xff] }
   0xf   :  { %v115_v2 = vld [vmem:[%s3917_s29 + $0x150] sm:$0xff]  ;;  %121 = vmatpush.msra.mxu0 %v118_v0  ;;  %141 = vmatpush.msra.mxu1 %v119_v1  ;;  %v112_v4 = vld [vmem:[%s3917_s29 + $0x138] sm:$0xff]  ;;  %v113_v5 = vld [vmem:[%s3917_s29 + $0x140] sm:$0xff] }
  0x10   :  { %v109_v6 = vld [vmem:[%s3917_s29 + $0x120] sm:$0xff]  ;;  %v110_v7 = vld [vmem:[%s3917_s29 + $0x128] sm:$0xff]  ;;  %v223_v9 = vld [vmem:[%s3918_s0 + $0x150] sm:$0xff] }
  0x11   :  { %122 = vmatpush.msra.mxu0 %v115_v2  ;;  %142 = vmatpush.msra.mxu1 %v116_v3  ;;  %v226_v8 = vld [vmem:[%s3918_s0 + $0x168] sm:$0xff]  ;;  %v107_v11 = vld [vmem:[%s3917_s29 + $0x110] sm:$0xff]  ;;  %v220_v12 = vld [vmem:[%s3918_s0 + $0x138] sm:$0xff] }
  0x12   :  { %v106_v10 = vld [vmem:[%s3917_s29 + $0x108] sm:$0xff]  ;;  %229 = vmatpush.msra.mxu3 %v226_v8  ;;  %v103_v13 = vld [vmem:[%s3917_s29 + $0xf0] sm:$0xff]  ;;  %v104_v14 = vld [vmem:[%s3917_s29 + $0xf8] sm:$0xff] }
  0x13   :  { %123 = vmatpush.msra.mxu0 %v112_v4  ;;  %143 = vmatpush.msra.mxu1 %v113_v5  ;;  %v217_v15 = vld [vmem:[%s3918_s0 + $0x120] sm:$0xff]  ;;  %v100_v16 = vld [vmem:[%s3917_s29 + $0xd8] sm:$0xff]  ;;  %v214_v18 = vld [vmem:[%s3918_s0 + $0x108] sm:$0xff] }
  0x14   :  { %230 = vmatpush.msra.mxu3 %v223_v9  ;;  %v101_v17 = vld [vmem:[%s3917_s29 + $0xe0] sm:$0xff]  ;;  %v120_v19 = vld [vmem:[%s3917_s29 + $0x178] sm:$0xff]  ;;  %v98_v21 = vld [vmem:[%s3917_s29 + $0xc8] sm:$0xff] }
  0x15   :  { %124 = vmatpush.msra.mxu0 %v109_v6  ;;  %144 = vmatpush.msra.mxu1 %v110_v7  ;;  %v97_v20 = vld [vmem:[%s3917_s29 + $0xc0] sm:$0xff]  ;;  %v211_v22 = vld [vmem:[%s3918_s0 + $0xf0] sm:$0xff]  ;;  %v94_v24 = vld [vmem:[%s3917_s29 + $0xa8] sm:$0xff] }
  0x16   :  { %231 = vmatpush.msra.mxu3 %v220_v12  ;;  %161 = vmatpush.msra.mxu2 %v120_v19  ;;  %v117_v23 = vld [vmem:[%s3917_s29 + $0x160] sm:$0xff]  ;;  %v95_v25 = vld [vmem:[%s3917_s29 + $0xb0] sm:$0xff]  ;;  %v114_v26 = vld [vmem:[%s3917_s29 + $0x148] sm:$0xff] }
  0x17   :  { %125 = vmatpush.msra.mxu0 %v106_v10  ;;  %145 = vmatpush.msra.mxu1 %v107_v11  ;;  %v208_v27 = vld [vmem:[%s3918_s0 + $0xd8] sm:$0xff]  ;;  %v111_v28 = vld [vmem:[%s3917_s29 + $0x130] sm:$0xff]  ;;  %v205_v31 = vld [vmem:[%s3918_s0 + $0xc0] sm:$0xff] }
  0x18   :  { %232 = vmatpush.msra.mxu3 %v217_v15  ;;  %162 = vmatpush.msra.mxu2 %v117_v23  ;;  %v91_v29 = vld [vmem:[%s3917_s29 + $0x90] sm:$0xff]  ;;  %v92_v30 = vld [vmem:[%s3917_s29 + $0x98] sm:$0xff]  ;;  %v89_v34 = vld [vmem:[%s3917_s29 + $0x80] sm:$0xff] }
  0x19   :  { %126 = vmatpush.msra.mxu0 %v103_v13  ;;  %146 = vmatpush.msra.mxu1 %v104_v14  ;;  %v108_v32 = vld [vmem:[%s3917_s29 + $0x118] sm:$0xff]  ;;  %v202_v35 = vld [vmem:[%s3918_s0 + $0xa8] sm:$0xff]  ;;  %v105_v36 = vld [vmem:[%s3917_s29 + $0x100] sm:$0xff] }
  0x1a   :  { %233 = vmatpush.msra.mxu3 %v214_v18  ;;  %163 = vmatpush.msra.mxu2 %v114_v26  ;;  %v88_v33 = vld [vmem:[%s3917_s29 + $0x78] sm:$0xff]  ;;  %v85_v37 = vld [vmem:[%s3917_s29 + $0x60] sm:$0xff]  ;;  %v86_v38 = vld [vmem:[%s3917_s29 + $0x68] sm:$0xff] }
  0x1b   :  { %127 = vmatpush.msra.mxu0 %v100_v16  ;;  %147 = vmatpush.msra.mxu1 %v101_v17  ;;  %v199_v39 = vld [vmem:[%s3918_s0 + $0x90] sm:$0xff]  ;;  %v102_v40 = vld [vmem:[%s3917_s29 + $0xe8] sm:$0xff]  ;;  %v196_v43 = vld [vmem:[%s3918_s0 + $0x78] sm:$0xff] }
  0x1c   :  { %234 = vmatpush.msra.mxu3 %v211_v22  ;;  %164 = vmatpush.msra.mxu2 %v111_v28  ;;  %v82_v41 = vld [vmem:[%s3917_s29 + $0x48] sm:$0xff]  ;;  %v83_v42 = vld [vmem:[%s3917_s29 + $0x50] sm:$0xff]  ;;  %v80_v46 = vld [vmem:[%s3917_s29 + $0x38] sm:$0xff] }
  0x1d   :  { %128 = vmatpush.msra.mxu0 %v97_v20  ;;  %148 = vmatpush.msra.mxu1 %v98_v21  ;;  %v99_v44 = vld [vmem:[%s3917_s29 + $0xd0] sm:$0xff]  ;;  %v193_v47 = vld [vmem:[%s3918_s0 + $0x60] sm:$0xff]  ;;  %v96_v48 = vld [vmem:[%s3917_s29 + $0xb8] sm:$0xff] }
  0x1e   :  { %235 = vmatpush.msra.mxu3 %v208_v27  ;;  %165 = vmatpush.msra.mxu2 %v108_v32  ;;  %v79_v45 = vld [vmem:[%s3917_s29 + $0x30] sm:$0xff]  ;;  %v76_v49 = vld [vmem:[%s3917_s29 + $0x18] sm:$0xff]  ;;  %v77_v50 = vld [vmem:[%s3917_s29 + $0x20] sm:$0xff] }
  0x1f   :  { %129 = vmatpush.msra.mxu0 %v94_v24  ;;  %149 = vmatpush.msra.mxu1 %v95_v25  ;;  %v190_v51 = vld [vmem:[%s3918_s0 + $0x48] sm:$0xff]  ;;  %v93_v52 = vld [vmem:[%s3917_s29 + $0xa0] sm:$0xff]  ;;  %v227_v55 = vld [vmem:[%s3918_s0 + $0x170] sm:$0xff] }
  0x20   :  { %236 = vmatpush.msra.mxu3 %v205_v31  ;;  %166 = vmatpush.msra.mxu2 %v105_v36  ;;  %v73_v53 = vld [vmem:[%s3917_s29] sm:$0xff]  ;;  %v74_v54 = vld [vmem:[%s3917_s29 + $0x8] sm:$0xff]  ;;  %v228_v56 = vld [vmem:[%s3918_s0 + $0x178] sm:$0xff] }
  0x21   :  { %130 = vmatpush.msra.mxu0 %v91_v29  ;;  %150 = vmatpush.msra.mxu1 %v92_v30  ;;  %v187_v57 = vld [vmem:[%s3918_s0 + $0x30] sm:$0xff]  ;;  %v90_v58 = vld [vmem:[%s3917_s29 + $0x88] sm:$0xff]  ;;  %v224_v59 = vld [vmem:[%s3918_s0 + $0x158] sm:$0xff] }
  0x22   :  { %237 = vmatpush.msra.mxu3 %v202_v35  ;;  %167 = vmatpush.msra.mxu2 %v102_v40  ;;  %v225_v60 = vld [vmem:[%s3918_s0 + $0x160] sm:$0xff]  ;;  %v222_v62 = vld [vmem:[%s3918_s0 + $0x148] sm:$0xff]  ;;  %v184_v63 = vld [vmem:[%s3918_s0 + $0x18] sm:$0xff] }
  0x23   :  { %131 = vmatpush.msra.mxu0 %v88_v33  ;;  %151 = vmatpush.msra.mxu1 %v89_v34  ;;  %v221_v61 = vld [vmem:[%s3918_s0 + $0x140] sm:$0xff]  ;;  %v218_v0 = vld [vmem:[%s3918_s0 + $0x128] sm:$0xff]  ;;  %v219_v1 = vld [vmem:[%s3918_s0 + $0x130] sm:$0xff] }
  0x24   :  { %238 = vmatpush.msra.mxu3 %v199_v39  ;;  %168 = vmatpush.msra.mxu2 %v99_v44  ;;  %v181_v2 = vld [vmem:[%s3918_s0] sm:$0xff]  ;;  %v87_v4 = vld [vmem:[%s3917_s29 + $0x70] sm:$0xff]  ;;  %v84_v5 = vld [vmem:[%s3917_s29 + $0x58] sm:$0xff] }
  0x25   :  { %132 = vmatpush.msra.mxu0 %v85_v37  ;;  %152 = vmatpush.msra.mxu1 %v86_v38  ;;  %v2859_v3 = vld [vmem:[%s3919_s1] sm:$0xff] }
  0x26   :  { %239 = vmatpush.msra.mxu3 %v196_v43  ;;  %169 = vmatpush.msra.mxu2 %v96_v48 }
  0x27   :  { %133 = vmatpush.msra.mxu0 %v82_v41  ;;  %153 = vmatpush.msra.mxu1 %v83_v42 }
  0x28   :  { %240 = vmatpush.msra.mxu3 %v193_v47  ;;  %170 = vmatpush.msra.mxu2 %v93_v52 }
  0x29   :  { %134 = vmatpush.msra.mxu0 %v79_v45  ;;  %154 = vmatpush.msra.mxu1 %v80_v46 }
  0x2a   :  { %241 = vmatpush.msra.mxu3 %v190_v51  ;;  %171 = vmatpush.msra.mxu2 %v90_v58 }
  0x2b   :  { %135 = vmatpush.msra.mxu0 %v76_v49  ;;  %155 = vmatpush.msra.mxu1 %v77_v50 }
  0x2c   :  { %242 = vmatpush.msra.mxu3 %v187_v57 }
  0x2d   :  { %136 = vmatpush.msra.mxu0 %v73_v53  ;;  %156 = vmatpush.msra.mxu1 %v74_v54 }
  0x2e   :  { %243 = vmatpush.msra.mxu3 %v184_v63  ;;  %137 = vmatmul.f32.vlgmr.msra.gmra.mxu0 %v2859_v3 }
  0x2f   :  { %249 = vmatpush.msrb.mxu0 %v227_v55  ;;  %269 = vmatpush.msrb.mxu1 %v228_v56 }
  0x31   :  { %250 = vmatpush.msrb.mxu0 %v224_v59  ;;  %270 = vmatpush.msrb.mxu1 %v225_v60 }
  0x33   :  { %251 = vmatpush.msrb.mxu0 %v221_v61  ;;  %271 = vmatpush.msrb.mxu1 %v222_v62 }
  0x34   :  { %27 = vsyncpa [#allocation3], 0  ;;  %v215_v6 = vld [vmem:[%s3918_s0 + $0x110] sm:$0xff]  ;;  %v216_v7 = vld [vmem:[%s3918_s0 + $0x118] sm:$0xff]  ;;  %244 = vmatpush.msra.mxu3 %v181_v2  ;;  %172 = vmatpush.msra.mxu2 %v87_v4  ;;  %s3920_s2 = sld [smem:[#allocation10_spill]]  ;;  %vm364_vm0 = vcmask 1043456  }
  0x35   :  { %252 = vmatpush.msrb.mxu0 %v218_v0  ;;  %272 = vmatpush.msrb.mxu1 %v219_v1  ;;  %v81_v8 = vld [vmem:[%s3917_s29 + $0x40] sm:$0xff]  ;;  %v212_v9 = vld [vmem:[%s3918_s0 + $0xf8] sm:$0xff]  ;;  %v78_v11 = vld [vmem:[%s3917_s29 + $0x28] sm:$0xff]  ;;  %s3921_s24 = sld [smem:[#allocation9_spill]]  ;;  %vm315_vm1 = vcmask 359424   ;;  %vm438_vm2 = vcmask 1041408  }
  0x36   :  { %245 = vmatmul.f32.vlgmr.msra.gmra.mxu3 %v2859_v3  ;;  %v213_v10 = vld [vmem:[%s3918_s0 + $0x100] sm:$0xff]  ;;  %173 = vmatpush.msra.mxu2 %v84_v5  ;;  %v210_v13 = vld [vmem:[%s3918_s0 + $0xe8] sm:$0xff]  ;;  %v75_v14 = vld [vmem:[%s3917_s29 + $0x10] sm:$0xff]  ;;  %s3922_s25 = sld [smem:[#allocation11_spill]]  ;;  %vm434_vm3 = vcmask 80896   ;;  %s2534_s26 = smov 32  }
  0x37   :  { %253 = vmatpush.msrb.mxu0 %v215_v6  ;;  %273 = vmatpush.msrb.mxu1 %v216_v7  ;;  %v209_v12 = vld [vmem:[%s3918_s0 + $0xe0] sm:$0xff]  ;;  %v206_v15 = vld [vmem:[%s3918_s0 + $0xc8] sm:$0xff]  ;;  %v207_v16 = vld [vmem:[%s3918_s0 + $0xd0] sm:$0xff]  ;;  %s2536_s27 = smov 96   ;;  %s3923_s1 = sld [smem:[#allocation6_spill]]  ;;  %vm746_vm7 = vcmask 982016  }
  0x38   :  { %174 = vmatpush.msra.mxu2 %v81_v8  ;;  %157 = vmatmul.f32.vlgmr.msra.gmra.mxu1 %v2859_v3  ;;  %v203_v17 = vld [vmem:[%s3918_s0 + $0xb0] sm:$0xff]  ;;  %v204_v18 = vld [vmem:[%s3918_s0 + $0xb8] sm:$0xff]  ;;  %v201_v21 = vld [vmem:[%s3918_s0 + $0xa0] sm:$0xff]  ;;  %vm812_vm12 = vcmask 130048   ;;  %s2539_s28 = smov [#allocation2]   ;;  %s2327_s4 = sshll.u32 %s3905_s22, 4  ;;  %s2328_s4 = int_to_ptr.hbm [resolvable:$true] %s2327_s4 }
  0x39   :  { %254 = vmatpush.msrb.mxu0 %v212_v9  ;;  %274 = vmatpush.msrb.mxu1 %v213_v10  ;;  %v200_v20 = vld [vmem:[%s3918_s0 + $0x98] sm:$0xff]  ;;  %v197_v23 = vld [vmem:[%s3918_s0 + $0x80] sm:$0xff]  ;;  %v198_v24 = vld [vmem:[%s3918_s0 + $0x88] sm:$0xff] }
  0x3a   :  { %175 = vmatpush.msra.mxu2 %v78_v11  ;;  %v338_v19 = vld [vmem:[%s3920_s2 + $0x78] sm:$0xff]  ;;  %v337_v22 = vld [vmem:[%s3920_s2 + $0x70] sm:$0xff]  ;;  %v336_v25 = vld [vmem:[%s3920_s2 + $0x68] sm:$0xff] }
  0x3b   :  { %255 = vmatpush.msrb.mxu0 %v209_v12  ;;  %275 = vmatpush.msrb.mxu1 %v210_v13  ;;  %v194_v26 = vld [vmem:[%s3918_s0 + $0x68] sm:$0xff]  ;;  %v195_v27 = vld [vmem:[%s3918_s0 + $0x70] sm:$0xff]  ;;  %v335_v28 = vld [vmem:[%s3920_s2 + $0x60] sm:$0xff] }
  0x3c   :  { %176 = vmatpush.msra.mxu2 %v75_v14  ;;  %v191_v29 = vld [vmem:[%s3918_s0 + $0x50] sm:$0xff]  ;;  %v192_v30 = vld [vmem:[%s3918_s0 + $0x58] sm:$0xff]  ;;  %v189_v33 = vld [vmem:[%s3918_s0 + $0x40] sm:$0xff] }
  0x3d   :  { %256 = vmatpush.msrb.mxu0 %v206_v15  ;;  %276 = vmatpush.msrb.mxu1 %v207_v16  ;;  %v334_v31 = vld [vmem:[%s3920_s2 + $0x58] sm:$0xff]  ;;  %v333_v34 = vld [vmem:[%s3920_s2 + $0x50] sm:$0xff]  ;;  %v185_v35 = vld [vmem:[%s3918_s0 + $0x20] sm:$0xff] }
  0x3e   :  { %177 = vmatmul.f32.vlgmr.msra.gmra.mxu2 %v2859_v3  ;;  %v188_v32 = vld [vmem:[%s3918_s0 + $0x38] sm:$0xff]  ;;  %v186_v36 = vld [vmem:[%s3918_s0 + $0x28] sm:$0xff]  ;;  %v183_v39 = vld [vmem:[%s3918_s0 + $0x10] sm:$0xff] }
  0x3f   :  { %257 = vmatpush.msrb.mxu0 %v203_v17  ;;  %277 = vmatpush.msrb.mxu1 %v204_v18  ;;  %v332_v37 = vld [vmem:[%s3920_s2 + $0x48] sm:$0xff]  ;;  %v331_v40 = vld [vmem:[%s3920_s2 + $0x40] sm:$0xff]  ;;  %v2981_v41 = vld [vmem:[%s3920_s2 + $0xf8] sm:$0xff] }
  0x40   :  { %368 = vmatpush.msrb.mxu2 %v338_v19  ;;  %v182_v38 = vld [vmem:[%s3918_s0 + $0x8] sm:$0xff]  ;;  %388 = vmatpush.msrb.mxu3 %v2981_v41  ;;  %v330_v42 = vld [vmem:[%s3920_s2 + $0x38] sm:$0xff]  ;;  %v2990_v43 = vld [vmem:[%s3920_s2 + $0xf0] sm:$0xff]  ;;  %s2325_s0 = sshll.u32 %s2539_s28, 4  ;;  %s2326_s0 = int_to_ptr.vmem [resolvable:$true] %s2325_s0 }
  0x41   :  { %258 = vmatpush.msrb.mxu0 %v200_v20  ;;  %278 = vmatpush.msrb.mxu1 %v201_v21  ;;  %v329_v44 = vld [vmem:[%s3920_s2 + $0x30] sm:$0xff]  ;;  %v2999_v45 = vld [vmem:[%s3920_s2 + $0xe8] sm:$0xff]  ;;  %v3008_v47 = vld [vmem:[%s3920_s2 + $0xe0] sm:$0xff] }
  0x42   :  { %369 = vmatpush.msrb.mxu2 %v337_v22  ;;  %389 = vmatpush.msrb.mxu3 %v2990_v43  ;;  %v328_v46 = vld [vmem:[%s3920_s2 + $0x28] sm:$0xff]  ;;  %v327_v48 = vld [vmem:[%s3920_s2 + $0x20] sm:$0xff]  ;;  %v3016_v49 = vld [vmem:[%s3920_s2 + $0xd8] sm:$0xff] }
  0x43   :  { %259 = vmatpush.msrb.mxu0 %v197_v23  ;;  %279 = vmatpush.msrb.mxu1 %v198_v24  ;;  %v326_v50 = vld [vmem:[%s3920_s2 + $0x18] sm:$0xff]  ;;  %v3025_v51 = vld [vmem:[%s3920_s2 + $0xd0] sm:$0xff]  ;;  %v3034_v53 = vld [vmem:[%s3920_s2 + $0xc8] sm:$0xff] }
  0x44   :  { %370 = vmatpush.msrb.mxu2 %v336_v25  ;;  %390 = vmatpush.msrb.mxu3 %v2999_v45  ;;  %v325_v52 = vld [vmem:[%s3920_s2 + $0x10] sm:$0xff]  ;;  %v324_v54 = vld [vmem:[%s3920_s2 + $0x8] sm:$0xff]  ;;  %v3044_v55 = vld [vmem:[%s3920_s2 + $0xc0] sm:$0xff] }
  0x45   :  { %260 = vmatpush.msrb.mxu0 %v194_v26  ;;  %280 = vmatpush.msrb.mxu1 %v195_v27  ;;  %v323_v56 = vld [vmem:[%s3920_s2] sm:$0xff]  ;;  %v3053_v57 = vld [vmem:[%s3920_s2 + $0xb8] sm:$0xff]  ;;  %v3059_v58 = vld [vmem:[%s3920_s2 + $0xb0] sm:$0xff] }
  0x46   :  { %371 = vmatpush.msrb.mxu2 %v335_v28  ;;  %391 = vmatpush.msrb.mxu3 %v3008_v47  ;;  %v3065_v59 = vld [vmem:[%s3920_s2 + $0xa8] sm:$0xff]  ;;  %v3071_v60 = vld [vmem:[%s3920_s2 + $0xa0] sm:$0xff]  ;;  %v3081_v62 = vld [vmem:[%s3920_s2 + $0x98] sm:$0xff] }
  0x47   :  { %261 = vmatpush.msrb.mxu0 %v191_v29  ;;  %281 = vmatpush.msrb.mxu1 %v192_v30  ;;  %v360_v61 = vld [vmem:[%s3920_s2 + $0x128] sm:$0xf]  ;;  %v359_v63 = vld [vmem:[%s3920_s2 + $0x120] sm:$0xff]  ;;  %v3093_v1 = vld [vmem:[%s3920_s2 + $0x90] sm:$0xff] }
  0x48   :  { %372 = vmatpush.msrb.mxu2 %v334_v31  ;;  %392 = vmatpush.msrb.mxu3 %v3016_v49  ;;  %v292_v0 = vld [vmem:[%s3921_s24] sm:$0x7]  ;;  %v358_v2 = vld [vmem:[%s3920_s2 + $0x118] sm:$0xff]  ;;  %v3102_v5 = vld [vmem:[%s3920_s2 + $0x88] sm:$0xff] }
  0x49   :  { %262 = vmatpush.msrb.mxu0 %v188_v32  ;;  %282 = vmatpush.msrb.mxu1 %v189_v33  ;;  %v294_v4 = vperm.slane %v292_v0, 0  ;;  %v357_v6 = vld [vmem:[%s3920_s2 + $0x110] sm:$0xff]  ;;  %v3111_v9 = vld [vmem:[%s3920_s2 + $0x80] sm:$0xff]  ;;  %v356_v10 = vld [vmem:[%s3920_s2 + $0x108] sm:$0xff]  ;;  %v295_v21 = vperm.slane %v292_v0, 1 }
  0x4a   :  { %373 = vmatpush.msrb.mxu2 %v333_v34  ;;  %393 = vmatpush.msrb.mxu3 %v3025_v51  ;;  %v355_v12 = vld [vmem:[%s3920_s2 + $0x100] sm:$0xff] }
  0x4b   :  { %263 = vmatpush.msrb.mxu0 %v185_v35  ;;  %283 = vmatpush.msrb.mxu1 %v186_v36 }
  0x4c   :  { %374 = vmatpush.msrb.mxu2 %v332_v37  ;;  %394 = vmatpush.msrb.mxu3 %v3034_v53 }
  0x4d   :  { %264 = vmatpush.msrb.mxu0 %v182_v38  ;;  %284 = vmatpush.msrb.mxu1 %v183_v39 }
  0x4e   :  { %265 = vmatmul.f32.vlgmr.msrb.gmra.mxu0 %v2859_v3  ;;  %285 = vmatmul.f32.vlgmr.msrb.gmra.mxu1 %v2859_v3 }
  0x4f   :  { %540 = vmatpush.msra.mxu1 %v338_v19  ;;  %375 = vmatpush.msrb.mxu2 %v331_v40 }
  0x50   :  { %395 = vmatpush.msrb.mxu3 %v3044_v55  ;;  %2336 = vmatpush.msk.msra.mxu0 %vm364_vm0, %v360_v61 }
  0x51   :  { %541 = vmatpush.msra.mxu1 %v337_v22  ;;  %376 = vmatpush.msrb.mxu2 %v330_v42  ;;  %v296_v22 = vperm.slane %v292_v0, 2 }
  0x52   :  { %396 = vmatpush.msrb.mxu3 %v3053_v57  ;;  %419 = vmatpush.msra.mxu0 %v359_v63 }
  0x53   :  { %542 = vmatpush.msra.mxu1 %v336_v25  ;;  %377 = vmatpush.msrb.mxu2 %v329_v44 }
  0x54   :  { %397 = vmatpush.msrb.mxu3 %v3059_v58  ;;  %420 = vmatpush.msra.mxu0 %v358_v2 }
  0x55   :  { %543 = vmatpush.msra.mxu1 %v335_v28  ;;  %378 = vmatpush.msrb.mxu2 %v328_v46 }
  0x56   :  { %398 = vmatpush.msrb.mxu3 %v3065_v59  ;;  %421 = vmatpush.msra.mxu0 %v357_v6 }
  0x57   :  { %544 = vmatpush.msra.mxu1 %v334_v31  ;;  %379 = vmatpush.msrb.mxu2 %v327_v48 }
  0x58   :  { %399 = vmatpush.msrb.mxu3 %v3071_v60  ;;  %422 = vmatpush.msra.mxu0 %v356_v10 }
  0x59   :  { %545 = vmatpush.msra.mxu1 %v333_v34  ;;  %380 = vmatpush.msrb.mxu2 %v326_v50 }
  0x5a   :  { %400 = vmatpush.msrb.mxu3 %v3081_v62  ;;  %423 = vmatpush.msra.mxu0 %v355_v12 }
  0x5b   :  { %546 = vmatpush.msra.mxu1 %v332_v37  ;;  %381 = vmatpush.msrb.mxu2 %v325_v52 }
  0x5c   :  { %401 = vmatpush.msrb.mxu3 %v3093_v1 }
  0x5d   :  { %547 = vmatpush.msra.mxu1 %v331_v40  ;;  %382 = vmatpush.msrb.mxu2 %v324_v54 }
  0x5e   :  { %402 = vmatpush.msrb.mxu3 %v3102_v5 }
  0x5f   :  { %548 = vmatpush.msra.mxu1 %v330_v42  ;;  %383 = vmatpush.msrb.mxu2 %v323_v56 }
  0x60   :  { %403 = vmatpush.msrb.mxu3 %v3111_v9 }
  0x61   :  { %549 = vmatpush.msra.mxu1 %v329_v44  ;;  %v431_v44 = vld [vmem:[%s3922_s25 + $0x18] sm:$0x3] }
  0x62   :  { %2344 = vmatpush.msk.msra.mxu3 %vm364_vm0, %v360_v61  ;;  %2338 = vmatpush.msk.msrb.mxu0 %vm438_vm2, %v431_v44 }
  0x63   :  { %550 = vmatpush.msra.mxu1 %v328_v46  ;;  %v432_v46 = vld [vmem:[%s3922_s25 + $0x20] sm:$0x3] }
  0x64   :  { %591 = vmatpush.msra.mxu3 %v359_v63  ;;  %2340 = vmatpush.msk.msra.mxu2 %vm438_vm2, %v432_v46 }
  0x65   :  { %551 = vmatpush.msra.mxu1 %v327_v48  ;;  %v428_v48 = vld [vmem:[%s3922_s25] sm:$0xff] }
  0x66   :  { %592 = vmatpush.msra.mxu3 %v358_v2  ;;  %463 = vmatpush.msrb.mxu0 %v428_v48 }
  0x67   :  { %552 = vmatpush.msra.mxu1 %v326_v50  ;;  %v429_v50 = vld [vmem:[%s3922_s25 + $0x8] sm:$0xff] }
  0x68   :  { %593 = vmatpush.msra.mxu3 %v357_v6  ;;  %483 = vmatpush.msra.mxu2 %v429_v50 }
  0x69   :  { %553 = vmatpush.msra.mxu1 %v325_v52  ;;  %v433_v52 = vld [vmem:[%s3922_s25 + $0x28] sm:$0x3] }
  0x6a   :  { %594 = vmatpush.msra.mxu3 %v356_v10 }
  0x6b   :  { %554 = vmatpush.msra.mxu1 %v324_v54  ;;  %v430_v54 = vld [vmem:[%s3922_s25 + $0x10] sm:$0xff] }
  0x6c   :  { %595 = vmatpush.msra.mxu3 %v355_v12 }
  0x6d   :  { %555 = vmatpush.msra.mxu1 %v323_v56 }
  0xab   :  { %v138_v3 = vpop.f32.mrf.mxu0 }
  0xb5   :  { %v158_v15 = vpop.f32.mrf.mxu1 }
  0xb9   :  { %v246_v7 = vpop.f32.mrf.mxu3 }
  0xba   :  { %v289_v8 = vmax.f32 %v138_v3, %v246_v7 }
  0xbc   :  { %v3117_v11 = vadd.f32 %v294_v4, %v289_v8 }
  0xbe   :  { %v303_v13 = vrot.slane %v3117_v11, 4 }
  0xc0   :  { %v304_v14 = vadd.f32 %v303_v13, %v3117_v11 }
  0xc1   :  { %v178_v20 = vpop.f32.mrf.mxu2 }
  0xc2   :  { %v305_v16 = vrot.slane %v304_v14, 2 }
  0xc4   :  { %v306_v17 = vadd.f32 %v305_v16, %v304_v14 }
  0xc6   :  { %v307_v18 = vrot.slane %v306_v17, 1 }
  0xc8   :  { %v308_v19 = vadd.f32 %v307_v18, %v306_v17 }
  0xca   :  { %384 = vmatmul.f32.vlgmr.msrb.gmra.mxu2 %v308_v19 }
  0xcb   :  { %v266_v23 = vpop.f32.mrf.mxu0  ;;  %v286_v24 = vpop.f32.mrf.mxu1  ;;  %560 = vmatpush.msrb.mxu2 %v2981_v41 }
  0xcc   :  { %v290_v25 = vmax.f32 %v158_v15, %v266_v23  ;;  %v291_v26 = vmax.f32 %v178_v20, %v286_v24  ;;  %v2535_v23 = vmov 0.0   ;;  %v784_v24 = vld [vmem:[%s3893_s10 + $0x70] sm:$0xff] }
  0xcd   :  { %561 = vmatpush.msrb.mxu2 %v2990_v43 }
  0xce   :  { %v3125_v27 = vadd.f32 %v295_v21, %v290_v25  ;;  %v3127_v28 = vadd.f32 %v296_v22, %v291_v26  ;;  %v783_v25 = vld [vmem:[%s3893_s10 + $0x68] sm:$0xff]  ;;  %v782_v26 = vld [vmem:[%s3893_s10 + $0x60] sm:$0xff] }
  0xcf   :  { %562 = vmatpush.msrb.mxu2 %v2999_v45 }
  0xd0   :  { %v309_v29 = vrot.slane %v3125_v27, 4  ;;  %v316_v30 = vsel %vm315_vm1, %v3127_v28, 0.0 }
  0xd1   :  { %v317_v31 = vrot.slane %v316_v30, 4  ;;  %563 = vmatpush.msrb.mxu2 %v3008_v47 }
  0xd2   :  { %v310_v32 = vadd.f32 %v309_v29, %v3125_v27  ;;  %v780_v29 = vld [vmem:[%s3893_s10 + $0x50] sm:$0xff] }
  0xd3   :  { %v318_v33 = vadd.f32 %v317_v31, %v316_v30  ;;  %564 = vmatpush.msrb.mxu2 %v3016_v49  ;;  %v779_v30 = vld [vmem:[%s3893_s10 + $0x48] sm:$0xff] }
  0xd4   :  { %v311_v34 = vrot.slane %v310_v32, 2 }
  0xd5   :  { %v319_v35 = vrot.slane %v318_v33, 2  ;;  %565 = vmatpush.msrb.mxu2 %v3025_v51  ;;  %v3180_v51 = vld [vmem:[%s3894_s11 + $0x8] sm:$0xff] }
  0xd6   :  { %v312_v36 = vadd.f32 %v311_v34, %v310_v32  ;;  %978 = vmatpush.msrb.mxu1 %v3180_v51 }
  0xd7   :  { %v320_v37 = vadd.f32 %v319_v35, %v318_v33  ;;  %566 = vmatpush.msrb.mxu2 %v3034_v53  ;;  %v3185_v53 = vld [vmem:[%s3894_s11] sm:$0xff]  ;;  %v777_v35 = vld [vmem:[%s3893_s10 + $0x38] sm:$0xff] }
  0xd8   :  { %v313_v38 = vrot.slane %v312_v36, 1  ;;  %979 = vmatpush.msrb.mxu1 %v3185_v53  ;;  %v778_v33 = vld [vmem:[%s3893_s10 + $0x40] sm:$0xff] }
  0xd9   :  { %v321_v39 = vrot.slane %v320_v37, 1  ;;  %567 = vmatpush.msrb.mxu2 %v3044_v55 }
  0xda   :  { %v314_v40 = vadd.f32 %v313_v38, %v312_v36  ;;  %v776_v38 = vld [vmem:[%s3893_s10 + $0x30] sm:$0xff] }
  0xdb   :  { %v322_v42 = vadd.f32 %v321_v39, %v320_v37  ;;  %568 = vmatpush.msrb.mxu2 %v3053_v57  ;;  %v2404_v57 = vld [vmem:[%s3896_s13] ss:$0 sm:$0xff]  ;;  %v775_v39 = vld [vmem:[%s3893_s10 + $0x28] sm:$0xff] }
  0xdc   :  { %404 = vmatmul.f32.vlgmr.msrb.gmra.mxu3 %v314_v40  ;;  %858 = vrot.lane.b32.xlu0 %v2404_v57, %s2534_s26  ;;  %v774_v40 = vld [vmem:[%s3893_s10 + $0x20] sm:$0xff] }
  0xdd   :  { %2337 = vmatmul.msk.f32.vlgmr.msra.gmra.mxu0 %vm315_vm1, %v322_v42  ;;  %2350 = vmatpush.msk.msrb.mxu3 %vm438_vm2, %v433_v52  ;;  %v773_v42 = vld [vmem:[%s3893_s10 + $0x18] sm:$0xff] }
  0xde   :  { %2342 = vmatpush.msk.msra.mxu0 %vm438_vm2, %v433_v52  ;;  %569 = vmatpush.msrb.mxu2 %v3059_v58 }
  0xdf   :  { %669 = vmatpush.msrb.mxu3 %v430_v54 }
  0xe0   :  { %503 = vmatpush.msra.mxu0 %v430_v54  ;;  %570 = vmatpush.msrb.mxu2 %v3065_v59  ;;  %v770_v54 = vld [vmem:[%s3893_s10] sm:$0xff] }
  0xe2   :  { %571 = vmatpush.msrb.mxu2 %v3071_v60 }
  0xe4   :  { %572 = vmatpush.msrb.mxu2 %v3081_v62 }
  0xe6   :  { %573 = vmatpush.msrb.mxu2 %v3093_v1 }
  0xe8   :  { %574 = vmatpush.msrb.mxu2 %v3102_v5 }
  0xea   :  { %575 = vmatpush.msrb.mxu2 %v3111_v9 }
 0x14d   :  { %v385_v41 = vpop.f32.mrf.mxu2 }
 0x14e   :  { %v3270_v57 = vpop.permute.xlu0 %858 }
 0x15a   :  { %v425_v47 = vpop.f32.mrf.mxu0 }
 0x15f   :  { %v405_v43 = vpop.f32.mrf.mxu3 }
 0x160   :  { %v406_v45 = vadd.f32 %v405_v43, %v385_v41 }
 0x162   :  { %v426_v49 = vadd.f32 %v425_v47, %v406_v45  ;;  %v536_v45 = vld [vmem:[%s3890_s7] sm:$0x1] }
 0x164   :  { %2339 = vmatmul.msk.f32.vlgmr.msrb.gmra.mxu0 %vm434_vm3, %v426_v49  ;;  %2341 = vmatmul.msk.f32.vlgmr.msra.gmra.mxu2 %vm434_vm3, %v426_v49 }
 0x165   :  { %2346 = vmatpush.msk.msrb.mxu0 %vm438_vm2, %v431_v44  ;;  %830 = vmatpush.msra.mxu2 %v3180_v51 }
 0x167   :  { %629 = vmatpush.msrb.mxu0 %v428_v48  ;;  %831 = vmatpush.msra.mxu2 %v3185_v53 }
 0x16c   :  { %2343 = vmatmul.msk.f32.vlgmr.msra.gmra.mxu0 %vm434_vm3, %v426_v49 }
 0x16d   :  { %2348 = vmatpush.msk.msra.mxu0 %vm438_vm2, %v432_v46  ;;  %v772_v46 = vld [vmem:[%s3893_s10 + $0x10] sm:$0xff] }
 0x16f   :  { %649 = vmatpush.msra.mxu0 %v429_v50  ;;  %v771_v50 = vld [vmem:[%s3893_s10 + $0x8] sm:$0xff] }
 0x1e1   :  { %v465_v55 = vpop.f32.mrf.mxu0 }
 0x1e2   :  { %v508_v56 = vperm.slane %v465_v55, 0 }
 0x1e4   :  { %v3195_v58 = vsub.f32 %v3117_v11, %v508_v56  ;;  %v741_v56 = vld [vmem:[%s3892_s9 + $0x70] sm:$0xff] }
 0x1e6   :  { %v514_v59 = vmul.f32 %v3195_v58, %v3195_v58 }
 0x1e7   :  { %v485_v60 = vpop.f32.mrf.mxu2 }
 0x1e8   :  { %v517_v61 = vrot.slane %v514_v59, 4  ;;  %v509_v62 = vperm.slane %v485_v60, 0 }
 0x1e9   :  { %v505_v63 = vpop.f32.mrf.mxu0 }
 0x1ea   :  { %v518_v0 = vadd.f32 %v517_v61, %v514_v59  ;;  %v3201_v1 = vsub.f32 %v3125_v27, %v509_v62  ;;  %v510_v2 = vperm.slane %v505_v63, 0  ;;  %v781_v27 = vld [vmem:[%s3893_s10 + $0x58] sm:$0xff]  ;;  %v740_v61 = vld [vmem:[%s3892_s9 + $0x68] sm:$0xff]  ;;  %v739_v62 = vld [vmem:[%s3892_s9 + $0x60] sm:$0xff]  ;;  %s2538_s10 = smov 16  }
 0x1eb   :  { %v738_v63 = vld [vmem:[%s3892_s9 + $0x58] sm:$0xff] }
 0x1ec   :  { %v519_v3 = vrot.slane %v518_v0, 2  ;;  %v515_v4 = vmul.f32 %v3201_v1, %v3201_v1  ;;  %v3206_v5 = vsub.f32 %v3127_v28, %v510_v2  ;;  %v737_v2 = vld [vmem:[%s3892_s9 + $0x50] sm:$0xff] }
 0x1ee   :  { %v520_v6 = vadd.f32 %v519_v3, %v518_v0  ;;  %v523_v7 = vrot.slane %v515_v4, 4  ;;  %v516_v8 = vmul.f32 %v3206_v5, %v3206_v5  ;;  %v726_v0 = vld [vmem:[%s3923_s1] sm:$0xff]  ;;  %v736_v3 = vld [vmem:[%s3892_s9 + $0x48] sm:$0xff] }
 0x1f0   :  { %v524_v9 = vadd.f32 %v523_v7, %v515_v4  ;;  %v529_v10 = vsel %vm315_vm1, %v516_v8, 0.0  ;;  %v521_v11 = vrot.slane %v520_v6, 1  ;;  %v735_v4 = vld [vmem:[%s3892_s9 + $0x40] sm:$0xff]  ;;  %v733_v7 = vld [vmem:[%s3892_s9 + $0x30] sm:$0xff]  ;;  %v732_v8 = vld [vmem:[%s3892_s9 + $0x28] sm:$0xff] }
 0x1f1   :  { %v530_v12 = vrot.slane %v529_v10, 4 }
 0x1f2   :  { %v525_v13 = vrot.slane %v524_v9, 2  ;;  %v522_v14 = vadd.f32 %v521_v11, %v520_v6  ;;  %v734_v6 = vld [vmem:[%s3892_s9 + $0x38] sm:$0xff]  ;;  %v729_v11 = vld [vmem:[%s3892_s9 + $0x10] sm:$0xff] }
 0x1f3   :  { %v531_v15 = vadd.f32 %v530_v12, %v529_v10  ;;  %v730_v10 = vld [vmem:[%s3892_s9 + $0x18] sm:$0xff]  ;;  %v728_v12 = vld [vmem:[%s3892_s9 + $0x8] sm:$0xff] }
 0x1f4   :  { %v526_v16 = vadd.f32 %v525_v13, %v524_v9  ;;  %556 = vmatmul.f32.vlgmr.msra.gmra.mxu1 %v522_v14  ;;  %v731_v9 = vld [vmem:[%s3892_s9 + $0x20] sm:$0xff] }
 0x1f5   :  { %v532_v17 = vrot.slane %v531_v15, 2  ;;  %1125 = vmatpush.msra.mxu1 %v3180_v51  ;;  %v727_v13 = vld [vmem:[%s3892_s9] sm:$0xff] }
 0x1f6   :  { %v527_v18 = vrot.slane %v526_v16, 1 }
 0x1f7   :  { %v533_v19 = vadd.f32 %v532_v17, %v531_v15  ;;  %1126 = vmatpush.msra.mxu1 %v3185_v53  ;;  %v680_v15 = vld [vmem:[%s3891_s8] sm:$0x7] }
 0x1f8   :  { %v528_v20 = vadd.f32 %v527_v18, %v526_v16  ;;  %v684_v18 = vperm.slane %v680_v15, 2 }
 0x1f9   :  { %v534_v21 = vrot.slane %v533_v19, 1 }
 0x1fa   :  { %576 = vmatmul.f32.vlgmr.msrb.gmra.mxu2 %v528_v20 }
 0x1fb   :  { %v535_v22 = vadd.f32 %v534_v21, %v533_v19  ;;  %903 = vmatpush.msrb.mxu2 %v3180_v51 }
 0x1fd   :  { %2345 = vmatmul.msk.f32.vlgmr.msra.gmra.mxu3 %vm315_vm1, %v535_v22  ;;  %904 = vmatpush.msrb.mxu2 %v3185_v53  ;;  %v683_v22 = vperm.slane %v680_v15, 1 }
 0x1fe   :  { %786 = vmatpush.msra.mxu3 %v784_v24 }
 0x200   :  { %787 = vmatpush.msra.mxu3 %v783_v25 }
 0x202   :  { %832 = vmatmul.f32.vlgmr.msra.gmra.mxu2 %v2535_v23  ;;  %788 = vmatpush.msra.mxu3 %v782_v26 }
 0x203   :  { %1053 = vmatpush.msra.mxu2 %v3180_v51 }
 0x204   :  { %789 = vmatpush.msra.mxu3 %v781_v27 }
 0x205   :  { %1054 = vmatpush.msra.mxu2 %v3185_v53 }
 0x206   :  { %790 = vmatpush.msra.mxu3 %v780_v29 }
 0x208   :  { %791 = vmatpush.msra.mxu3 %v779_v30 }
 0x20a   :  { %792 = vmatpush.msra.mxu3 %v778_v33 }
 0x20c   :  { %793 = vmatpush.msra.mxu3 %v777_v35 }
 0x20e   :  { %794 = vmatpush.msra.mxu3 %v776_v38 }
 0x210   :  { %795 = vmatpush.msra.mxu3 %v775_v39 }
 0x212   :  { %796 = vmatpush.msra.mxu3 %v774_v40 }
 0x214   :  { %797 = vmatpush.msra.mxu3 %v773_v42 }
 0x216   :  { %798 = vmatpush.msra.mxu3 %v772_v46 }
 0x218   :  { %799 = vmatpush.msra.mxu3 %v771_v50 }
 0x21a   :  { %800 = vmatpush.msra.mxu3 %v770_v54 }
 0x271   :  { %v557_v28 = vpop.f32.mrf.mxu1 }
 0x272   :  { %v558_v31 = vadd.f32 1e-05, %v557_v28  ;;  %v2405_v28 = vld [vmem:[%s3895_s12] ss:$0 sm:$0xff]  ;;  %s2537_s12 = smov 112  }
 0x27d   :  { %v577_v32 = vpop.f32.mrf.mxu2 }
 0x27e   :  { %v578_v34 = vadd.f32 %v577_v32, %v558_v31 }
 0x280   :  { %v597_v36 = vpop.f32.mrf.mxu3 }
 0x281   :  { %v598_v37 = vadd.f32 %v597_v36, %v578_v34 }
 0x283   :  { %2409 = vrsqrt.f32 %v598_v37  ;;  %vm606_vm5 = vweird.f32 %v598_v37 }
 0x285   :  { %v833_v59 = vpop.f32.mrf.mxu2 }
 0x286   :  { %v861_v60 = vadd.f32 %v3270_v57, %v833_v59 }
 0x288   :  { %863 = vrot.lane.b32.xlu0 %v861_v60, %s2536_s27 }
 0x289   :  { %v2410_v44 = vpop.eup %2409 }
 0x28a   :  { %v601_v48 = vmul.f32 %v2410_v44, %v598_v37  ;;  %vm607_vm4 = vweird.f32 %v2410_v44 }
 0x28b   :  { %vm608_vm6 = vmor %vm606_vm5, %vm607_vm4 }
 0x28c   :  { %v602_v52 = vmul.f32 %v2410_v44, %v601_v48 }
 0x28e   :  { %v603_v41 = vmul.f32 0.5, %v602_v52 }
 0x290   :  { %v604_v43 = vsub.f32 1.5, %v603_v41 }
 0x292   :  { %v605_v47 = vmul.f32 %v2410_v44, %v604_v43 }
 0x294   :  { %v609_v49 = vsel %vm608_vm6, %v2410_v44, %v605_v47 }
 0x295   :  { %v610_v55 = vmul.f32 %v609_v49, %v536_v45 }
 0x297   :  { %2347 = vmatmul.msk.f32.vlgmr.msrb.gmra.mxu0 %vm434_vm3, %v610_v55  ;;  %2351 = vmatmul.msk.f32.vlgmr.msrb.gmra.mxu3 %vm434_vm3, %v610_v55 }
 0x298   :  { %751 = vmatpush.msrb.mxu0 %v741_v56  ;;  %1341 = vmatpush.msrb.mxu3 %v3180_v51 }
 0x29a   :  { %752 = vmatpush.msrb.mxu0 %v740_v61  ;;  %1342 = vmatpush.msrb.mxu3 %v3185_v53 }
 0x29c   :  { %753 = vmatpush.msrb.mxu0 %v739_v62 }
 0x29e   :  { %754 = vmatpush.msrb.mxu0 %v738_v63 }
 0x29f   :  { %2349 = vmatmul.msk.f32.vlgmr.msra.gmra.mxu0 %vm434_vm3, %v610_v55  ;;  %2362 = vmatmul.msk.f32.vlgmr.msra.gmra.mxu3 %vm746_vm7, %v726_v0 }
 0x2a0   :  { %755 = vmatpush.msrb.mxu0 %v737_v2 }
 0x2a2   :  { %756 = vmatpush.msrb.mxu0 %v736_v3 }
 0x2a4   :  { %757 = vmatpush.msrb.mxu0 %v735_v4 }
 0x2a6   :  { %758 = vmatpush.msrb.mxu0 %v734_v6 }
 0x2a8   :  { %759 = vmatpush.msrb.mxu0 %v733_v7 }
 0x2aa   :  { %760 = vmatpush.msrb.mxu0 %v732_v8 }
 0x2ac   :  { %761 = vmatpush.msrb.mxu0 %v731_v9 }
 0x2ae   :  { %762 = vmatpush.msrb.mxu0 %v730_v10 }
 0x2b0   :  { %763 = vmatpush.msrb.mxu0 %v729_v11 }
 0x2b2   :  { %764 = vmatpush.msrb.mxu0 %v728_v12 }
 0x2b4   :  { %765 = vmatpush.msrb.mxu0 %v727_v13 }
 0x2b5   :  { %2361 = vmatmul.msk.f32.vlgmr.msrb.gmra.mxu0 %vm746_vm7, %v726_v0 }
 0x2b6   :  { %1269 = vmatpush.msra.mxu0 %v3180_v51 }
 0x2b8   :  { %1270 = vmatpush.msra.mxu0 %v3185_v53 }
 0x2fa   :  { %v864_v44 = vpop.permute.xlu0 %863 }
 0x314   :  { %v3328_v14 = vpop.f32.mrf.mxu0 }
 0x31a   :  { %v671_v16 = vpop.f32.mrf.mxu3 }
 0x31b   :  { %v676_v17 = vperm.slane %v671_v16, 0 }
 0x31c   :  { %v651_v19 = vpop.f32.mrf.mxu0 }
 0x31d   :  { %v679_v20 = vmul.f32 %v676_v17, %v3206_v5  ;;  %v675_v21 = vperm.slane %v651_v19, 0 }
 0x31f   :  { %v3334_v24 = vadd.f32 %v684_v18, %v679_v20  ;;  %v678_v25 = vmul.f32 %v675_v21, %v3201_v1 }
 0x321   :  { %v3337_v26 = vadd.f32 %v683_v22, %v678_v25 }
 0x322   :  { %v3339_v27 = vpop.f32.mrf.mxu3 }
 0x323   :  { %v809_v29 = vrot.slane %v3339_v27, 7  ;;  %v881_v63 = vrot.slane %v3339_v27, 5 }
 0x332   :  { %v767_v30 = vpop.f32.mrf.mxu0 }
 0x333   :  { %v3345_v31 = vadd.f32 %v2405_v28, %v767_v30 }
 0x335   :  { %v3348_v5 = vadd.f32 %v809_v29, %v3345_v31  ;;  %v3365_v2 = vadd.f32 %v881_v63, %v3345_v31 }
 0x337   :  { %v836_v32 = vadd.f32 %v833_v59, %v3348_v5 }
 0x339   :  { %v2363_v33 = vmul.f32 -1.442695, %v836_v32 }
 0x33b   :  { %2411 = vpow2.f32 %v2363_v33 }
 0x341   :  { %v2412_v1 = vpop.eup %2411 }
 0x342   :  { %v840_v34 = vadd.f32 1.0, %v2412_v1 }
 0x344   :  { %2413 = vrcp.f32 %v840_v34  ;;  %v852_v38 = vand.u32 2147483648, %v840_v34  ;;  %v850_v40 = vand.u32 2147483647, %v840_v34  ;;  %vm846_vm9 = vweird.f32 %v840_v34 }
 0x346   :  { %v853_v46 = vor.u32 1.1754944e-38, %v852_v38  ;;  %vm851_vm11 = vcmp.eq.f32.partialorder %v850_v40, 8.507059e+37 }
 0x34a   :  { %v2414_v35 = vpop.eup %2413 }
 0x34b   :  { %v842_v36 = vmul.f32 %v2414_v35, %v840_v34  ;;  %vm847_vm8 = vweird.f32 %v2414_v35 }
 0x34c   :  { %vm848_vm10 = vmor %vm846_vm9, %vm847_vm8 }
 0x34d   :  { %v843_v37 = vsub.f32 1.0, %v842_v36 }
 0x34f   :  { %v844_v39 = vmul.f32 %v2414_v35, %v843_v37  ;;  %v955_v37 = vrot.slane %v3339_v27, 3 }
 0x351   :  { %v845_v42 = vadd.f32 %v2414_v35, %v844_v39  ;;  %v3381_v39 = vadd.f32 %v955_v37, %v3345_v31 }
 0x353   :  { %v849_v48 = vsel %vm848_vm10, %v2414_v35, %v845_v42 }
 0x354   :  { %v854_v50 = vsel %vm851_vm11, %v853_v46, %v849_v48 }
 0x355   :  { %v866_v52 = vmul.f32 %v864_v44, %v854_v50  ;;  %v873_v45 = vsub.f32 1.0, %v854_v50  ;;  %v879_v49 = vmul.f32 0.0, %v854_v50 }
 0x357   :  { %868 = vrot.lane.b32.xlu1 %v866_v52, %s2534_s26 }
 0x3c9   :  { %v869_v54 = vpop.permute.xlu1 %868 }
 0x3ca   :  { %v871_v41 = vadd.f32 %v869_v54, %v3348_v5 }
 0x3cc   :  { %2415 = vtanh.f32 %v871_v41 }
 0x3d2   :  { %v2416_v43 = vpop.eup %2415 }
 0x3d3   :  { %875 = vrot.lane.b32.xlu1 %v2416_v43, %s2537_s12 }
 0x445   :  { %v876_v47 = vpop.permute.xlu1 %875 }
 0x446   :  { %v878_v55 = vmul.f32 %v876_v47, %v873_v45 }
 0x448   :  { %v3354_v56 = vadd.f32 %v879_v49, %v878_v55 }
 0x44a   :  { %885 = vrot.lane.b32.xlu2 %v3354_v56, %s2537_s12  ;;  %v951_v25 = vrot.slane %v3354_v56, 7 }
 0x4a4   :  { %v886_v59 = vpop.permute.xlu2 %885 }
 0x4a5   :  { %2364 = vmatmul.msk.f32.vlgmr.msrb.gmra.mxu2 %vm812_vm12, %v886_v59 }
 0x4a6   :  { %1197 = vmatpush.msrb.mxu2 %v3180_v51 }
 0x4a8   :  { %1198 = vmatpush.msrb.mxu2 %v3185_v53 }
 0x528   :  { %v906_v60 = vpop.f32.mrf.mxu2 }
 0x529   :  { %v932_v61 = vadd.f32 %v906_v60, %v3270_v57  ;;  %v910_v0 = vrot.slane %v906_v60, 7 }
 0x52b   :  { %v934_v62 = vrot.slane %v932_v61, 7  ;;  %v912_v3 = vadd.f32 %v910_v0, %v3365_v2 }
 0x52d   :  { %935 = vrot.lane.b32.xlu2 %v934_v62, %s2536_s27  ;;  %v2365_v4 = vmul.f32 -1.442695, %v912_v3 }
 0x52f   :  { %2417 = vpow2.f32 %v2365_v4 }
 0x535   :  { %v2418_v6 = vpop.eup %2417 }
 0x536   :  { %v916_v51 = vadd.f32 1.0, %v2418_v6 }
 0x538   :  { %2419 = vrcp.f32 %v916_v51  ;;  %v928_v11 = vand.u32 2147483648, %v916_v51  ;;  %vm922_vm14 = vweird.f32 %v916_v51  ;;  %v926_v12 = vand.u32 2147483647, %v916_v51 }
 0x53a   :  { %v929_v15 = vor.u32 1.1754944e-38, %v928_v11  ;;  %vm927_vm2 = vcmp.eq.f32.partialorder %v926_v12, 8.507059e+37  ;;  %v1030_v12 = vrot.slane %v3339_v27, 1 }
 0x53e   :  { %v2420_v53 = vpop.eup %2419 }
 0x53f   :  { %v918_v7 = vmul.f32 %v2420_v53, %v916_v51  ;;  %vm923_vm13 = vweird.f32 %v2420_v53 }
 0x540   :  { %vm924_vm15 = vmor %vm922_vm14, %vm923_vm13 }
 0x541   :  { %v919_v8 = vsub.f32 1.0, %v918_v7 }
 0x543   :  { %v920_v9 = vmul.f32 %v2420_v53, %v919_v8 }
 0x545   :  { %v921_v10 = vadd.f32 %v2420_v53, %v920_v9 }
 0x547   :  { %v925_v13 = vsel %vm924_vm15, %v2420_v53, %v921_v10 }
 0x548   :  { %v930_v17 = vsel %vm927_vm2, %v929_v15, %v925_v13  ;;  %v3397_v15 = vadd.f32 %v1030_v12, %v3345_v31 }
 0x549   :  { %v945_v22 = vsub.f32 1.0, %v930_v17  ;;  %v953_v30 = vmul.f32 %v951_v25, %v930_v17 }
 0x587   :  { %v936_v16 = vpop.permute.xlu2 %935 }
 0x588   :  { %v938_v18 = vmul.f32 %v936_v16, %v930_v17 }
 0x58a   :  { %940 = vrot.lane.b32.xlu0 %v938_v18, %s2534_s26 }
 0x5fc   :  { %v941_v19 = vpop.permute.xlu0 %940 }
 0x5fd   :  { %v943_v20 = vadd.f32 %v941_v19, %v3365_v2 }
 0x5ff   :  { %2421 = vtanh.f32 %v943_v20 }
 0x605   :  { %v2422_v21 = vpop.eup %2421 }
 0x606   :  { %947 = vrot.lane.b32.xlu1 %v2422_v21, %s2537_s12 }
 0x678   :  { %v948_v28 = vpop.permute.xlu1 %947 }
 0x679   :  { %v950_v29 = vmul.f32 %v948_v28, %v945_v22 }
 0x67b   :  { %v3372_v32 = vadd.f32 %v953_v30, %v950_v29 }
 0x67d   :  { %v959_v33 = vrot.slane %v3372_v32, 1  ;;  %v1026_v3 = vrot.slane %v3372_v32, 7 }
 0x67f   :  { %960 = vrot.lane.b32.xlu2 %v959_v33, %s2537_s12 }
 0x6d9   :  { %v961_v1 = vpop.permute.xlu2 %960 }
 0x6da   :  { %2366 = vmatmul.msk.f32.vlgmr.msrb.gmra.mxu1 %vm812_vm12, %v961_v1 }
 0x757   :  { %v981_v34 = vpop.f32.mrf.mxu1 }
 0x758   :  { %v1007_v35 = vadd.f32 %v981_v34, %v3270_v57  ;;  %v985_v38 = vrot.slane %v981_v34, 6 }
 0x75a   :  { %v1009_v36 = vrot.slane %v1007_v35, 6  ;;  %v987_v40 = vadd.f32 %v985_v38, %v3381_v39 }
 0x75c   :  { %1010 = vrot.lane.b32.xlu0 %v1009_v36, %s2536_s27  ;;  %v2367_v42 = vmul.f32 -1.442695, %v987_v40 }
 0x75e   :  { %2423 = vpow2.f32 %v2367_v42 }
 0x764   :  { %v2424_v44 = vpop.eup %2423 }
 0x765   :  { %v991_v46 = vadd.f32 1.0, %v2424_v44 }
 0x767   :  { %2425 = vrcp.f32 %v991_v46  ;;  %v1003_v43 = vand.u32 2147483648, %v991_v46  ;;  %vm997_vm4 = vweird.f32 %v991_v46  ;;  %v1001_v45 = vand.u32 2147483647, %v991_v46 }
 0x769   :  { %v1004_v49 = vor.u32 1.1754944e-38, %v1003_v43  ;;  %vm1002_vm6 = vcmp.eq.f32.partialorder %v1001_v45, 8.507059e+37 }
 0x76d   :  { %v2426_v48 = vpop.eup %2425 }
 0x76e   :  { %v993_v50 = vmul.f32 %v2426_v48, %v991_v46  ;;  %vm998_vm3 = vweird.f32 %v2426_v48 }
 0x76f   :  { %vm999_vm5 = vmor %vm997_vm4, %vm998_vm3 }
 0x770   :  { %v994_v52 = vsub.f32 1.0, %v993_v50 }
 0x772   :  { %v995_v54 = vmul.f32 %v2426_v48, %v994_v52 }
 0x774   :  { %v996_v41 = vadd.f32 %v2426_v48, %v995_v54 }
 0x776   :  { %v1000_v47 = vsel %vm999_vm5, %v2426_v48, %v996_v41 }
 0x777   :  { %v1005_v59 = vsel %vm1002_vm6, %v1004_v49, %v1000_v47 }
 0x778   :  { %v1020_v0 = vsub.f32 1.0, %v1005_v59  ;;  %v1028_v6 = vmul.f32 %v1026_v3, %v1005_v59 }
 0x7ce   :  { %v1011_v55 = vpop.permute.xlu0 %1010 }
 0x7cf   :  { %v1013_v60 = vmul.f32 %v1011_v55, %v1005_v59 }
 0x7d1   :  { %1015 = vrot.lane.b32.xlu1 %v1013_v60, %s2534_s26 }
 0x843   :  { %v1016_v61 = vpop.permute.xlu1 %1015 }
 0x844   :  { %v1018_v62 = vadd.f32 %v1016_v61, %v3381_v39 }
 0x846   :  { %2427 = vtanh.f32 %v1018_v62 }
 0x84c   :  { %v2428_v63 = vpop.eup %2427 }
 0x84d   :  { %1022 = vrot.lane.b32.xlu2 %v2428_v63, %s2537_s12 }
 0x8a7   :  { %v1023_v4 = vpop.permute.xlu2 %1022 }
 0x8a8   :  { %v1025_v51 = vmul.f32 %v1023_v4, %v1020_v0 }
 0x8aa   :  { %v3388_v53 = vadd.f32 %v1028_v6, %v1025_v51 }
 0x8ac   :  { %v1034_v7 = vrot.slane %v3388_v53, 2  ;;  %v1101_v40 = vrot.slane %v3388_v53, 7 }
 0x8ae   :  { %1035 = vrot.lane.b32.xlu0 %v1034_v7, %s2537_s12 }
 0x920   :  { %v1036_v8 = vpop.permute.xlu0 %1035 }
 0x921   :  { %2368 = vmatmul.msk.f32.vlgmr.msra.gmra.mxu2 %vm812_vm12, %v1036_v8 }
 0x9a4   :  { %v1056_v9 = vpop.f32.mrf.mxu2 }
 0x9a5   :  { %v1082_v10 = vadd.f32 %v1056_v9, %v3270_v57  ;;  %v1060_v13 = vrot.slane %v1056_v9, 5 }
 0x9a7   :  { %v1084_v11 = vrot.slane %v1082_v10, 5  ;;  %v1062_v16 = vadd.f32 %v1060_v13, %v3397_v15 }
 0x9a9   :  { %1085 = vrot.lane.b32.xlu1 %v1084_v11, %s2536_s27  ;;  %v2369_v17 = vmul.f32 -1.442695, %v1062_v16 }
 0x9ab   :  { %2429 = vpow2.f32 %v2369_v17 }
 0x9b1   :  { %v2430_v18 = vpop.eup %2429 }
 0x9b2   :  { %v1066_v19 = vadd.f32 1.0, %v2430_v18 }
 0x9b4   :  { %2431 = vrcp.f32 %v1066_v19  ;;  %v1078_v29 = vand.u32 2147483648, %v1066_v19  ;;  %vm1072_vm8 = vweird.f32 %v1066_v19  ;;  %v1076_v27 = vand.u32 2147483647, %v1066_v19 }
 0x9b6   :  { %v1079_v31 = vor.u32 1.1754944e-38, %v1078_v29  ;;  %vm1077_vm10 = vcmp.eq.f32.partialorder %v1076_v27, 8.507059e+37 }
 0x9ba   :  { %v2432_v20 = vpop.eup %2431 }
 0x9bb   :  { %v1068_v21 = vmul.f32 %v2432_v20, %v1066_v19  ;;  %vm1073_vm7 = vweird.f32 %v2432_v20 }
 0x9bc   :  { %vm1074_vm9 = vmor %vm1072_vm8, %vm1073_vm7 }
 0x9bd   :  { %v1069_v22 = vsub.f32 1.0, %v1068_v21 }
 0x9bf   :  { %v1070_v25 = vmul.f32 %v2432_v20, %v1069_v22 }
 0x9c1   :  { %v1071_v28 = vadd.f32 %v2432_v20, %v1070_v25 }
 0x9c3   :  { %v1075_v30 = vsel %vm1074_vm9, %v2432_v20, %v1071_v28 }
 0x9c4   :  { %v1080_v1 = vsel %vm1077_vm10, %v1079_v31, %v1075_v30 }
 0x9c5   :  { %v1095_v38 = vsub.f32 1.0, %v1080_v1  ;;  %v1103_v44 = vmul.f32 %v1101_v40, %v1080_v1 }
 0xa1b   :  { %v1086_v33 = vpop.permute.xlu1 %1085 }
 0xa1c   :  { %v1088_v34 = vmul.f32 %v1086_v33, %v1080_v1 }
 0xa1e   :  { %1090 = vrot.lane.b32.xlu2 %v1088_v34, %s2534_s26 }
 0xa78   :  { %v1091_v35 = vpop.permute.xlu2 %1090 }
 0xa79   :  { %v1093_v36 = vadd.f32 %v1091_v35, %v3397_v15 }
 0xa7b   :  { %2433 = vtanh.f32 %v1093_v36 }
 0xa81   :  { %v2434_v37 = vpop.eup %2433 }
 0xa82   :  { %1097 = vrot.lane.b32.xlu0 %v2434_v37, %s2537_s12 }
 0xaf4   :  { %v1098_v42 = vpop.permute.xlu0 %1097 }
 0xaf5   :  { %v1100_v46 = vmul.f32 %v1098_v42, %v1095_v38 }
 0xaf7   :  { %v3404_v48 = vadd.f32 %v1103_v44, %v1100_v46 }
 0xaf9   :  { %v1106_v50 = vrot.slane %v3404_v48, 3  ;;  %v1173_v16 = vrot.slane %v3404_v48, 7 }
 0xafb   :  { %1107 = vrot.lane.b32.xlu1 %v1106_v50, %s2537_s12 }
 0xb6d   :  { %v1108_v52 = vpop.permute.xlu1 %1107 }
 0xb6e   :  { %2370 = vmatmul.msk.f32.vlgmr.msra.gmra.mxu1 %vm812_vm12, %v1108_v52 }
 0xbeb   :  { %v1128_v54 = vpop.f32.mrf.mxu1 }
 0xbec   :  { %v1154_v41 = vadd.f32 %v1128_v54, %v3270_v57  ;;  %v1132_v45 = vrot.slane %v1128_v54, 4 }
 0xbee   :  { %v1156_v43 = vrot.slane %v1154_v41, 4  ;;  %v1134_v47 = vadd.f32 %v1132_v45, %v3348_v5 }
 0xbf0   :  { %1157 = vrot.lane.b32.xlu2 %v1156_v43, %s2536_s27  ;;  %v2371_v49 = vmul.f32 -1.442695, %v1134_v47 }
 0xbf2   :  { %2435 = vpow2.f32 %v2371_v49 }
 0xbf8   :  { %v2436_v55 = vpop.eup %2435 }
 0xbf9   :  { %v1138_v59 = vadd.f32 1.0, %v2436_v55 }
 0xbfb   :  { %2437 = vrcp.f32 %v1138_v59  ;;  %v1150_v3 = vand.u32 2147483648, %v1138_v59  ;;  %vm1144_vm13 = vweird.f32 %v1138_v59  ;;  %v1148_v4 = vand.u32 2147483647, %v1138_v59 }
 0xbfd   :  { %v1151_v51 = vor.u32 1.1754944e-38, %v1150_v3  ;;  %vm1149_vm15 = vcmp.eq.f32.partialorder %v1148_v4, 8.507059e+37 }
 0xc01   :  { %v2438_v60 = vpop.eup %2437 }
 0xc02   :  { %v1140_v61 = vmul.f32 %v2438_v60, %v1138_v59  ;;  %vm1145_vm11 = vweird.f32 %v2438_v60 }
 0xc03   :  { %vm1146_vm14 = vmor %vm1144_vm13, %vm1145_vm11 }
 0xc04   :  { %v1141_v62 = vsub.f32 1.0, %v1140_v61 }
 0xc06   :  { %v1142_v63 = vmul.f32 %v2438_v60, %v1141_v62 }
 0xc08   :  { %v1143_v0 = vadd.f32 %v2438_v60, %v1142_v63 }
 0xc0a   :  { %v1147_v6 = vsel %vm1146_vm14, %v2438_v60, %v1143_v0 }
 0xc0b   :  { %v1152_v8 = vsel %vm1149_vm15, %v1151_v51, %v1147_v6 }
 0xc0c   :  { %v1167_v13 = vsub.f32 1.0, %v1152_v8  ;;  %v1175_v18 = vmul.f32 %v1173_v16, %v1152_v8 }
 0xc4a   :  { %v1158_v7 = vpop.permute.xlu2 %1157 }
 0xc4b   :  { %v1160_v9 = vmul.f32 %v1158_v7, %v1152_v8 }
 0xc4d   :  { %1162 = vrot.lane.b32.xlu0 %v1160_v9, %s2534_s26 }
 0xcbf   :  { %v1163_v10 = vpop.permute.xlu0 %1162 }
 0xcc0   :  { %v1165_v11 = vadd.f32 %v1163_v10, %v3348_v5 }
 0xcc2   :  { %2439 = vtanh.f32 %v1165_v11 }
 0xcc8   :  { %v2440_v12 = vpop.eup %2439 }
 0xcc9   :  { %1169 = vrot.lane.b32.xlu1 %v2440_v12, %s2537_s12 }
 0xd3b   :  { %v1170_v17 = vpop.permute.xlu1 %1169 }
 0xd3c   :  { %v1172_v19 = vmul.f32 %v1170_v17, %v1167_v13 }
 0xd3e   :  { %v3416_v20 = vadd.f32 %v1175_v18, %v1172_v19 }
 0xd40   :  { %v1178_v21 = vrot.slane %v3416_v20, 4  ;;  %v1245_v47 = vrot.slane %v3416_v20, 7 }
 0xd42   :  { %1179 = vrot.lane.b32.xlu2 %v1178_v21, %s2537_s12 }
 0xd9c   :  { %v1180_v22 = vpop.permute.xlu2 %1179 }
 0xd9d   :  { %2372 = vmatmul.msk.f32.vlgmr.msrb.gmra.mxu2 %vm812_vm12, %v1180_v22 }
 0xe20   :  { %v1200_v5 = vpop.f32.mrf.mxu2 }
 0xe21   :  { %v1226_v25 = vadd.f32 %v1200_v5, %v3270_v57  ;;  %v1204_v29 = vrot.slane %v1200_v5, 3 }
 0xe23   :  { %v1228_v28 = vrot.slane %v1226_v25, 3  ;;  %v1206_v27 = vadd.f32 %v1204_v29, %v3365_v2 }
 0xe25   :  { %1229 = vrot.lane.b32.xlu0 %v1228_v28, %s2536_s27  ;;  %v2373_v30 = vmul.f32 -1.442695, %v1206_v27 }
 0xe27   :  { %2441 = vpow2.f32 %v2373_v30 }
 0xe2d   :  { %v2442_v31 = vpop.eup %2441 }
 0xe2e   :  { %v1210_v33 = vadd.f32 1.0, %v2442_v31 }
 0xe30   :  { %2443 = vrcp.f32 %v1210_v33  ;;  %v1222_v38 = vand.u32 2147483648, %v1210_v33  ;;  %vm1216_vm3 = vweird.f32 %v1210_v33  ;;  %v1220_v40 = vand.u32 2147483647, %v1210_v33 }
 0xe32   :  { %v1223_v44 = vor.u32 1.1754944e-38, %v1222_v38  ;;  %vm1221_vm5 = vcmp.eq.f32.partialorder %v1220_v40, 8.507059e+37 }
 0xe36   :  { %v2444_v1 = vpop.eup %2443 }
 0xe37   :  { %v1212_v34 = vmul.f32 %v2444_v1, %v1210_v33  ;;  %vm1217_vm2 = vweird.f32 %v2444_v1 }
 0xe38   :  { %vm1218_vm4 = vmor %vm1216_vm3, %vm1217_vm2 }
 0xe39   :  { %v1213_v35 = vsub.f32 1.0, %v1212_v34 }
 0xe3b   :  { %v1214_v36 = vmul.f32 %v2444_v1, %v1213_v35 }
 0xe3d   :  { %v1215_v37 = vadd.f32 %v2444_v1, %v1214_v36 }
 0xe3f   :  { %v1219_v42 = vsel %vm1218_vm4, %v2444_v1, %v1215_v37 }
 0xe40   :  { %v1224_v50 = vsel %vm1221_vm5, %v1223_v44, %v1219_v42 }
 0xe41   :  { %v1239_v45 = vsub.f32 1.0, %v1224_v50  ;;  %v1247_v55 = vmul.f32 %v1245_v47, %v1224_v50 }
 0xe97   :  { %v1230_v46 = vpop.permute.xlu0 %1229 }
 0xe98   :  { %v1232_v52 = vmul.f32 %v1230_v46, %v1224_v50 }
 0xe9a   :  { %1234 = vrot.lane.b32.xlu1 %v1232_v52, %s2534_s26 }
 0xf0c   :  { %v1235_v54 = vpop.permute.xlu1 %1234 }
 0xf0d   :  { %v1237_v41 = vadd.f32 %v1235_v54, %v3365_v2 }
 0xf0f   :  { %2445 = vtanh.f32 %v1237_v41 }
 0xf15   :  { %v2446_v43 = vpop.eup %2445 }
 0xf16   :  { %1241 = vrot.lane.b32.xlu2 %v2446_v43, %s2537_s12 }
 0xf70   :  { %v1242_v49 = vpop.permute.xlu2 %1241 }
 0xf71   :  { %v1244_v59 = vmul.f32 %v1242_v49, %v1239_v45 }
 0xf73   :  { %v3428_v60 = vadd.f32 %v1247_v55, %v1244_v59 }
 0xf75   :  { %v1250_v61 = vrot.slane %v3428_v60, 5  ;;  %v1317_v27 = vrot.slane %v3428_v60, 7 }
 0xf77   :  { %1251 = vrot.lane.b32.xlu0 %v1250_v61, %s2537_s12 }
 0xfe9   :  { %v1252_v62 = vpop.permute.xlu0 %1251 }
 0xfea   :  { %2374 = vmatmul.msk.f32.vlgmr.msra.gmra.mxu0 %vm812_vm12, %v1252_v62 }
0x1067   :  { %v1272_v2 = vpop.f32.mrf.mxu0 }
0x1068   :  { %v1298_v63 = vadd.f32 %v1272_v2, %v3270_v57  ;;  %v1276_v3 = vrot.slane %v1272_v2, 2 }
0x106a   :  { %v1300_v0 = vrot.slane %v1298_v63, 2  ;;  %v1278_v4 = vadd.f32 %v1276_v3, %v3381_v39 }
0x106c   :  { %1301 = vrot.lane.b32.xlu1 %v1300_v0, %s2536_s27  ;;  %v2375_v6 = vmul.f32 -1.442695, %v1278_v4 }
0x106e   :  { %2447 = vpow2.f32 %v2375_v6 }
0x1074   :  { %v2448_v51 = vpop.eup %2447 }
0x1075   :  { %v1282_v7 = vadd.f32 1.0, %v2448_v51 }
0x1077   :  { %2449 = vrcp.f32 %v1282_v7  ;;  %v1294_v13 = vand.u32 2147483648, %v1282_v7  ;;  %vm1288_vm7 = vweird.f32 %v1282_v7  ;;  %v1292_v16 = vand.u32 2147483647, %v1282_v7 }
0x1079   :  { %v1295_v18 = vor.u32 1.1754944e-38, %v1294_v13  ;;  %vm1293_vm9 = vcmp.eq.f32.partialorder %v1292_v16, 8.507059e+37  ;;  %v1474_v13 = vld [vmem:[%s3897_s14 + $0x8] sm:$0xff] }
0x107a   :  { %1498 = vmatpush.msrb.mxu1 %v1474_v13 }
0x107d   :  { %v2450_v8 = vpop.eup %2449 }
0x107e   :  { %v1284_v9 = vmul.f32 %v2450_v8, %v1282_v7  ;;  %vm1289_vm6 = vweird.f32 %v2450_v8  ;;  %v3458_v7 = vld [vmem:[%s3899_s16 + $0x8] sm:$0xff] }
0x107f   :  { %vm1290_vm8 = vmor %vm1288_vm7, %vm1289_vm6  ;;  %1547 = vmatpush.msrb.mxu0 %v3458_v7  ;;  %1620 = vmatpush.msra.mxu3 %v3458_v7 }
0x1080   :  { %v1285_v10 = vsub.f32 1.0, %v1284_v9 }
0x1082   :  { %v1286_v11 = vmul.f32 %v2450_v8, %v1285_v10 }
0x1084   :  { %v1287_v12 = vadd.f32 %v2450_v8, %v1286_v11  ;;  %v1505_v11 = vld [vmem:[%s3898_s15 + $0x8] sm:$0xff] }
0x1085   :  { %1520 = vmatpush.msra.mxu2 %v1505_v11 }
0x1086   :  { %v1291_v17 = vsel %vm1290_vm8, %v2450_v8, %v1287_v12  ;;  %v3463_v8 = vld [vmem:[%s3899_s16] sm:$0xff] }
0x1087   :  { %v1296_v21 = vsel %vm1293_vm9, %v1295_v18, %v1291_v17  ;;  %v1504_v12 = vld [vmem:[%s3898_s15] sm:$0xff]  ;;  %1548 = vmatpush.msrb.mxu0 %v3463_v8  ;;  %1621 = vmatpush.msra.mxu3 %v3463_v8 }
0x1088   :  { %v1311_v29 = vsub.f32 1.0, %v1296_v21  ;;  %v1319_v31 = vmul.f32 %v1317_v27, %v1296_v21  ;;  %v1473_v18 = vld [vmem:[%s3897_s14] sm:$0xff]  ;;  %1549 = vmatmul.f32.vlgmr.msrb.gmra.mxu0 %v2535_v23  ;;  %1521 = vmatpush.msra.mxu2 %v1504_v12 }
0x1089   :  { %1499 = vmatpush.msrb.mxu1 %v1473_v18  ;;  %1842 = vmatpush.msra.mxu0 %v3458_v7 }
0x108a   :  { %1770 = vmatpush.msrb.mxu2 %v3458_v7 }
0x108b   :  { %1695 = vmatpush.msra.mxu1 %v3458_v7  ;;  %1843 = vmatpush.msra.mxu0 %v3463_v8 }
0x108c   :  { %1771 = vmatpush.msrb.mxu2 %v3463_v8 }
0x108d   :  { %1696 = vmatpush.msra.mxu1 %v3463_v8 }
0x10de   :  { %v1302_v19 = vpop.permute.xlu1 %1301 }
0x10df   :  { %v1304_v22 = vmul.f32 %v1302_v19, %v1296_v21 }
0x10e1   :  { %1306 = vrot.lane.b32.xlu2 %v1304_v22, %s2534_s26 }
0x113b   :  { %v1307_v5 = vpop.permute.xlu2 %1306 }
0x113c   :  { %v1309_v25 = vadd.f32 %v1307_v5, %v3381_v39  ;;  %v694_v39 = vlaneseq }
0x113e   :  { %2451 = vtanh.f32 %v1309_v25  ;;  %v695_v36 = vand.u32 127, %v694_v39 }
0x1140   :  { %vm696_vm10 = vcmp.lt.s32.totalorder %v695_v36, 8 }
0x1141   :  { %v2352_v42 = vsel %vm696_vm10, 1.0, %v2535_v23 }
0x1142   :  { %v699_v44 = vsub.f32 1.0, %v2352_v42 }
0x1144   :  { %v2452_v28 = vpop.eup %2451 }
0x1145   :  { %1313 = vrot.lane.b32.xlu0 %v2452_v28, %s2537_s12  ;;  %v3495_v28 = vshrl.u32 %v694_v39, 7 }
0x1147   :  { %vm702_vm2 = vcmp.eq.s32.totalorder %v3495_v28, 0  ;;  %vm705_vm3 = vcmp.eq.s32.totalorder %v3495_v28, 1  ;;  %vm708_vm4 = vcmp.eq.s32.totalorder %v3495_v28, 2  ;;  %vm711_vm5 = vcmp.eq.s32.totalorder %v3495_v28, 3 }
0x1148   :  { %vm714_vm6 = vcmp.eq.s32.totalorder %v3495_v28, 4  ;;  %vm717_vm7 = vcmp.eq.s32.totalorder %v3495_v28, 5  ;;  %vm720_vm8 = vcmp.eq.s32.totalorder %v3495_v28, 6  ;;  %vm723_vm9 = vcmp.eq.s32.totalorder %v3495_v28, 7 }
0x11b7   :  { %v1314_v30 = vpop.permute.xlu0 %1313 }
0x11b8   :  { %v1316_v33 = vmul.f32 %v1314_v30, %v1311_v29 }
0x11ba   :  { %v3440_v1 = vadd.f32 %v1319_v31, %v1316_v33 }
0x11bc   :  { %v1322_v34 = vrot.slane %v3440_v1, 6  ;;  %v1389_v10 = vrot.slane %v3440_v1, 7 }
0x11be   :  { %1323 = vrot.lane.b32.xlu1 %v1322_v34, %s2537_s12 }
0x1230   :  { %v1324_v35 = vpop.permute.xlu1 %1323 }
0x1231   :  { %2376 = vmatmul.msk.f32.vlgmr.msrb.gmra.mxu3 %vm812_vm12, %v1324_v35 }
0x1232   :  { %1914 = vmatpush.msrb.mxu3 %v3458_v7 }
0x1234   :  { %1915 = vmatpush.msrb.mxu3 %v3463_v8 }
0x12b4   :  { %v1344_v37 = vpop.f32.mrf.mxu3 }
0x12b5   :  { %v1370_v38 = vadd.f32 %v1344_v37, %v3270_v57  ;;  %v1348_v46 = vrot.slane %v1344_v37, 1 }
0x12b7   :  { %v1372_v40 = vrot.slane %v1370_v38, 1  ;;  %v1350_v50 = vadd.f32 %v1348_v46, %v3397_v15 }
0x12b9   :  { %1373 = vrot.lane.b32.xlu2 %v1372_v40, %s2536_s27  ;;  %v2377_v52 = vmul.f32 -1.442695, %v1350_v50 }
0x12bb   :  { %2453 = vpow2.f32 %v2377_v52 }
0x12c1   :  { %1399 = vrot.lane.b32.xlu2 %v699_v44, %s2538_s10  ;;  %v2454_v54 = vpop.eup %2453 }
0x12c2   :  { %v1354_v41 = vadd.f32 1.0, %v2454_v54 }
0x12c4   :  { %2455 = vrcp.f32 %v1354_v41  ;;  %v1366_v55 = vand.u32 2147483648, %v1354_v41  ;;  %vm1360_vm13 = vweird.f32 %v1354_v41  ;;  %v1364_v59 = vand.u32 2147483647, %v1354_v41 }
0x12c6   :  { %v1367_v62 = vor.u32 1.1754944e-38, %v1366_v55  ;;  %vm1365_vm15 = vcmp.eq.f32.partialorder %v1364_v59, 8.507059e+37 }
0x12ca   :  { %v2456_v43 = vpop.eup %2455 }
0x12cb   :  { %v1356_v45 = vmul.f32 %v2456_v43, %v1354_v41  ;;  %vm1361_vm11 = vweird.f32 %v2456_v43 }
0x12cc   :  { %vm1362_vm14 = vmor %vm1360_vm13, %vm1361_vm11 }
0x12cd   :  { %v1357_v57 = vsub.f32 1.0, %v1356_v45  ;;  %v3533_v45 = vsel %vm702_vm2, 1.0, %v2535_v23 }
0x12cf   :  { %v1358_v47 = vmul.f32 %v2456_v43, %v1357_v57 }
0x12d1   :  { %v1359_v49 = vadd.f32 %v2456_v43, %v1358_v47 }
0x12d3   :  { %v1363_v61 = vsel %vm1362_vm14, %v2456_v43, %v1359_v49  ;;  %v3544_v49 = vsel %vm708_vm4, 1.0, %v2535_v23 }
0x12d4   :  { %v1368_v63 = vsel %vm1365_vm15, %v1367_v62, %v1363_v61 }
0x12d5   :  { %v1383_v16 = vsub.f32 1.0, %v1368_v63  ;;  %v1391_v19 = vmul.f32 %v1389_v10, %v1368_v63  ;;  %v3556_v10 = vsel %vm714_vm6, 1.0, %v2535_v23 }
0x1313   :  { %v1374_v2 = vpop.permute.xlu2 %1373 }
0x1314   :  { %v1376_v0 = vmul.f32 %v1374_v2, %v1368_v63 }
0x1316   :  { %1378 = vrot.lane.b32.xlu0 %v1376_v0, %s2534_s26 }
0x131b   :  { %v3453_v51 = vpop.permute.xlu2 %1399 }
0x131c   :  { %v1411_v17 = vmul.f32 %v3453_v51, %v3440_v1  ;;  %v1420_v22 = vmul.f32 %v3453_v51, %v3428_v60  ;;  %v1429_v29 = vmul.f32 %v3453_v51, %v3416_v20  ;;  %v1438_v33 = vmul.f32 %v3453_v51, %v3404_v48 }
0x131d   :  { %v1447_v38 = vmul.f32 %v3453_v51, %v3388_v53  ;;  %v1465_v46 = vmul.f32 %v3453_v51, %v3354_v56 }
0x131e   :  { %1394 = vrot.lane.b32.xlu0 %v2352_v42, %s2538_s10  ;;  %v1413_v27 = vrot.slane %v1411_v17, 5  ;;  %v1422_v34 = vrot.slane %v1420_v22, 3  ;;  %v1431_v37 = vrot.slane %v1429_v29, 1  ;;  %v1440_v50 = vrot.slane %v1438_v33, 7 }
0x131f   :  { %v1467_v0 = vrot.slane %v1465_v46, 1  ;;  %v3561_v17 = vsel %vm717_vm7, 1.0, %v2535_v23  ;;  %v3566_v22 = vsel %vm720_vm8, 1.0, %v2535_v23 }
0x1388   :  { %v1379_v3 = vpop.permute.xlu0 %1378 }
0x1389   :  { %v1381_v4 = vadd.f32 %v1379_v3, %v3397_v15  ;;  %v2406_v15 = vld [vmem:[%s3901_s18] ss:$0 sm:$0xff]  ;;  %v3551_v3 = vsel %vm711_vm5, 1.0, %v2535_v23 }
0x138a   :  { %1575 = vrot.lane.b32.xlu2 %v2406_v15, %s2534_s26 }
0x138b   :  { %2457 = vtanh.f32 %v1381_v4 }
0x1390   :  { %v3468_v9 = vpop.permute.xlu0 %1394 }
0x1391   :  { %v2458_v6 = vpop.eup %2457  ;;  %v1410_v25 = vmul.f32 %v3468_v9, %v3372_v32  ;;  %v1419_v31 = vmul.f32 %v3468_v9, %v3388_v53  ;;  %v1428_v36 = vmul.f32 %v3468_v9, %v3404_v48  ;;  %v1397_v40 = vmul.f32 %v3468_v9, %v3354_v56 }
0x1392   :  { %1385 = vrot.lane.b32.xlu1 %v2458_v6, %s2537_s12  ;;  %v1437_v44 = vmul.f32 %v3468_v9, %v3416_v20  ;;  %v1446_v52 = vmul.f32 %v3468_v9, %v3428_v60  ;;  %v1456_v53 = vmul.f32 %v3453_v51, %v3372_v32  ;;  %v3538_v56 = vsel %vm705_vm3, 1.0, %v2535_v23 }
0x1393   :  { %v1415_v39 = vadd.f32 %v1413_v27, %v1410_v25  ;;  %v1424_v42 = vadd.f32 %v1422_v34, %v1419_v31  ;;  %v1433_v43 = vadd.f32 %v1431_v37, %v1428_v36  ;;  %v1449_v20 = vrot.slane %v1447_v38, 5 }
0x1394   :  { %v1442_v57 = vadd.f32 %v1440_v50, %v1437_v44  ;;  %v1455_v47 = vmul.f32 %v3468_v9, %v3440_v1  ;;  %v1458_v59 = vrot.slane %v1456_v53, 3  ;;  %v3570_v27 = vsel %vm723_vm9, 1.0, %v2535_v23  ;;  %v2407_v23 = vld [vmem:[%s3900_s17] ss:$0 sm:$0xff] }
0x1395   :  { %v1416_v41 = vperm.slane %v1415_v39, 1  ;;  %v1425_v32 = vperm.slane %v1424_v42, 2  ;;  %v1451_v55 = vadd.f32 %v1449_v20, %v1446_v52  ;;  %v1434_v63 = vperm.slane %v1433_v43, 3  ;;  %v1550_v39 = vpop.f32.mrf.mxu0 }
0x1396   :  { %v1443_v6 = vperm.slane %v1442_v57, 4  ;;  %v1460_v15 = vadd.f32 %v1458_v59, %v1455_v47 }
0x1397   :  { %v1417_v62 = vmul.f32 %v3538_v56, %v1416_v41  ;;  %v1426_v4 = vmul.f32 %v3544_v49, %v1425_v32  ;;  %v1435_v13 = vmul.f32 %v3551_v3, %v1434_v63 }
0x1404   :  { %v1386_v21 = vpop.permute.xlu1 %1385 }
0x1405   :  { %v1388_v5 = vmul.f32 %v1386_v21, %v1383_v16  ;;  %v1452_v16 = vperm.slane %v1451_v55, 5  ;;  %v1461_v21 = vperm.slane %v1460_v15, 6 }
0x1407   :  { %v1392_v30 = vadd.f32 %v1391_v19, %v1388_v5  ;;  %v1444_v19 = vmul.f32 %v3556_v10, %v1443_v6  ;;  %v1453_v29 = vmul.f32 %v3561_v17, %v1452_v16  ;;  %v1462_v31 = vmul.f32 %v3566_v22, %v1461_v21 }
0x1409   :  { %v1402_v35 = vmul.f32 %v3453_v51, %v1392_v30  ;;  %v1464_v2 = vmul.f32 %v3468_v9, %v1392_v30 }
0x140b   :  { %v1404_v48 = vrot.slane %v1402_v35, 7  ;;  %v1469_v12 = vadd.f32 %v1467_v0, %v1464_v2  ;;  %v3575_v35 = vpop.permute.xlu2 %1575 }
0x140c   :  { %v1578_v36 = vadd.f32 %v3575_v35, %v1550_v39 }
0x140d   :  { %v1406_v54 = vadd.f32 %v1404_v48, %v1397_v40  ;;  %v1470_v5 = vperm.slane %v1469_v12, 7 }
0x140e   :  { %1580 = vrot.lane.b32.xlu0 %v1578_v36, %s2536_s27 }
0x140f   :  { %v1407_v60 = vperm.slane %v1406_v54, 0  ;;  %v1471_v28 = vmul.f32 %v3570_v27, %v1470_v5 }
0x1411   :  { %v1408_v61 = vmul.f32 %v3533_v45, %v1407_v60 }
0x1413   :  { %v1418_v1 = vadd.f32 %v1417_v62, %v1408_v61 }
0x1415   :  { %v1427_v11 = vadd.f32 %v1426_v4, %v1418_v1 }
0x1417   :  { %v1436_v18 = vadd.f32 %v1435_v13, %v1427_v11 }
0x1419   :  { %v1445_v25 = vadd.f32 %v1444_v19, %v1436_v18 }
0x141b   :  { %v1454_v30 = vadd.f32 %v1453_v29, %v1445_v25 }
0x141d   :  { %v1463_v33 = vadd.f32 %v1462_v31, %v1454_v30 }
0x141f   :  { %v1472_v34 = vadd.f32 %v1471_v28, %v1463_v33 }
0x1421   :  { %1480 = vrot.lane.b32.xlu1 %v1472_v34, %s2537_s12 }
0x1480   :  { %v1581_v57 = vpop.permute.xlu0 %1580 }
0x1493   :  { %v1481_v37 = vpop.permute.xlu1 %1480 }
0x1494   :  { %2378 = vmatmul.msk.f32.vlgmr.msrb.gmra.mxu1 %vm812_vm12, %v1481_v37  ;;  %2379 = vmatmul.msk.f32.vlgmr.msra.gmra.mxu2 %vm812_vm12, %v1481_v37 }
0x1495   :  { %1986 = vmatpush.msrb.mxu1 %v3458_v7  ;;  %2058 = vmatpush.msra.mxu2 %v3458_v7 }
0x1497   :  { %1987 = vmatpush.msrb.mxu1 %v3463_v8  ;;  %2059 = vmatpush.msra.mxu2 %v3463_v8 }
0x1511   :  { %v1501_v38 = vpop.f32.mrf.mxu1 }
0x1512   :  { %v3590_v48 = vadd.f32 %v2407_v23, %v1501_v38 }
0x1517   :  { %v3588_v40 = vpop.f32.mrf.mxu2 }
0x1518   :  { %v1530_v42 = vrot.slane %v3588_v40, 7  ;;  %v1598_v16 = vrot.slane %v3588_v40, 5 }
0x151a   :  { %v3594_v44 = vadd.f32 %v1530_v42, %v3590_v48  ;;  %v3609_v19 = vadd.f32 %v1598_v16, %v3590_v48 }
0x151c   :  { %v1553_v7 = vadd.f32 %v1550_v39, %v3594_v44 }
0x151e   :  { %v2380_v46 = vmul.f32 -1.442695, %v1553_v7 }
0x1520   :  { %2459 = vpow2.f32 %v2380_v46 }
0x1526   :  { %v2460_v50 = vpop.eup %2459 }
0x1527   :  { %v1557_v8 = vadd.f32 1.0, %v2460_v50 }
0x1529   :  { %2461 = vrcp.f32 %v1557_v8  ;;  %v1569_v41 = vand.u32 2147483648, %v1557_v8  ;;  %v1567_v20 = vand.u32 2147483647, %v1557_v8  ;;  %vm1563_vm11 = vweird.f32 %v1557_v8 }
0x152b   :  { %v1570_v32 = vor.u32 1.1754944e-38, %v1569_v41  ;;  %vm1568_vm14 = vcmp.eq.f32.partialorder %v1567_v20, 8.507059e+37 }
0x152f   :  { %v2462_v52 = vpop.eup %2461 }
0x1530   :  { %v1559_v53 = vmul.f32 %v2462_v52, %v1557_v8  ;;  %vm1564_vm10 = vweird.f32 %v2462_v52 }
0x1531   :  { %vm1565_vm13 = vmor %vm1563_vm11, %vm1564_vm10 }
0x1532   :  { %v1560_v54 = vsub.f32 1.0, %v1559_v53 }
0x1534   :  { %v1561_v43 = vmul.f32 %v2462_v52, %v1560_v54 }
0x1536   :  { %v1562_v60 = vadd.f32 %v2462_v52, %v1561_v43 }
0x1538   :  { %v1566_v47 = vsel %vm1565_vm13, %v2462_v52, %v1562_v60 }
0x1539   :  { %v1571_v55 = vsel %vm1568_vm14, %v1570_v32, %v1566_v47 }
0x153a   :  { %v1583_v59 = vmul.f32 %v1581_v57, %v1571_v55  ;;  %v1590_v63 = vsub.f32 1.0, %v1571_v55  ;;  %v1596_v1 = vmul.f32 0.0, %v1571_v55  ;;  %v1672_v57 = vrot.slane %v3588_v40, 3 }
0x153c   :  { %1585 = vrot.lane.b32.xlu1 %v1583_v59, %s2534_s26  ;;  %v3623_v55 = vadd.f32 %v1672_v57, %v3590_v48 }
0x15ae   :  { %v1586_v61 = vpop.permute.xlu1 %1585 }
0x15af   :  { %v1588_v62 = vadd.f32 %v1586_v61, %v3594_v44 }
0x15b1   :  { %2463 = vtanh.f32 %v1588_v62 }
0x15b7   :  { %v2464_v2 = vpop.eup %2463 }
0x15b8   :  { %1592 = vrot.lane.b32.xlu2 %v2464_v2, %s2537_s12 }
0x1612   :  { %v1593_v0 = vpop.permute.xlu2 %1592 }
0x1613   :  { %v1595_v4 = vmul.f32 %v1593_v0, %v1590_v63 }
0x1615   :  { %v3600_v6 = vadd.f32 %v1596_v1, %v1595_v4 }
0x1617   :  { %1602 = vrot.lane.b32.xlu0 %v3600_v6, %s2537_s12  ;;  %v1668_v53 = vrot.slane %v3600_v6, 7 }
0x1689   :  { %v1603_v15 = vpop.permute.xlu0 %1602 }
0x168a   :  { %2381 = vmatmul.msk.f32.vlgmr.msra.gmra.mxu3 %vm812_vm12, %v1603_v15 }
0x170d   :  { %v1623_v11 = vpop.f32.mrf.mxu3 }
0x170e   :  { %v1649_v12 = vadd.f32 %v1623_v11, %v3575_v35  ;;  %v1627_v18 = vrot.slane %v1623_v11, 7 }
0x1710   :  { %v1651_v13 = vrot.slane %v1649_v12, 7  ;;  %v1629_v21 = vadd.f32 %v1627_v18, %v3609_v19 }
0x1712   :  { %1652 = vrot.lane.b32.xlu1 %v1651_v13, %s2536_s27  ;;  %v2382_v5 = vmul.f32 -1.442695, %v1629_v21 }
0x1714   :  { %2465 = vpow2.f32 %v2382_v5 }
0x171a   :  { %v2466_v25 = vpop.eup %2465 }
0x171b   :  { %v1633_v29 = vadd.f32 1.0, %v2466_v25 }
0x171d   :  { %2467 = vrcp.f32 %v1633_v29  ;;  %v1645_v39 = vand.u32 2147483648, %v1633_v29  ;;  %vm1639_vm2 = vweird.f32 %v1633_v29  ;;  %v1643_v36 = vand.u32 2147483647, %v1633_v29 }
0x171f   :  { %v1646_v23 = vor.u32 1.1754944e-38, %v1645_v39  ;;  %vm1644_vm4 = vcmp.eq.f32.partialorder %v1643_v36, 8.507059e+37 }
0x1723   :  { %v2468_v30 = vpop.eup %2467 }
0x1724   :  { %v1635_v31 = vmul.f32 %v2468_v30, %v1633_v29  ;;  %vm1640_vm15 = vweird.f32 %v2468_v30 }
0x1725   :  { %vm1641_vm3 = vmor %vm1639_vm2, %vm1640_vm15 }
0x1726   :  { %v1636_v33 = vsub.f32 1.0, %v1635_v31 }
0x1728   :  { %v1637_v28 = vmul.f32 %v2468_v30, %v1636_v33 }
0x172a   :  { %v1638_v34 = vadd.f32 %v2468_v30, %v1637_v28 }
0x172c   :  { %v1642_v37 = vsel %vm1641_vm3, %v2468_v30, %v1638_v34 }
0x172d   :  { %v1647_v42 = vsel %vm1644_vm4, %v1646_v23, %v1642_v37 }
0x172e   :  { %v1662_v52 = vsub.f32 1.0, %v1647_v42  ;;  %v1670_v43 = vmul.f32 %v1668_v53, %v1647_v42 }
0x1784   :  { %v1653_v38 = vpop.permute.xlu1 %1652 }
0x1785   :  { %v1655_v7 = vmul.f32 %v1653_v38, %v1647_v42 }
0x1787   :  { %1657 = vrot.lane.b32.xlu2 %v1655_v7, %s2534_s26 }
0x17e1   :  { %v1658_v46 = vpop.permute.xlu2 %1657 }
0x17e2   :  { %v1660_v50 = vadd.f32 %v1658_v46, %v3609_v19 }
0x17e4   :  { %2469 = vtanh.f32 %v1660_v50 }
0x17ea   :  { %v2470_v8 = vpop.eup %2469 }
0x17eb   :  { %1664 = vrot.lane.b32.xlu0 %v2470_v8, %s2537_s12 }
0x185d   :  { %v1665_v54 = vpop.permute.xlu0 %1664 }
0x185e   :  { %v1667_v41 = vmul.f32 %v1665_v54, %v1662_v52  ;;  %v1747_v52 = vrot.slane %v3588_v40, 1 }
0x1860   :  { %v3616_v20 = vadd.f32 %v1670_v43, %v1667_v41  ;;  %v3641_v54 = vadd.f32 %v1747_v52, %v3590_v48 }
0x1862   :  { %v1676_v60 = vrot.slane %v3616_v20, 1  ;;  %v1743_v25 = vrot.slane %v3616_v20, 7 }
0x1864   :  { %1677 = vrot.lane.b32.xlu1 %v1676_v60, %s2537_s12 }
0x18d6   :  { %v1678_v32 = vpop.permute.xlu1 %1677 }
0x18d7   :  { %2383 = vmatmul.msk.f32.vlgmr.msra.gmra.mxu1 %vm812_vm12, %v1678_v32 }
0x1954   :  { %v1698_v47 = vpop.f32.mrf.mxu1 }
0x1955   :  { %v1702_v59 = vrot.slane %v1698_v47, 6  ;;  %v1724_v61 = vadd.f32 %v1698_v47, %v3575_v35 }
0x1957   :  { %v1704_v62 = vadd.f32 %v1702_v59, %v3623_v55  ;;  %v1726_v2 = vrot.slane %v1724_v61, 6 }
0x1959   :  { %v2384_v63 = vmul.f32 -1.442695, %v1704_v62  ;;  %1727 = vrot.lane.b32.xlu2 %v1726_v2, %s2536_s27 }
0x195b   :  { %2471 = vpow2.f32 %v2384_v63 }
0x1961   :  { %v2472_v0 = vpop.eup %2471 }
0x1962   :  { %v1708_v1 = vadd.f32 1.0, %v2472_v0 }
0x1964   :  { %2473 = vrcp.f32 %v1708_v1  ;;  %v1720_v12 = vand.u32 2147483648, %v1708_v1  ;;  %v1718_v16 = vand.u32 2147483647, %v1708_v1  ;;  %vm1714_vm6 = vweird.f32 %v1708_v1 }
0x1966   :  { %v1721_v21 = vor.u32 1.1754944e-38, %v1720_v12  ;;  %vm1719_vm8 = vcmp.eq.f32.partialorder %v1718_v16, 8.507059e+37 }
0x196a   :  { %v2474_v4 = vpop.eup %2473 }
0x196b   :  { %v1710_v15 = vmul.f32 %v2474_v4, %v1708_v1  ;;  %vm1715_vm5 = vweird.f32 %v2474_v4 }
0x196c   :  { %vm1716_vm7 = vmor %vm1714_vm6, %vm1715_vm5 }
0x196d   :  { %v1711_v11 = vsub.f32 1.0, %v1710_v15 }
0x196f   :  { %v1712_v13 = vmul.f32 %v2474_v4, %v1711_v11 }
0x1971   :  { %v1713_v18 = vadd.f32 %v2474_v4, %v1712_v13 }
0x1973   :  { %v1717_v5 = vsel %vm1716_vm7, %v2474_v4, %v1713_v18 }
0x1974   :  { %v1722_v29 = vsel %vm1719_vm8, %v1721_v21, %v1717_v5 }
0x1975   :  { %v1745_v30 = vmul.f32 %v1743_v25, %v1722_v29  ;;  %v1737_v36 = vsub.f32 1.0, %v1722_v29 }
0x19b3   :  { %v1728_v31 = vpop.permute.xlu2 %1727 }
0x19b4   :  { %v1730_v33 = vmul.f32 %v1728_v31, %v1722_v29 }
0x19b6   :  { %1732 = vrot.lane.b32.xlu0 %v1730_v33, %s2534_s26 }
0x1a28   :  { %v1733_v28 = vpop.permute.xlu0 %1732 }
0x1a29   :  { %v1735_v34 = vadd.f32 %v1733_v28, %v3623_v55 }
0x1a2b   :  { %2475 = vtanh.f32 %v1735_v34 }
0x1a31   :  { %v2476_v39 = vpop.eup %2475 }
0x1a32   :  { %1739 = vrot.lane.b32.xlu1 %v2476_v39, %s2537_s12 }
0x1aa4   :  { %v1740_v37 = vpop.permute.xlu1 %1739 }
0x1aa5   :  { %v1742_v23 = vmul.f32 %v1740_v37, %v1737_v36 }
0x1aa7   :  { %v3632_v38 = vadd.f32 %v1745_v30, %v1742_v23 }
0x1aa9   :  { %v1751_v42 = vrot.slane %v3632_v38, 2  ;;  %v1818_v16 = vrot.slane %v3632_v38, 7 }
0x1aab   :  { %1752 = vrot.lane.b32.xlu2 %v1751_v42, %s2537_s12 }
0x1b05   :  { %v1753_v7 = vpop.permute.xlu2 %1752 }
0x1b06   :  { %2385 = vmatmul.msk.f32.vlgmr.msrb.gmra.mxu2 %vm812_vm12, %v1753_v7 }
0x1b89   :  { %v1773_v46 = vpop.f32.mrf.mxu2 }
0x1b8a   :  { %v1799_v50 = vadd.f32 %v1773_v46, %v3575_v35  ;;  %v1777_v53 = vrot.slane %v1773_v46, 5 }
0x1b8c   :  { %v1801_v8 = vrot.slane %v1799_v50, 5  ;;  %v1779_v41 = vadd.f32 %v1777_v53, %v3641_v54 }
0x1b8e   :  { %1802 = vrot.lane.b32.xlu0 %v1801_v8, %s2536_s27  ;;  %v2386_v43 = vmul.f32 -1.442695, %v1779_v41 }
0x1b90   :  { %2477 = vpow2.f32 %v2386_v43 }
0x1b96   :  { %v2478_v60 = vpop.eup %2477 }
0x1b97   :  { %v1783_v32 = vadd.f32 1.0, %v2478_v60 }
0x1b99   :  { %2479 = vrcp.f32 %v1783_v32  ;;  %v1795_v2 = vand.u32 2147483648, %v1783_v32  ;;  %vm1789_vm10 = vweird.f32 %v1783_v32  ;;  %v1793_v40 = vand.u32 2147483647, %v1783_v32 }
0x1b9b   :  { %v1796_v48 = vor.u32 1.1754944e-38, %v1795_v2  ;;  %vm1794_vm13 = vcmp.eq.f32.partialorder %v1793_v40, 8.507059e+37  ;;  %v2196_v2 = vld [vmem:[%s3902_s19 + $0x70] sm:$0xff]  ;;  %v2195_v40 = vld [vmem:[%s3902_s19 + $0x68] sm:$0xff] }
0x1b9f   :  { %v2480_v57 = vpop.eup %2479 }
0x1ba0   :  { %v1785_v47 = vmul.f32 %v2480_v57, %v1783_v32  ;;  %vm1790_vm9 = vweird.f32 %v2480_v57 }
0x1ba1   :  { %vm1791_vm11 = vmor %vm1789_vm10, %vm1790_vm9 }
0x1ba2   :  { %v1786_v59 = vsub.f32 1.0, %v1785_v47 }
0x1ba4   :  { %v1787_v61 = vmul.f32 %v2480_v57, %v1786_v59 }
0x1ba6   :  { %v1788_v62 = vadd.f32 %v2480_v57, %v1787_v61 }
0x1ba8   :  { %v1792_v63 = vsel %vm1791_vm11, %v2480_v57, %v1788_v62  ;;  %v2197_v62 = vld [vmem:[%s3902_s19 + $0x78] sm:$0xff] }
0x1ba9   :  { %v1797_v1 = vsel %vm1794_vm13, %v1796_v48, %v1792_v63  ;;  %2253 = vmatpush.msra.mxu3 %v2197_v62  ;;  %v2193_v63 = vld [vmem:[%s3902_s19 + $0x58] sm:$0xff]  ;;  %v2192_v48 = vld [vmem:[%s3902_s19 + $0x50] sm:$0xff] }
0x1baa   :  { %v1812_v13 = vsub.f32 1.0, %v1797_v1  ;;  %v1820_v21 = vmul.f32 %v1818_v16, %v1797_v1  ;;  %v2186_v16 = vld [vmem:[%s3902_s19 + $0x20] sm:$0xff] }
0x1bab   :  { %2254 = vmatpush.msra.mxu3 %v2196_v2 }
0x1bad   :  { %2255 = vmatpush.msra.mxu3 %v2195_v40 }
0x1c00   :  { %v1803_v0 = vpop.permute.xlu0 %1802 }
0x1c01   :  { %v1805_v4 = vmul.f32 %v1803_v0, %v1797_v1  ;;  %v2191_v0 = vld [vmem:[%s3902_s19 + $0x48] sm:$0xff]  ;;  %v2190_v1 = vld [vmem:[%s3902_s19 + $0x40] sm:$0xff] }
0x1c03   :  { %1807 = vrot.lane.b32.xlu1 %v1805_v4, %s2534_s26  ;;  %v2189_v4 = vld [vmem:[%s3902_s19 + $0x38] sm:$0xff] }
0x1c75   :  { %v1808_v15 = vpop.permute.xlu1 %1807 }
0x1c76   :  { %v1810_v11 = vadd.f32 %v1808_v15, %v3641_v54  ;;  %v2188_v15 = vld [vmem:[%s3902_s19 + $0x30] sm:$0xff] }
0x1c78   :  { %2481 = vtanh.f32 %v1810_v11  ;;  %v2187_v11 = vld [vmem:[%s3902_s19 + $0x28] sm:$0xff] }
0x1c7e   :  { %v2482_v12 = vpop.eup %2481 }
0x1c7f   :  { %1814 = vrot.lane.b32.xlu2 %v2482_v12, %s2537_s12 }
0x1cd9   :  { %v1815_v18 = vpop.permute.xlu2 %1814 }
0x1cda   :  { %v1817_v5 = vmul.f32 %v1815_v18, %v1812_v13 }
0x1cdc   :  { %v3648_v25 = vadd.f32 %v1820_v21, %v1817_v5 }
0x1cde   :  { %v1823_v29 = vrot.slane %v3648_v25, 3  ;;  %v1890_v13 = vrot.slane %v3648_v25, 7  ;;  %v2147_v21 = vmul.f32 %v3648_v25, %v3453_v51 }
0x1ce0   :  { %1824 = vrot.lane.b32.xlu0 %v1823_v29, %s2537_s12 }
0x1d52   :  { %v1825_v30 = vpop.permute.xlu0 %1824 }
0x1d53   :  { %2387 = vmatmul.msk.f32.vlgmr.msra.gmra.mxu0 %vm812_vm12, %v1825_v30 }
0x1dd0   :  { %v1845_v31 = vpop.f32.mrf.mxu0 }
0x1dd1   :  { %v1871_v33 = vadd.f32 %v1845_v31, %v3575_v35  ;;  %v1849_v34 = vrot.slane %v1845_v31, 4  ;;  %v2149_v31 = vrot.slane %v2147_v21, 7 }
0x1dd3   :  { %v1873_v28 = vrot.slane %v1871_v33, 4  ;;  %v1851_v39 = vadd.f32 %v1849_v34, %v3594_v44 }
0x1dd5   :  { %1874 = vrot.lane.b32.xlu1 %v1873_v28, %s2536_s27  ;;  %v2388_v36 = vmul.f32 -1.442695, %v1851_v39  ;;  %v2137_v39 = vmul.f32 %v3648_v25, %v3468_v9  ;;  %v2183_v25 = vld [vmem:[%s3902_s19 + $0x8] sm:$0xff] }
0x1dd7   :  { %2483 = vpow2.f32 %v2388_v36 }
0x1ddd   :  { %v2484_v37 = vpop.eup %2483 }
0x1dde   :  { %v1855_v23 = vadd.f32 1.0, %v2484_v37 }
0x1de0   :  { %2485 = vrcp.f32 %v1855_v23  ;;  %v1867_v52 = vand.u32 2147483648, %v1855_v23  ;;  %vm1861_vm15 = vweird.f32 %v1855_v23  ;;  %v1865_v53 = vand.u32 2147483647, %v1855_v23 }
0x1de2   :  { %v1868_v43 = vor.u32 1.1754944e-38, %v1867_v52  ;;  %vm1866_vm3 = vcmp.eq.f32.partialorder %v1865_v53, 8.507059e+37  ;;  %v2507_v52 = vld [vmem:[%s3891_s8] sm:$0x7] }
0x1de3   :  { %v682_v53 = vperm.slane %v2507_v52, 0  ;;  %v2156_v52 = vmul.f32 %v3632_v38, %v3453_v51 }
0x1de6   :  { %v2486_v42 = vpop.eup %2485 }
0x1de7   :  { %v1857_v7 = vmul.f32 %v2486_v42, %v1855_v23  ;;  %vm1862_vm14 = vweird.f32 %v2486_v42 }
0x1de8   :  { %vm1863_vm2 = vmor %vm1861_vm15, %vm1862_vm14  ;;  %vm2318_vm15 = vcmask 39936  }
0x1de9   :  { %v1858_v46 = vsub.f32 1.0, %v1857_v7  ;;  %v2184_v7 = vld [vmem:[%s3902_s19 + $0x10] sm:$0xff] }
0x1deb   :  { %v1859_v50 = vmul.f32 %v2486_v42, %v1858_v46  ;;  %v2182_v46 = vld [vmem:[%s3902_s19] sm:$0xff] }
0x1ded   :  { %v1860_v8 = vadd.f32 %v2486_v42, %v1859_v50  ;;  %v674_v50 = vperm.slane %v3328_v14, 0 }
0x1def   :  { %v1864_v41 = vsel %vm1863_vm2, %v2486_v42, %v1860_v8  ;;  %v2185_v42 = vld [vmem:[%s3902_s19 + $0x18] sm:$0xff]  ;;  %v677_v8 = vmul.f32 %v674_v50, %v3195_v58  ;;  %v2202_v50 = vld [vmem:[%s3902_s19 + $0xa0] sm:$0xff] }
0x1df0   :  { %v1869_v32 = vsel %vm1866_vm3, %v1868_v43, %v1864_v41 }
0x1df1   :  { %v1884_v12 = vsub.f32 1.0, %v1869_v32  ;;  %v1892_v5 = vmul.f32 %v1890_v13, %v1869_v32  ;;  %v688_v43 = vadd.f32 %v682_v53, %v677_v8 }
0x1e47   :  { %v1875_v60 = vpop.permute.xlu1 %1874 }
0x1e48   :  { %v1877_v57 = vmul.f32 %v1875_v60, %v1869_v32  ;;  %v691_v60 = vmax.f32 %v688_v43, 0.0  ;;  %v2158_v43 = vrot.slane %v2156_v52, 5 }
0x1e4a   :  { %1879 = vrot.lane.b32.xlu2 %v1877_v57, %s2534_s26 }
0x1ea4   :  { %v1880_v47 = vpop.permute.xlu2 %1879 }
0x1ea5   :  { %v1882_v59 = vadd.f32 %v1880_v47, %v3594_v44  ;;  %v2194_v44 = vld [vmem:[%s3902_s19 + $0x60] sm:$0xff] }
0x1ea6   :  { %2256 = vmatpush.msra.mxu3 %v2194_v44 }
0x1ea7   :  { %2487 = vtanh.f32 %v1882_v59 }
0x1ea8   :  { %2257 = vmatpush.msra.mxu3 %v2193_v63 }
0x1eaa   :  { %2258 = vmatpush.msra.mxu3 %v2192_v48 }
0x1eac   :  { %2259 = vmatpush.msra.mxu3 %v2191_v0 }
0x1ead   :  { %v2488_v61 = vpop.eup %2487 }
0x1eae   :  { %1886 = vrot.lane.b32.xlu0 %v2488_v61, %s2537_s12  ;;  %2260 = vmatpush.msra.mxu3 %v2190_v1 }
0x1eb0   :  { %2261 = vmatpush.msra.mxu3 %v2189_v4 }
0x1eb2   :  { %2262 = vmatpush.msra.mxu3 %v2188_v15 }
0x1eb4   :  { %2263 = vmatpush.msra.mxu3 %v2187_v11 }
0x1eb6   :  { %2264 = vmatpush.msra.mxu3 %v2186_v16 }
0x1eb8   :  { %2265 = vmatpush.msra.mxu3 %v2185_v42  ;;  %v2205_v42 = vld [vmem:[%s3902_s19 + $0xb8] sm:$0xff] }
0x1eba   :  { %2266 = vmatpush.msra.mxu3 %v2184_v7  ;;  %v2204_v7 = vld [vmem:[%s3902_s19 + $0xb0] sm:$0xff] }
0x1ebc   :  { %2267 = vmatpush.msra.mxu3 %v2183_v25  ;;  %v2203_v25 = vld [vmem:[%s3902_s19 + $0xa8] sm:$0xff] }
0x1ebe   :  { %2268 = vmatpush.msra.mxu3 %v2182_v46 }
0x1f20   :  { %v1887_v18 = vpop.permute.xlu0 %1886 }
0x1f21   :  { %v1889_v29 = vmul.f32 %v1887_v18, %v1884_v12 }
0x1f23   :  { %v1893_v30 = vadd.f32 %v1892_v5, %v1889_v29 }
0x1f25   :  { %v2138_v33 = vmul.f32 %v1893_v30, %v3453_v51  ;;  %v2146_v28 = vmul.f32 %v1893_v30, %v3468_v9  ;;  %v1895_v34 = vrot.slane %v1893_v30, 4  ;;  %v1962_v11 = vrot.slane %v1893_v30, 7  ;;  %v2212_v30 = vld [vmem:[%s3902_s19 + $0xf0] sm:$0xff] }
0x1f27   :  { %v2140_v36 = vrot.slane %v2138_v33, 1  ;;  %v3702_v37 = vadd.f32 %v2149_v31, %v2146_v28  ;;  %1896 = vrot.lane.b32.xlu1 %v1895_v34, %s2537_s12  ;;  %v2213_v31 = vld [vmem:[%s3902_s19 + $0xf8] sm:$0xff]  ;;  %v2211_v33 = vld [vmem:[%s3902_s19 + $0xe8] sm:$0xff]  ;;  %v2208_v34 = vld [vmem:[%s3902_s19 + $0xd0] sm:$0xff] }
0x1f28   :  { %2273 = vmatpush.msra.mxu1 %v2213_v31  ;;  %v2209_v28 = vld [vmem:[%s3902_s19 + $0xd8] sm:$0xff] }
0x1f29   :  { %v3705_v23 = vadd.f32 %v2140_v36, %v2137_v39  ;;  %v2207_v39 = vld [vmem:[%s3902_s19 + $0xc8] sm:$0xff]  ;;  %v2206_v36 = vld [vmem:[%s3902_s19 + $0xc0] sm:$0xff] }
0x1f2a   :  { %2274 = vmatpush.msra.mxu1 %v2212_v30 }
0x1f2c   :  { %2275 = vmatpush.msra.mxu1 %v2211_v33 }
0x1f99   :  { %v1897_v41 = vpop.permute.xlu1 %1896 }
0x1f9a   :  { %2389 = vmatmul.msk.f32.vlgmr.msrb.gmra.mxu3 %vm812_vm12, %v1897_v41 }
0x1fa2   :  { %2269 = vmatmul.f32.vlgmr.msra.gmra.mxu3 %v691_v60 }
0x201d   :  { %v1917_v32 = vpop.f32.mrf.mxu3 }
0x201e   :  { %v1921_v57 = vrot.slane %v1917_v32, 3  ;;  %v1943_v47 = vadd.f32 %v1917_v32, %v3575_v35 }
0x2020   :  { %v1923_v59 = vadd.f32 %v1921_v57, %v3609_v19  ;;  %v1945_v14 = vrot.slane %v1943_v47, 3  ;;  %v2128_v47 = vmul.f32 %v3632_v38, %v3468_v9  ;;  %v2199_v38 = vld [vmem:[%s3902_s19 + $0x88] sm:$0xff] }
0x2022   :  { %v2390_v61 = vmul.f32 -1.442695, %v1923_v59  ;;  %1946 = vrot.lane.b32.xlu2 %v1945_v14, %s2536_s27 }
0x2024   :  { %2489 = vpow2.f32 %v2390_v61 }
0x202a   :  { %v2490_v58 = vpop.eup %2489 }
0x202b   :  { %v1927_v62 = vadd.f32 1.0, %v2490_v58  ;;  %v2201_v58 = vld [vmem:[%s3902_s19 + $0x98] sm:$0xff] }
0x202d   :  { %2491 = vrcp.f32 %v1927_v62  ;;  %v1939_v63 = vand.u32 2147483648, %v1927_v62  ;;  %v1937_v0 = vand.u32 2147483647, %v1927_v62  ;;  %vm1933_vm5 = vweird.f32 %v1927_v62 }
0x202f   :  { %v1940_v4 = vor.u32 1.1754944e-38, %v1939_v63  ;;  %vm1938_vm7 = vcmp.eq.f32.partialorder %v1937_v0, 8.507059e+37 }
0x2033   :  { %v2492_v2 = vpop.eup %2491 }
0x2034   :  { %v1929_v40 = vmul.f32 %v2492_v2, %v1927_v62  ;;  %vm1934_vm4 = vweird.f32 %v2492_v2  ;;  %v2200_v62 = vld [vmem:[%s3902_s19 + $0x90] sm:$0xff] }
0x2035   :  { %vm1935_vm6 = vmor %vm1933_vm5, %vm1934_vm4 }
0x2036   :  { %v1930_v44 = vsub.f32 1.0, %v1929_v40 }
0x2038   :  { %v1931_v48 = vmul.f32 %v2492_v2, %v1930_v44  ;;  %v692_v44 = vmax.f32 %v3337_v26, 0.0 }
0x203a   :  { %v1932_v1 = vadd.f32 %v2492_v2, %v1931_v48 }
0x203c   :  { %v1936_v15 = vsel %vm1935_vm6, %v2492_v2, %v1932_v1  ;;  %v2198_v2 = vld [vmem:[%s3902_s19 + $0x80] sm:$0xff] }
0x203d   :  { %v1941_v12 = vsel %vm1938_vm7, %v1940_v4, %v1936_v15 }
0x203e   :  { %v1964_v13 = vmul.f32 %v1962_v11, %v1941_v12  ;;  %v1956_v46 = vsub.f32 1.0, %v1941_v12 }
0x207c   :  { %v1947_v16 = vpop.permute.xlu2 %1946 }
0x207d   :  { %v1949_v18 = vmul.f32 %v1947_v16, %v1941_v12 }
0x207f   :  { %1951 = vrot.lane.b32.xlu0 %v1949_v18, %s2534_s26 }
0x20f1   :  { %v1952_v21 = vpop.permute.xlu0 %1951 }
0x20f2   :  { %v1954_v5 = vadd.f32 %v1952_v21, %v3609_v19  ;;  %v2210_v19 = vld [vmem:[%s3902_s19 + $0xe0] sm:$0xff] }
0x20f3   :  { %2276 = vmatpush.msra.mxu1 %v2210_v19 }
0x20f4   :  { %2493 = vtanh.f32 %v1954_v5 }
0x20f5   :  { %2277 = vmatpush.msra.mxu1 %v2209_v28 }
0x20f7   :  { %2278 = vmatpush.msra.mxu1 %v2208_v34 }
0x20f9   :  { %2279 = vmatpush.msra.mxu1 %v2207_v39 }
0x20fa   :  { %v2494_v29 = vpop.eup %2493 }
0x20fb   :  { %1958 = vrot.lane.b32.xlu1 %v2494_v29, %s2537_s12  ;;  %2280 = vmatpush.msra.mxu1 %v2206_v36 }
0x20fd   :  { %2281 = vmatpush.msra.mxu1 %v2205_v42  ;;  %v2219_v42 = vld [vmem:[%s3902_s19 + $0x128] sm:$0xf] }
0x20fe   :  { %2396 = vmatpush.msk.msrb.mxu2 %vm364_vm0, %v2219_v42 }
0x20ff   :  { %2282 = vmatpush.msra.mxu1 %v2204_v7  ;;  %v2218_v7 = vld [vmem:[%s3902_s19 + $0x120] sm:$0xff] }
0x2100   :  { %2304 = vmatpush.msrb.mxu2 %v2218_v7 }
0x2101   :  { %2283 = vmatpush.msra.mxu1 %v2203_v25 }
0x2103   :  { %2284 = vmatpush.msra.mxu1 %v2202_v50 }
0x2105   :  { %2285 = vmatpush.msra.mxu1 %v2201_v58 }
0x2107   :  { %2286 = vmatpush.msra.mxu1 %v2200_v62  ;;  %v2217_v62 = vld [vmem:[%s3902_s19 + $0x118] sm:$0xff] }
0x2108   :  { %2305 = vmatpush.msrb.mxu2 %v2217_v62 }
0x2109   :  { %2287 = vmatpush.msra.mxu1 %v2199_v38  ;;  %v2216_v38 = vld [vmem:[%s3902_s19 + $0x110] sm:$0xff] }
0x210a   :  { %2306 = vmatpush.msrb.mxu2 %v2216_v38  ;;  %v2143_v38 = vperm.slane %v3705_v23, 3 }
0x210b   :  { %2288 = vmatpush.msra.mxu1 %v2198_v2  ;;  %v2214_v2 = vld [vmem:[%s3902_s19 + $0x100] sm:$0xff] }
0x216d   :  { %v1959_v8 = vpop.permute.xlu1 %1958 }
0x216e   :  { %v1961_v53 = vmul.f32 %v1959_v8, %v1956_v46 }
0x2170   :  { %v3769_v41 = vadd.f32 %v1964_v13, %v1961_v53 }
0x2172   :  { %v2129_v60 = vmul.f32 %v3769_v41, %v3453_v51  ;;  %v2155_v32 = vmul.f32 %v3769_v41, %v3468_v9  ;;  %v1967_v57 = vrot.slane %v3769_v41, 5  ;;  %v2034_v46 = vrot.slane %v3769_v41, 7 }
0x2173   :  { %v2119_v41 = vmul.f32 %v3616_v20, %v3468_v9 }
0x2174   :  { %v2131_v59 = vrot.slane %v2129_v60, 3  ;;  %1968 = vrot.lane.b32.xlu2 %v1967_v57, %s2537_s12  ;;  %v3779_v14 = vadd.f32 %v2158_v43, %v2155_v32 }
0x2176   :  { %v3781_v61 = vadd.f32 %v2131_v59, %v2128_v47 }
0x21ce   :  { %v1969_v40 = vpop.permute.xlu2 %1968 }
0x21cf   :  { %2391 = vmatmul.msk.f32.vlgmr.msrb.gmra.mxu1 %vm812_vm12, %v1969_v40 }
0x21d7   :  { %2289 = vmatmul.f32.vlgmr.msra.gmra.mxu1 %v692_v44  ;;  %v693_v44 = vmax.f32 %v3334_v24, 0.0 }
0x224c   :  { %v1989_v63 = vpop.f32.mrf.mxu1 }
0x224d   :  { %v2015_v48 = vadd.f32 %v1989_v63, %v3575_v35  ;;  %v1993_v1 = vrot.slane %v1989_v63, 2 }
0x224f   :  { %v2017_v0 = vrot.slane %v2015_v48, 2  ;;  %v1995_v4 = vadd.f32 %v1993_v1, %v3623_v55 }
0x2251   :  { %2018 = vrot.lane.b32.xlu0 %v2017_v0, %s2536_s27  ;;  %v2392_v15 = vmul.f32 -1.442695, %v1995_v4 }
0x2253   :  { %2495 = vpow2.f32 %v2392_v15 }
0x2259   :  { %v2496_v11 = vpop.eup %2495 }
0x225a   :  { %v1999_v12 = vadd.f32 1.0, %v2496_v11 }
0x225c   :  { %2497 = vrcp.f32 %v1999_v12  ;;  %v2011_v5 = vand.u32 2147483648, %v1999_v12  ;;  %vm2005_vm9 = vweird.f32 %v1999_v12  ;;  %v2009_v29 = vand.u32 2147483647, %v1999_v12 }
0x225e   :  { %v2012_v30 = vor.u32 1.1754944e-38, %v2011_v5  ;;  %vm2010_vm11 = vcmp.eq.f32.partialorder %v2009_v29, 8.507059e+37 }
0x2262   :  { %v2498_v13 = vpop.eup %2497 }
0x2263   :  { %v2001_v16 = vmul.f32 %v2498_v13, %v1999_v12  ;;  %vm2006_vm8 = vweird.f32 %v2498_v13 }
0x2264   :  { %vm2007_vm10 = vmor %vm2005_vm9, %vm2006_vm8 }
0x2265   :  { %v2002_v18 = vsub.f32 1.0, %v2001_v16 }
0x2267   :  { %v2003_v21 = vmul.f32 %v2498_v13, %v2002_v18 }
0x2269   :  { %v2004_v26 = vadd.f32 %v2498_v13, %v2003_v21 }
0x226b   :  { %v2008_v31 = vsel %vm2007_vm10, %v2498_v13, %v2004_v26 }
0x226c   :  { %v2013_v19 = vsel %vm2010_vm11, %v2012_v30, %v2008_v31 }
0x226d   :  { %v2028_v25 = vsub.f32 1.0, %v2013_v19  ;;  %v2036_v8 = vmul.f32 %v2034_v46, %v2013_v19 }
0x22c3   :  { %v2019_v33 = vpop.permute.xlu0 %2018 }
0x22c4   :  { %v2021_v28 = vmul.f32 %v2019_v33, %v2013_v19 }
0x22c6   :  { %2023 = vrot.lane.b32.xlu1 %v2021_v28, %s2534_s26 }
0x2338   :  { %v2024_v34 = vpop.permute.xlu1 %2023 }
0x2339   :  { %v2026_v39 = vadd.f32 %v2024_v34, %v3623_v55  ;;  %v2165_v55 = vmul.f32 %v3616_v20, %v3453_v51  ;;  %v2215_v20 = vld [vmem:[%s3902_s19 + $0x108] sm:$0xff] }
0x233a   :  { %2307 = vmatpush.msrb.mxu2 %v2215_v20 }
0x233b   :  { %2499 = vtanh.f32 %v2026_v39  ;;  %v2167_v43 = vrot.slane %v2165_v55, 3  ;;  %v2221_v39 = vld [vmem:[%s3903_s20 + $0x8] sm:$0xff] }
0x233c   :  { %2308 = vmatpush.msrb.mxu2 %v2214_v2  ;;  %2241 = vmatpush.msrb.mxu0 %v2221_v39 }
0x2341   :  { %v2500_v36 = vpop.eup %2499 }
0x2342   :  { %2030 = vrot.lane.b32.xlu2 %v2500_v36, %s2537_s12  ;;  %v2220_v36 = vld [vmem:[%s3903_s20] sm:$0xff] }
0x2343   :  { %2242 = vmatpush.msrb.mxu0 %v2220_v36 }
0x239c   :  { %v2031_v50 = vpop.permute.xlu2 %2030 }
0x239d   :  { %v2033_v52 = vmul.f32 %v2031_v50, %v2028_v25 }
0x239f   :  { %v3813_v53 = vadd.f32 %v2036_v8, %v2033_v52 }
0x23a1   :  { %v2120_v60 = vmul.f32 %v3813_v53, %v3453_v51  ;;  %v2164_v32 = vmul.f32 %v3813_v53, %v3468_v9  ;;  %v2039_v57 = vrot.slane %v3813_v53, 6  ;;  %v2106_v7 = vrot.slane %v3813_v53, 7 }
0x23a3   :  { %v2122_v47 = vrot.slane %v2120_v60, 5  ;;  %2040 = vrot.lane.b32.xlu0 %v2039_v57, %s2537_s12  ;;  %v3823_v59 = vadd.f32 %v2167_v43, %v2164_v32  ;;  %v2110_v60 = vmul.f32 %v3600_v6, %v3468_v9 }
0x23a5   :  { %v3825_v58 = vadd.f32 %v2122_v47, %v2119_v41  ;;  %v2134_v47 = vperm.slane %v3781_v61, 2 }
0x23a7   :  { %v2125_v53 = vperm.slane %v3825_v58, 1  ;;  %v2161_v58 = vperm.slane %v3779_v14, 5  ;;  %v2270_v14 = vpop.f32.mrf.mxu3 }
0x23a9   :  { %v2126_v20 = vmul.f32 %v3538_v56, %v2125_v53  ;;  %v2162_v56 = vmul.f32 %v3561_v17, %v2161_v58  ;;  %v2408_v17 = vld [vmem:[%s3904_s21] ss:$0 sm:$0xff] }
0x2415   :  { %v2041_v40 = vpop.permute.xlu0 %2040 }
0x2416   :  { %2393 = vmatmul.msk.f32.vlgmr.msra.gmra.mxu2 %vm812_vm12, %v2041_v40  ;;  %v2135_v40 = vmul.f32 %v3544_v49, %v2134_v47 }
0x241e   :  { %2397 = vmatmul.msk.f32.vlgmr.msrb.gmra.mxu2 %vm315_vm1, %v693_v44 }
0x2499   :  { %v2061_v63 = vpop.f32.mrf.mxu2 }
0x249a   :  { %v2087_v48 = vadd.f32 %v2061_v63, %v3575_v35  ;;  %v2065_v1 = vrot.slane %v2061_v63, 1 }
0x249c   :  { %v2089_v0 = vrot.slane %v2087_v48, 1  ;;  %v2067_v4 = vadd.f32 %v2065_v1, %v3641_v54  ;;  %v2170_v48 = vperm.slane %v3823_v59, 6  ;;  %v2290_v59 = vpop.f32.mrf.mxu1 }
0x249e   :  { %2090 = vrot.lane.b32.xlu1 %v2089_v0, %s2536_s27  ;;  %v2394_v15 = vmul.f32 -1.442695, %v2067_v4 }
0x24a0   :  { %2501 = vpow2.f32 %v2394_v15 }
0x24a6   :  { %v2502_v11 = vpop.eup %2501 }
0x24a7   :  { %v2071_v12 = vadd.f32 1.0, %v2502_v11 }
0x24a9   :  { %2503 = vrcp.f32 %v2071_v12  ;;  %v2083_v26 = vand.u32 2147483648, %v2071_v12  ;;  %vm2077_vm1 = vweird.f32 %v2071_v12  ;;  %v2081_v35 = vand.u32 2147483647, %v2071_v12 }
0x24ab   :  { %v2084_v29 = vor.u32 1.1754944e-38, %v2083_v26  ;;  %vm2082_vm14 = vcmp.eq.f32.partialorder %v2081_v35, 8.507059e+37 }
0x24af   :  { %v2504_v13 = vpop.eup %2503 }
0x24b0   :  { %v2073_v16 = vmul.f32 %v2504_v13, %v2071_v12  ;;  %vm2078_vm0 = vweird.f32 %v2504_v13  ;;  %v2310_v12 = vpop.f32.mrf.mxu2 }
0x24b1   :  { %vm2079_vm13 = vmor %vm2077_vm1, %vm2078_vm0 }
0x24b2   :  { %v2074_v18 = vsub.f32 1.0, %v2073_v16 }
0x24b4   :  { %v2075_v24 = vmul.f32 %v2504_v13, %v2074_v18 }
0x24b6   :  { %v2076_v21 = vadd.f32 %v2504_v13, %v2075_v24 }
0x24b8   :  { %v2080_v5 = vsel %vm2079_vm13, %v2504_v13, %v2076_v21 }
0x24b9   :  { %v2085_v30 = vsel %vm2082_vm14, %v2084_v29, %v2080_v5 }
0x24ba   :  { %v2100_v42 = vsub.f32 1.0, %v2085_v30  ;;  %v2108_v46 = vmul.f32 %v2106_v7, %v2085_v30 }
0x2510   :  { %v2091_v31 = vpop.permute.xlu1 %2090 }
0x2511   :  { %v2093_v33 = vmul.f32 %v2091_v31, %v2085_v30 }
0x2513   :  { %2095 = vrot.lane.b32.xlu2 %v2093_v33, %s2534_s26 }
0x256d   :  { %v2096_v19 = vpop.permute.xlu2 %2095 }
0x256e   :  { %v2098_v28 = vadd.f32 %v2096_v19, %v3641_v54  ;;  %v2174_v54 = vmul.f32 %v3600_v6, %v3453_v51  ;;  %v2144_v6 = vmul.f32 %v3551_v3, %v2143_v38 }
0x2570   :  { %2505 = vtanh.f32 %v2098_v28  ;;  %v2176_v8 = vrot.slane %v2174_v54, 1 }
0x2576   :  { %v2506_v34 = vpop.eup %2505 }
0x2577   :  { %2102 = vrot.lane.b32.xlu0 %v2506_v34, %s2537_s12 }
0x25e9   :  { %v2103_v25 = vpop.permute.xlu0 %2102 }
0x25ea   :  { %v2105_v50 = vmul.f32 %v2103_v25, %v2100_v42 }
0x25ec   :  { %v2109_v55 = vadd.f32 %v2108_v46, %v2105_v50 }
0x25ee   :  { %v2111_v52 = vmul.f32 %v2109_v55, %v3453_v51  ;;  %v2173_v43 = vmul.f32 %v2109_v55, %v3468_v9  ;;  %v2152_v51 = vperm.slane %v3702_v37, 4  ;;  %v2171_v37 = vmul.f32 %v3566_v22, %v2170_v48 }
0x25f0   :  { %v2113_v32 = vrot.slane %v2111_v52, 7  ;;  %v2178_v57 = vadd.f32 %v2176_v8, %v2173_v43  ;;  %v2153_v61 = vmul.f32 %v3556_v10, %v2152_v51 }
0x25f2   :  { %v2115_v41 = vadd.f32 %v2113_v32, %v2110_v60  ;;  %v2179_v23 = vperm.slane %v2178_v57, 7 }
0x25f4   :  { %v2116_v62 = vperm.slane %v2115_v41, 0  ;;  %v2180_v49 = vmul.f32 %v3570_v27, %v2179_v23 }
0x25f6   :  { %v2117_v2 = vmul.f32 %v3533_v45, %v2116_v62 }
0x25f8   :  { %v2127_v44 = vadd.f32 %v2126_v20, %v2117_v2 }
0x25fa   :  { %v2136_v9 = vadd.f32 %v2135_v40, %v2127_v44 }
0x25fc   :  { %v2145_v63 = vadd.f32 %v2144_v6, %v2136_v9 }
0x25fe   :  { %v2154_v0 = vadd.f32 %v2153_v61, %v2145_v63 }
0x2600   :  { %v2163_v45 = vadd.f32 %v2162_v56, %v2154_v0 }
0x2602   :  { %v2172_v1 = vadd.f32 %v2171_v37, %v2163_v45 }
0x2604   :  { %v2181_v4 = vadd.f32 %v2180_v49, %v2172_v1 }
0x2606   :  { %2223 = vrot.lane.b32.xlu1 %v2181_v4, %s2537_s12 }
0x2678   :  { %v2224_v3 = vpop.permute.xlu1 %2223 }
0x2679   :  { %2395 = vmatmul.msk.f32.vlgmr.msrb.gmra.mxu0 %vm812_vm12, %v2224_v3 }
0x26f6   :  { %v2244_v10 = vpop.f32.mrf.mxu0 }
0x26f7   :  { %v2271_v15 = vadd.f32 %v2270_v14, %v2244_v10 }
0x26f9   :  { %v2291_v11 = vadd.f32 %v2290_v59, %v2271_v15 }
0x26fb   :  { %v2311_v22 = vadd.f32 %v2310_v12, %v2291_v11 }
0x26fd   :  { %v2317_v27 = vadd.f32 %v2408_v17, %v2311_v22 }
0x26ff   :  { %2319 = vst.msk [vmem:[#allocation2] sm:$0xff] %vm2318_vm15, %v2317_v27 }
0x2700   :  { %2330 = dma.vmem_to_hbm [thread:$0]  %s2326_s0, 128, %s2328_s4, [#allocation3]  }
0x2701   :  { %2532 = dma.done.wait [#allocation3], 128  }
0x2702   :  { %2533 = vsyncadd [#allocation3], 4294967168 }
0x2703   :  { %2335 = vsyncpa [#allocation3], 1 }

</bundles_post_ra>
